<compile_context>
chip_gen: v7x
topology: tpu7x:2x2x1
jax: 0.10.0
libtpu: 0.0.40
codegen_flags: <defaults>
</compile_context>

<pallas_src>
import functools
import sys

import numpy as np
import jax
import jax.numpy as jnp
from jax import lax
from jax.experimental import pallas as pl
from jax.experimental.pallas import tpu as pltpu


# --------------------------------------------------------------------------
# Kernel
# --------------------------------------------------------------------------
def bottleneck_kernel(x_ref, w1_ref, b1_ref, w2_ref, b2_ref, w3_ref, b3_ref,
                      out_ref, pad_ref, *col_scratch, use_col=True):
    # Per grid step:
    #   x_ref  : (B, H, W, Cin)   f32, Cin == 4*P (residual add requires it)
    #   w1_ref : (Cin, P)         bf16, 1x1 conv weight, BN1 scale folded in
    #   w2_ref : (9*P, P)         bf16, 3x3 conv weight, im2col tap-major rows
    #   w3_ref : (P, Cout)        bf16, 1x1 conv weight, BN3 scale folded in
    #   b*_ref : (1, C)           f32 folded BatchNorm biases
    #   out_ref: (B, H, W, Cout)
    #   pad_ref: (B, H+2, W+2, P) f32 VMEM scratch (padded conv2 input)
    #   col_scratch[0] (use_col): (B, H, W, 9*P) f32 VMEM im2col scratch
    B, H, W, Cin = x_ref.shape
    P = w1_ref.shape[1]
    Cout = w3_ref.shape[1]
    M = B * H * W

    # ---- conv1 (1x1, BN folded) + relu : bf16 MXU matmul, f32 accumulate ----
    x1 = x_ref[...].reshape(M, Cin).astype(jnp.bfloat16)
    h1 = jnp.dot(x1, w1_ref[...], preferred_element_type=jnp.float32)
    h1 = jnp.maximum(h1 + b1_ref[...], 0.0)

    # ---- conv2 (3x3, stride=1, pad=1, BN folded) + relu ----
    # Write the interior of the padded scratch; refresh only the 1-px zero
    # border each step (the interior is fully overwritten every step, and a
    # per-step border refresh stays correct when the parallel batch axis is
    # sharded across v7x's two TensorCores).
    pad_ref[:, 1:H + 1, 1:W + 1, :] = h1.reshape(B, H, W, P)
    zrow = jnp.zeros((B, 1, W + 2, P), jnp.float32)
    zcol = jnp.zeros((B, H, 1, P), jnp.float32)
    pad_ref[:, 0:1, :, :] = zrow
    pad_ref[:, H + 1:H + 2, :, :] = zrow
    pad_ref[:, 1:H + 1, 0:1, :] = zcol
    pad_ref[:, 1:H + 1, W + 1:W + 2, :] = zcol

    if use_col:
        # Build the im2col operand in place (no concatenate intermediate):
        # tap t lands in lane slot [t*P, (t+1)*P). Then one fat-K MXU matmul.
        col_ref = col_scratch[0]
        t = 0
        for kh in range(3):
            for kw in range(3):
                col_ref[:, :, :, t * P:(t + 1) * P] = \
                    pad_ref[:, kh:kh + H, kw:kw + W, :]
                t += 1
        col = col_ref[...].reshape(M, 9 * P).astype(jnp.bfloat16)
        h2 = jnp.dot(col, w2_ref[...], preferred_element_type=jnp.float32)
    else:
        # Conservative fallback: nine K=P matmuls accumulated in f32.
        h2 = jnp.zeros((M, P), jnp.float32)
        t = 0
        for kh in range(3):
            for kw in range(3):
                tap = pad_ref[:, kh:kh + H, kw:kw + W, :].reshape(M, P)
                h2 = h2 + jnp.dot(tap.astype(jnp.bfloat16),
                                  w2_ref[t * P:(t + 1) * P, :],
                                  preferred_element_type=jnp.float32)
                t += 1
    h2 = jnp.maximum(h2 + b2_ref[...], 0.0)

    # ---- conv3 (1x1, BN folded) + residual add + relu (f32 epilogue) ----
    h3 = jnp.dot(h2.astype(jnp.bfloat16), w3_ref[...],
                 preferred_element_type=jnp.float32)
    # Re-read the residual here (cheap VMEM vld — the block is resident)
    # instead of keeping the conv1 input live across all three matmuls.
    res = x_ref[...].reshape(M, Cout).astype(jnp.float32)
    out = jnp.maximum(h3 + b3_ref[...] + res, 0.0)
    out_ref[...] = out.reshape(B, H, W, Cout).astype(out_ref.dtype)


# --------------------------------------------------------------------------
# Host-side helpers
# --------------------------------------------------------------------------
def fold_bn_into_weights(params):
    """Fold per-channel BN scales into the conv weights (bf16 weights,
    f32 biases for the f32 epilogue)."""
    (w1, s1, b1, w2, s2, b2, w3, s3, b3) = params
    P = w1.shape[1]
    w1f = (w1 * s1).astype(jnp.bfloat16)                      # (Cin, P)
    w2f = (w2.reshape(9 * P, P) * s2).astype(jnp.bfloat16)    # (9P, P) tap-major
    w3f = (w3 * s3).astype(jnp.bfloat16)                      # (P, 4P)
    return (w1f, b1.astype(jnp.float32), w2f, b2.astype(jnp.float32),
            w3f, b3.astype(jnp.float32))


def _vmem_capacity_bytes():
    """Per-core VMEM capacity; conservative 64 MiB (v7x) if the query fails."""
    try:
        info = pltpu.get_tpu_info()
        cap = getattr(info, "vmem_capacity_bytes", None)
        if cap:
            return int(cap)
    except Exception:  # optional hardware query only
        pass
    return 64 << 20


def _vmem_footprint_bytes(bt, H, W, Cin, P, Cout, use_col):
    """Rough per-step VMEM footprint: double-buffered x/out blocks, scratches,
    live intermediates and (double-buffered) weights/biases."""
    rows = bt * H * W
    f = 2 * bt * H * W * Cin * 4          # x block (double-buffered, f32)
    f += 2 * bt * H * W * Cout * 4        # out block (double-buffered, f32)
    f += bt * (H + 2) * (W + 2) * P * 4   # padded conv2 scratch (f32)
    if use_col:
        f += bt * H * W * 9 * P * 4       # im2col scratch (f32)
    # live intermediates: h1(f32), col bf16 copy, h2(f32), h3(f32), residual(f32)
    f += rows * (P * 4 + 9 * P * 2 + P * 4 + Cout * 4 + Cout * 4)
    # weights (bf16) + biases (f32), double-buffered by the pipeline
    f += 2 * ((Cin * P + 9 * P * P + P * Cout) * 2 + (2 * P + Cout) * 4)
    return f


def _pick_batch_tile(N, H, W, Cin, P, Cout, use_col, vmem_budget,
                     target_rows=512):
    """Largest divisor bt of N whose footprint fits the VMEM budget, stopping
    once >= target_rows matmul rows per grid step are packed."""
    best = 1
    for b in range(1, N + 1):
        if N % b:
            continue
        if _vmem_footprint_bytes(b, H, W, Cin, P, Cout, use_col) > vmem_budget:
            break
        best = b
        if b * H * W >= target_rows:
            break
    return best


def _forward_nhwc(x, params, *, use_col):
    w1f, b1, w2f, b2, w3f, b3 = fold_bn_into_weights(params)
    Cin, P = w1f.shape
    Cout = w3f.shape[1]
    N, H, W, Cin_x = x.shape
    assert Cin_x == Cin and Cin == 4 * P, \
        "residual add requires inplanes == 4 * planes (stride=1, no downsample)"

    cap = _vmem_capacity_bytes()
    bt = _pick_batch_tile(N, H, W, Cin, P, Cout, use_col,
                          vmem_budget=int(0.7 * cap))
    fp = _vmem_footprint_bytes(bt, H, W, Cin, P, Cout, use_col)
    vmem_limit = int(min(cap, max(32 << 20, fp * 5 // 4 + (2 << 20))))

    scratch = [pltpu.VMEM((bt, H + 2, W + 2, P), jnp.float32)]
    if use_col:
        scratch.append(pltpu.VMEM((bt, H, W, 9 * P), jnp.float32))

    grid_spec = pltpu.PrefetchScalarGridSpec(
        num_scalar_prefetch=0,
        grid=(N // bt,),
        in_specs=[
            pl.BlockSpec((bt, H, W, Cin), lambda n: (n, 0, 0, 0)),   # x
            pl.BlockSpec((Cin, P),        lambda n: (0, 0)),         # w1 (bf16)
            pl.BlockSpec((1, P),          lambda n: (0, 0)),         # b1
            pl.BlockSpec((9 * P, P),      lambda n: (0, 0)),         # w2 (bf16)
            pl.BlockSpec((1, P),          lambda n: (0, 0)),         # b2
            pl.BlockSpec((P, Cout),       lambda n: (0, 0)),         # w3 (bf16)
            pl.BlockSpec((1, Cout),       lambda n: (0, 0)),         # b3
        ],
        out_specs=pl.BlockSpec((bt, H, W, Cout), lambda n: (n, 0, 0, 0)),
        scratch_shapes=scratch,
    )

    flops = 2 * N * H * W * (Cin * P + 9 * P * P + P * Cout)
    bytes_accessed = (4 * x.size + 4 * N * H * W * Cout
                      + 2 * (w1f.size + w2f.size + w3f.size)
                      + 4 * (b1.size + b2.size + b3.size))
    cost = pl.CostEstimate(flops=int(flops), transcendentals=0,
                           bytes_accessed=int(bytes_accessed))

    return pl.pallas_call(
        functools.partial(bottleneck_kernel, use_col=use_col),
        out_shape=jax.ShapeDtypeStruct((N, H, W, Cout), x.dtype),
        grid_spec=grid_spec,
        compiler_params=pltpu.CompilerParams(
            dimension_semantics=("parallel",),
            vmem_limit_bytes=vmem_limit),
        cost_estimate=cost,
    )(x, w1f, b1, w2f, b2, w3f, b3)


def bottleneck_forward_nhwc(x_nhwc, params):
    """NHWC entry point (avoids the NCHW boundary transposes)."""
    try:
        return _forward_nhwc(x_nhwc, params, use_col=True)
    except (pltpu.LoweringException, NotImplementedError) as e:
        print("WARNING: im2col conv2 path failed to lower "
              f"({type(e).__name__}); falling back to 9-matmul path.",
              file=sys.stderr)
        return _forward_nhwc(x_nhwc, params, use_col=False)


def bottleneck_forward(x_nchw, params):
    """x_nchw: (N, Cin, H, W) with Cin == 4*planes. Returns NCHW."""
    x = jnp.transpose(x_nchw, (0, 2, 3, 1))           # NCHW -> NHWC
    out = bottleneck_forward_nhwc(x, params)
    return jax.block_until_ready(jnp.transpose(out, (0, 3, 1, 2)))


# --------------------------------------------------------------------------
# Parameters & pure-JAX reference
# --------------------------------------------------------------------------
def make_params(key, inplanes, planes, eps=1e-5):
    """Deterministic conv weights + BN scale/bias (raw f32, un-fused)."""
    ks = jax.random.split(key, 16)

    def bn_fold(kg, kb, km, kv, c):
        gamma = 0.5 + jax.random.uniform(kg, (c,), jnp.float32)
        beta = 0.1 * jax.random.normal(kb, (c,), jnp.float32)
        mean = 0.1 * jax.random.normal(km, (c,), jnp.float32)
        var = 0.5 + jax.random.uniform(kv, (c,), jnp.float32)
        scale = gamma / jnp.sqrt(var + eps)
        bias = beta - mean * scale
        return scale.reshape(1, c), bias.reshape(1, c)

    # conv1: PyTorch (planes, inplanes, 1, 1) -> (inplanes, planes)
    w1 = 0.1 * jax.random.normal(ks[0], (inplanes, planes), jnp.float32)
    s1, b1 = bn_fold(ks[1], ks[2], ks[3], ks[4], planes)
    # conv2: PyTorch (planes, planes, 3, 3) -> taps (9, planes_in, planes_out)
    w2 = 0.1 * jax.random.normal(ks[5], (9, planes, planes), jnp.float32)
    s2, b2 = bn_fold(ks[6], ks[7], ks[8], ks[9], planes)
    # conv3: PyTorch (4*planes, planes, 1, 1) -> (planes, 4*planes)
    w3 = 0.1 * jax.random.normal(ks[10], (planes, 4 * planes), jnp.float32)
    s3, b3 = bn_fold(ks[11], ks[12], ks[13], ks[14], 4 * planes)
    return (w1, s1, b1, w2, s2, b2, w3, s3, b3)


def reference_forward(x_nchw, params):
    """Pure-JAX f32 reference using lax convolutions (NHWC / HWIO), un-fused BN."""
    (w1, s1, b1, w2, s2, b2, w3, s3, b3) = params
    x = jnp.transpose(x_nchw, (0, 2, 3, 1))
    P = w1.shape[1]
    dn = ("NHWC", "HWIO", "NHWC")

    def conv(a, w_hwio, pad):
        return lax.conv_general_dilated(a, w_hwio, (1, 1), pad,
                                        dimension_numbers=dn)

    h = conv(x, w1.reshape(1, 1, -1, P), "VALID")
    h = jnp.maximum(h * s1.reshape(1, 1, 1, -1) + b1.reshape(1, 1, 1, -1), 0.0)
    h = conv(h, w2.reshape(3, 3, P, P), "SAME")
    h = jnp.maximum(h * s2.reshape(1, 1, 1, -1) + b2.reshape(1, 1, 1, -1), 0.0)
    h = conv(h, w3.reshape(1, 1, P, 4 * P), "VALID")
    h = h * s3.reshape(1, 1, 1, -1) + b3.reshape(1, 1, 1, -1)
    out = jnp.maximum(h + x, 0.0)
    return jnp.transpose(out, (0, 3, 1, 2))


# --------------------------------------------------------------------------
# Self-test
# --------------------------------------------------------------------------
if __name__ == "__main__":
    # Bottleneck(inplanes=16, planes=4, stride=1, downsample=None)
    N, planes, H, W = 2, 4, 16, 16
    inplanes = 4 * planes  # 16, so the residual add is well-defined

    key = jax.random.PRNGKey(0)
    kx, kp = jax.random.split(key)
    x = jax.random.normal(kx, (N, inplanes, H, W), jnp.float32)  # NCHW input
    params = make_params(kp, inplanes, planes)

    out = jax.block_until_ready(bottleneck_forward(x, params))
    ref = jax.block_until_ready(reference_forward(x, params))

    assert out.shape == (N, inplanes, H, W)
    # bf16 matmul operands vs. an all-f32 reference -> allow small drift.
    np.testing.assert_allclose(np.asarray(out), np.asarray(ref),
                               rtol=2e-2, atol=2e-2)
    print("KERNEL_OK")
</pallas_src>

<mosaic_0001>
module attributes {stable_mosaic.version = 11 : i64} {
  func.func @bottleneck_kernel(%arg0: i32, %arg1: memref<2x16x16x16xf32, #tpu.memory_space<vmem>>, %arg2: memref<16x4xbf16, #tpu.memory_space<vmem>>, %arg3: memref<1x4xf32, #tpu.memory_space<vmem>>, %arg4: memref<36x4xbf16, #tpu.memory_space<vmem>>, %arg5: memref<1x4xf32, #tpu.memory_space<vmem>>, %arg6: memref<4x16xbf16, #tpu.memory_space<vmem>>, %arg7: memref<1x16xf32, #tpu.memory_space<vmem>>, %arg8: memref<2x16x16x16xf32, #tpu.memory_space<vmem>>, %arg9: memref<2x18x18x4xf32, #tpu.memory_space<vmem>>, %arg10: memref<2x16x16x36xf32, #tpu.memory_space<vmem>>) attributes {dimension_semantics = [#tpu.dimension_semantics<parallel>], iteration_bounds = array<i64: 1>, scalar_prefetch = 0 : i64, scratch_operands = 2 : i64, tpu.core_type = #tpu.core_type<tc>, window_params = [{transform_indices = @transform_0, window_bounds = array<i64: 2, 16, 16, 16>}, {pipeline_mode = #tpu.pipeline_mode<synchronous>, transform_indices = @transform_1, window_bounds = array<i64: 16, 4>}, {pipeline_mode = #tpu.pipeline_mode<synchronous>, transform_indices = @transform_2, window_bounds = array<i64: 1, 4>}, {pipeline_mode = #tpu.pipeline_mode<synchronous>, transform_indices = @transform_3, window_bounds = array<i64: 36, 4>}, {pipeline_mode = #tpu.pipeline_mode<synchronous>, transform_indices = @transform_4, window_bounds = array<i64: 1, 4>}, {pipeline_mode = #tpu.pipeline_mode<synchronous>, transform_indices = @transform_5, window_bounds = array<i64: 4, 16>}, {pipeline_mode = #tpu.pipeline_mode<synchronous>, transform_indices = @transform_6, window_bounds = array<i64: 1, 16>}, {transform_indices = @transform_7, window_bounds = array<i64: 2, 16, 16, 16>}]} {
    %c0 = arith.constant 0 : index
    %c0_0 = arith.constant 0 : index
    %c0_1 = arith.constant 0 : index
    %c0_2 = arith.constant 0 : index
    %0 = vector.load %arg1[%c0, %c0_0, %c0_1, %c0_2] : memref<2x16x16x16xf32, #tpu.memory_space<vmem>>, vector<2x16x16x16xf32>
    %1 = vector.shape_cast %0 : vector<2x16x16x16xf32> to vector<512x16xf32>
    %2 = arith.truncf %1 : vector<512x16xf32> to vector<512x16xbf16>
    %c0_3 = arith.constant 0 : index
    %c0_4 = arith.constant 0 : index
    %3 = vector.load %arg2[%c0_3, %c0_4] : memref<16x4xbf16, #tpu.memory_space<vmem>>, vector<16x4xbf16>
    %cst = arith.constant dense<0.000000e+00> : vector<512x4xf32>
    %4 = tpu.matmul %2, %3, %cst {dimension_numbers = #tpu.dot_dimension_numbers<[1], [0], [0], [1], [0, 0, 1, 1], [], []>} : vector<512x16xbf16>, vector<16x4xbf16>, vector<512x4xf32> -> vector<512x4xf32>
    %c0_5 = arith.constant 0 : index
    %c0_6 = arith.constant 0 : index
    %5 = vector.load %arg3[%c0_5, %c0_6] : memref<1x4xf32, #tpu.memory_space<vmem>>, vector<1x4xf32>
    %6 = vector.broadcast %5 : vector<1x4xf32> to vector<512x4xf32>
    %7 = arith.addf %4, %6 : vector<512x4xf32>
    %cst_7 = arith.constant 0.000000e+00 : f32
    %8 = vector.broadcast %cst_7 : f32 to vector<512x4xf32>
    %9 = arith.maximumf %7, %8 : vector<512x4xf32>
    %10 = vector.shape_cast %9 : vector<512x4xf32> to vector<2x16x16x4xf32>
    %c0_8 = arith.constant 0 : index
    %c1 = arith.constant 1 : index
    %c1_9 = arith.constant 1 : index
    %c0_10 = arith.constant 0 : index
    %11 = vector.load %arg9[%c0_8, %c1, %c1_9, %c0_10] : memref<2x18x18x4xf32, #tpu.memory_space<vmem>>, vector<2x16x16x4xf32>
    tpu.vector_store %arg9[%c0_8, %c1, %c1_9, %c0_10], %10 {strides = array<i32>} : memref<2x18x18x4xf32, #tpu.memory_space<vmem>>, vector<2x16x16x4xf32>,
    %cst_11 = arith.constant 0.000000e+00 : f32
    %12 = vector.broadcast %cst_11 : f32 to vector<2x1x18x4xf32>
    %cst_12 = arith.constant 0.000000e+00 : f32
    %13 = vector.broadcast %cst_12 : f32 to vector<2x16x1x4xf32>
    %c0_13 = arith.constant 0 : index
    %c0_14 = arith.constant 0 : index
    %c0_15 = arith.constant 0 : index
    %c0_16 = arith.constant 0 : index
    %14 = vector.load %arg9[%c0_13, %c0_14, %c0_15, %c0_16] : memref<2x18x18x4xf32, #tpu.memory_space<vmem>>, vector<2x1x18x4xf32>
    tpu.vector_store %arg9[%c0_13, %c0_14, %c0_15, %c0_16], %12 {strides = array<i32>} : memref<2x18x18x4xf32, #tpu.memory_space<vmem>>, vector<2x1x18x4xf32>,
    %c0_17 = arith.constant 0 : index
    %c17 = arith.constant 17 : index
    %c0_18 = arith.constant 0 : index
    %c0_19 = arith.constant 0 : index
    %15 = vector.load %arg9[%c0_17, %c17, %c0_18, %c0_19] : memref<2x18x18x4xf32, #tpu.memory_space<vmem>>, vector<2x1x18x4xf32>
    tpu.vector_store %arg9[%c0_17, %c17, %c0_18, %c0_19], %12 {strides = array<i32>} : memref<2x18x18x4xf32, #tpu.memory_space<vmem>>, vector<2x1x18x4xf32>,
    %c0_20 = arith.constant 0 : index
    %c1_21 = arith.constant 1 : index
    %c0_22 = arith.constant 0 : index
    %c0_23 = arith.constant 0 : index
    %16 = vector.load %arg9[%c0_20, %c1_21, %c0_22, %c0_23] : memref<2x18x18x4xf32, #tpu.memory_space<vmem>>, vector<2x16x1x4xf32>
    tpu.vector_store %arg9[%c0_20, %c1_21, %c0_22, %c0_23], %13 {strides = array<i32>} : memref<2x18x18x4xf32, #tpu.memory_space<vmem>>, vector<2x16x1x4xf32>,
    %c0_24 = arith.constant 0 : index
    %c1_25 = arith.constant 1 : index
    %c17_26 = arith.constant 17 : index
    %c0_27 = arith.constant 0 : index
    %17 = vector.load %arg9[%c0_24, %c1_25, %c17_26, %c0_27] : memref<2x18x18x4xf32, #tpu.memory_space<vmem>>, vector<2x16x1x4xf32>
    tpu.vector_store %arg9[%c0_24, %c1_25, %c17_26, %c0_27], %13 {strides = array<i32>} : memref<2x18x18x4xf32, #tpu.memory_space<vmem>>, vector<2x16x1x4xf32>,
    %c0_28 = arith.constant 0 : index
    %c0_29 = arith.constant 0 : index
    %c0_30 = arith.constant 0 : index
    %c0_31 = arith.constant 0 : index
    %18 = vector.load %arg9[%c0_28, %c0_29, %c0_30, %c0_31] : memref<2x18x18x4xf32, #tpu.memory_space<vmem>>, vector<2x16x16x4xf32>
    %c0_32 = arith.constant 0 : index
    %c0_33 = arith.constant 0 : index
    %c0_34 = arith.constant 0 : index
    %c0_35 = arith.constant 0 : index
    %19 = vector.load %arg10[%c0_32, %c0_33, %c0_34, %c0_35] : memref<2x16x16x36xf32, #tpu.memory_space<vmem>>, vector<2x16x16x4xf32>
    tpu.vector_store %arg10[%c0_32, %c0_33, %c0_34, %c0_35], %18 {strides = array<i32>} : memref<2x16x16x36xf32, #tpu.memory_space<vmem>>, vector<2x16x16x4xf32>,
    %c0_36 = arith.constant 0 : index
    %c0_37 = arith.constant 0 : index
    %c1_38 = arith.constant 1 : index
    %c0_39 = arith.constant 0 : index
    %20 = vector.load %arg9[%c0_36, %c0_37, %c1_38, %c0_39] : memref<2x18x18x4xf32, #tpu.memory_space<vmem>>, vector<2x16x16x4xf32>
    %c0_40 = arith.constant 0 : index
    %c0_41 = arith.constant 0 : index
    %c0_42 = arith.constant 0 : index
    %c4 = arith.constant 4 : index
    %21 = vector.load %arg10[%c0_40, %c0_41, %c0_42, %c4] : memref<2x16x16x36xf32, #tpu.memory_space<vmem>>, vector<2x16x16x4xf32>
    tpu.vector_store %arg10[%c0_40, %c0_41, %c0_42, %c4], %20 {strides = array<i32>} : memref<2x16x16x36xf32, #tpu.memory_space<vmem>>, vector<2x16x16x4xf32>,
    %c0_43 = arith.constant 0 : index
    %c0_44 = arith.constant 0 : index
    %c2 = arith.constant 2 : index
    %c0_45 = arith.constant 0 : index
    %22 = vector.load %arg9[%c0_43, %c0_44, %c2, %c0_45] : memref<2x18x18x4xf32, #tpu.memory_space<vmem>>, vector<2x16x16x4xf32>
    %c0_46 = arith.constant 0 : index
    %c0_47 = arith.constant 0 : index
    %c0_48 = arith.constant 0 : index
    %c8 = arith.constant 8 : index
    %23 = vector.load %arg10[%c0_46, %c0_47, %c0_48, %c8] : memref<2x16x16x36xf32, #tpu.memory_space<vmem>>, vector<2x16x16x4xf32>
    tpu.vector_store %arg10[%c0_46, %c0_47, %c0_48, %c8], %22 {strides = array<i32>} : memref<2x16x16x36xf32, #tpu.memory_space<vmem>>, vector<2x16x16x4xf32>,
    %c0_49 = arith.constant 0 : index
    %c1_50 = arith.constant 1 : index
    %c0_51 = arith.constant 0 : index
    %c0_52 = arith.constant 0 : index
    %24 = vector.load %arg9[%c0_49, %c1_50, %c0_51, %c0_52] : memref<2x18x18x4xf32, #tpu.memory_space<vmem>>, vector<2x16x16x4xf32>
    %c0_53 = arith.constant 0 : index
    %c0_54 = arith.constant 0 : index
    %c0_55 = arith.constant 0 : index
    %c12 = arith.constant 12 : index
    %25 = vector.load %arg10[%c0_53, %c0_54, %c0_55, %c12] : memref<2x16x16x36xf32, #tpu.memory_space<vmem>>, vector<2x16x16x4xf32>
    tpu.vector_store %arg10[%c0_53, %c0_54, %c0_55, %c12], %24 {strides = array<i32>} : memref<2x16x16x36xf32, #tpu.memory_space<vmem>>, vector<2x16x16x4xf32>,
    %c0_56 = arith.constant 0 : index
    %c1_57 = arith.constant 1 : index
    %c1_58 = arith.constant 1 : index
    %c0_59 = arith.constant 0 : index
    %26 = vector.load %arg9[%c0_56, %c1_57, %c1_58, %c0_59] : memref<2x18x18x4xf32, #tpu.memory_space<vmem>>, vector<2x16x16x4xf32>
    %c0_60 = arith.constant 0 : index
    %c0_61 = arith.constant 0 : index
    %c0_62 = arith.constant 0 : index
    %c16 = arith.constant 16 : index
    %27 = vector.load %arg10[%c0_60, %c0_61, %c0_62, %c16] : memref<2x16x16x36xf32, #tpu.memory_space<vmem>>, vector<2x16x16x4xf32>
    tpu.vector_store %arg10[%c0_60, %c0_61, %c0_62, %c16], %26 {strides = array<i32>} : memref<2x16x16x36xf32, #tpu.memory_space<vmem>>, vector<2x16x16x4xf32>,
    %c0_63 = arith.constant 0 : index
    %c1_64 = arith.constant 1 : index
    %c2_65 = arith.constant 2 : index
    %c0_66 = arith.constant 0 : index
    %28 = vector.load %arg9[%c0_63, %c1_64, %c2_65, %c0_66] : memref<2x18x18x4xf32, #tpu.memory_space<vmem>>, vector<2x16x16x4xf32>
    %c0_67 = arith.constant 0 : index
    %c0_68 = arith.constant 0 : index
    %c0_69 = arith.constant 0 : index
    %c20 = arith.constant 20 : index
    %29 = vector.load %arg10[%c0_67, %c0_68, %c0_69, %c20] : memref<2x16x16x36xf32, #tpu.memory_space<vmem>>, vector<2x16x16x4xf32>
    tpu.vector_store %arg10[%c0_67, %c0_68, %c0_69, %c20], %28 {strides = array<i32>} : memref<2x16x16x36xf32, #tpu.memory_space<vmem>>, vector<2x16x16x4xf32>,
    %c0_70 = arith.constant 0 : index
    %c2_71 = arith.constant 2 : index
    %c0_72 = arith.constant 0 : index
    %c0_73 = arith.constant 0 : index
    %30 = vector.load %arg9[%c0_70, %c2_71, %c0_72, %c0_73] : memref<2x18x18x4xf32, #tpu.memory_space<vmem>>, vector<2x16x16x4xf32>
    %c0_74 = arith.constant 0 : index
    %c0_75 = arith.constant 0 : index
    %c0_76 = arith.constant 0 : index
    %c24 = arith.constant 24 : index
    %31 = vector.load %arg10[%c0_74, %c0_75, %c0_76, %c24] : memref<2x16x16x36xf32, #tpu.memory_space<vmem>>, vector<2x16x16x4xf32>
    tpu.vector_store %arg10[%c0_74, %c0_75, %c0_76, %c24], %30 {strides = array<i32>} : memref<2x16x16x36xf32, #tpu.memory_space<vmem>>, vector<2x16x16x4xf32>,
    %c0_77 = arith.constant 0 : index
    %c2_78 = arith.constant 2 : index
    %c1_79 = arith.constant 1 : index
    %c0_80 = arith.constant 0 : index
    %32 = vector.load %arg9[%c0_77, %c2_78, %c1_79, %c0_80] : memref<2x18x18x4xf32, #tpu.memory_space<vmem>>, vector<2x16x16x4xf32>
    %c0_81 = arith.constant 0 : index
    %c0_82 = arith.constant 0 : index
    %c0_83 = arith.constant 0 : index
    %c28 = arith.constant 28 : index
    %33 = vector.load %arg10[%c0_81, %c0_82, %c0_83, %c28] : memref<2x16x16x36xf32, #tpu.memory_space<vmem>>, vector<2x16x16x4xf32>
    tpu.vector_store %arg10[%c0_81, %c0_82, %c0_83, %c28], %32 {strides = array<i32>} : memref<2x16x16x36xf32, #tpu.memory_space<vmem>>, vector<2x16x16x4xf32>,
    %c0_84 = arith.constant 0 : index
    %c2_85 = arith.constant 2 : index
    %c2_86 = arith.constant 2 : index
    %c0_87 = arith.constant 0 : index
    %34 = vector.load %arg9[%c0_84, %c2_85, %c2_86, %c0_87] : memref<2x18x18x4xf32, #tpu.memory_space<vmem>>, vector<2x16x16x4xf32>
    %c0_88 = arith.constant 0 : index
    %c0_89 = arith.constant 0 : index
    %c0_90 = arith.constant 0 : index
    %c32 = arith.constant 32 : index
    %35 = vector.load %arg10[%c0_88, %c0_89, %c0_90, %c32] : memref<2x16x16x36xf32, #tpu.memory_space<vmem>>, vector<2x16x16x4xf32>
    tpu.vector_store %arg10[%c0_88, %c0_89, %c0_90, %c32], %34 {strides = array<i32>} : memref<2x16x16x36xf32, #tpu.memory_space<vmem>>, vector<2x16x16x4xf32>,
    %c0_91 = arith.constant 0 : index
    %c0_92 = arith.constant 0 : index
    %c0_93 = arith.constant 0 : index
    %c0_94 = arith.constant 0 : index
    %36 = vector.load %arg10[%c0_91, %c0_92, %c0_93, %c0_94] : memref<2x16x16x36xf32, #tpu.memory_space<vmem>>, vector<2x16x16x36xf32>
    %37 = vector.shape_cast %36 : vector<2x16x16x36xf32> to vector<512x36xf32>
    %38 = arith.truncf %37 : vector<512x36xf32> to vector<512x36xbf16>
    %c0_95 = arith.constant 0 : index
    %c0_96 = arith.constant 0 : index
    %39 = vector.load %arg4[%c0_95, %c0_96] : memref<36x4xbf16, #tpu.memory_space<vmem>>, vector<36x4xbf16>
    %cst_97 = arith.constant dense<0.000000e+00> : vector<512x4xf32>
    %40 = tpu.matmul %38, %39, %cst_97 {dimension_numbers = #tpu.dot_dimension_numbers<[1], [0], [0], [1], [0, 0, 1, 1], [], []>} : vector<512x36xbf16>, vector<36x4xbf16>, vector<512x4xf32> -> vector<512x4xf32>
    %c0_98 = arith.constant 0 : index
    %c0_99 = arith.constant 0 : index
    %41 = vector.load %arg5[%c0_98, %c0_99] : memref<1x4xf32, #tpu.memory_space<vmem>>, vector<1x4xf32>
    %42 = vector.broadcast %41 : vector<1x4xf32> to vector<512x4xf32>
    %43 = arith.addf %40, %42 : vector<512x4xf32>
    %cst_100 = arith.constant 0.000000e+00 : f32
    %44 = vector.broadcast %cst_100 : f32 to vector<512x4xf32>
    %45 = arith.maximumf %43, %44 : vector<512x4xf32>
    %46 = arith.truncf %45 : vector<512x4xf32> to vector<512x4xbf16>
    %c0_101 = arith.constant 0 : index
    %c0_102 = arith.constant 0 : index
    %47 = vector.load %arg6[%c0_101, %c0_102] : memref<4x16xbf16, #tpu.memory_space<vmem>>, vector<4x16xbf16>
    %cst_103 = arith.constant dense<0.000000e+00> : vector<512x16xf32>
    %48 = tpu.matmul %46, %47, %cst_103 {dimension_numbers = #tpu.dot_dimension_numbers<[1], [0], [0], [1], [0, 0, 1, 1], [], []>} : vector<512x4xbf16>, vector<4x16xbf16>, vector<512x16xf32> -> vector<512x16xf32>
    %c0_104 = arith.constant 0 : index
    %c0_105 = arith.constant 0 : index
    %c0_106 = arith.constant 0 : index
    %c0_107 = arith.constant 0 : index
    %49 = vector.load %arg1[%c0_104, %c0_105, %c0_106, %c0_107] : memref<2x16x16x16xf32, #tpu.memory_space<vmem>>, vector<2x16x16x16xf32>
    %50 = vector.shape_cast %49 : vector<2x16x16x16xf32> to vector<512x16xf32>
    %c0_108 = arith.constant 0 : index
    %c0_109 = arith.constant 0 : index
    %51 = vector.load %arg7[%c0_108, %c0_109] : memref<1x16xf32, #tpu.memory_space<vmem>>, vector<1x16xf32>
    %52 = vector.broadcast %51 : vector<1x16xf32> to vector<512x16xf32>
    %53 = arith.addf %48, %52 : vector<512x16xf32>
    %54 = arith.addf %53, %50 : vector<512x16xf32>
    %cst_110 = arith.constant 0.000000e+00 : f32
    %55 = vector.broadcast %cst_110 : f32 to vector<512x16xf32>
    %56 = arith.maximumf %54, %55 : vector<512x16xf32>
    %57 = vector.shape_cast %56 : vector<512x16xf32> to vector<2x16x16x16xf32>
    %c0_111 = arith.constant 0 : index
    %c0_112 = arith.constant 0 : index
    %c0_113 = arith.constant 0 : index
    %c0_114 = arith.constant 0 : index
    %58 = vector.load %arg8[%c0_111, %c0_112, %c0_113, %c0_114] : memref<2x16x16x16xf32, #tpu.memory_space<vmem>>, vector<2x16x16x16xf32>
    tpu.vector_store %arg8[%c0_111, %c0_112, %c0_113, %c0_114], %57 {strides = array<i32>} : memref<2x16x16x16xf32, #tpu.memory_space<vmem>>, vector<2x16x16x16xf32>,
    return
  }
  func.func @transform_0(%arg0: i32) -> (i32, i32, i32, i32) {
    %c0_i32 = arith.constant 0 : i32
    %c0_i32_0 = arith.constant 0 : i32
    %c0_i32_1 = arith.constant 0 : i32
    %c0_i32_2 = arith.constant 0 : i32
    return %arg0, %c0_i32, %c0_i32_0, %c0_i32_1 : i32, i32, i32, i32
  }
  func.func @transform_1(%arg0: i32) -> (i32, i32) {
    %c0_i32 = arith.constant 0 : i32
    %c0_i32_0 = arith.constant 0 : i32
    %c0_i32_1 = arith.constant 0 : i32
    return %c0_i32, %c0_i32_0 : i32, i32
  }
  func.func @transform_2(%arg0: i32) -> (i32, i32) {
    %c0_i32 = arith.constant 0 : i32
    %c0_i32_0 = arith.constant 0 : i32
    %c0_i32_1 = arith.constant 0 : i32
    return %c0_i32, %c0_i32_0 : i32, i32
  }
  func.func @transform_3(%arg0: i32) -> (i32, i32) {
    %c0_i32 = arith.constant 0 : i32
    %c0_i32_0 = arith.constant 0 : i32
    %c0_i32_1 = arith.constant 0 : i32
    return %c0_i32, %c0_i32_0 : i32, i32
  }
  func.func @transform_4(%arg0: i32) -> (i32, i32) {
    %c0_i32 = arith.constant 0 : i32
    %c0_i32_0 = arith.constant 0 : i32
    %c0_i32_1 = arith.constant 0 : i32
    return %c0_i32, %c0_i32_0 : i32, i32
  }
  func.func @transform_5(%arg0: i32) -> (i32, i32) {
    %c0_i32 = arith.constant 0 : i32
    %c0_i32_0 = arith.constant 0 : i32
    %c0_i32_1 = arith.constant 0 : i32
    return %c0_i32, %c0_i32_0 : i32, i32
  }
  func.func @transform_6(%arg0: i32) -> (i32, i32) {
    %c0_i32 = arith.constant 0 : i32
    %c0_i32_0 = arith.constant 0 : i32
    %c0_i32_1 = arith.constant 0 : i32
    return %c0_i32, %c0_i32_0 : i32, i32
  }
  func.func @transform_7(%arg0: i32) -> (i32, i32, i32, i32) {
    %c0_i32 = arith.constant 0 : i32
    %c0_i32_0 = arith.constant 0 : i32
    %c0_i32_1 = arith.constant 0 : i32
    %c0_i32_2 = arith.constant 0 : i32
    return %arg0, %c0_i32, %c0_i32_0, %c0_i32_1 : i32, i32, i32, i32
  }
}

</mosaic_0001>

<bundles_post_ra>
// kernel: tpu_custom_call.1
= control target key start
LH: loop header
LB: loop body
LE: loop exit
PB: predicated region body
PF: predicated region fallthrough
CT: control target
= control target key end

     0   :  { %12 = vsyncpa [#allocation5], 0  ;;  %s7719_s0 = inlined_call_operand.hbm [shape: f32[2,16,16,16], index: 0, kind: input, shape index: {}]   ;;  %s7720_s1 = inlined_call_operand.vmem [shape: bf16[16,4], index: 1, kind: input, shape index: {}]   ;;  %s7721_s2 = inlined_call_operand.vmem [shape: f32[1,4], index: 2, kind: input, shape index: {}]   ;;  %s7722_s3 = inlined_call_operand.vmem [shape: bf16[36,4], index: 3, kind: input, shape index: {}]   ;;  %s7723_s4 = inlined_call_operand.vmem [shape: f32[1,4], index: 4, kind: input, shape index: {}]   ;;  %s7724_s5 = inlined_call_operand.vmem [shape: bf16[4,16], index: 5, kind: input, shape index: {}]   ;;  %s7725_s6 = inlined_call_operand.vmem [shape: f32[1,16], index: 6, kind: input, shape index: {}]   ;;  %s7726_s7 = inlined_call_operand.hbm [shape: f32[2,16,16,16], index: 7, kind: output, shape index: {}]  }
   0x1   :  { %13 = vsyncpa [#allocation6], 0  ;;  %s5712_s24 = smov [#allocation4]   ;;  %s5664_s28 = scalar_lea.hbm %s7719_s0, 8192 }
   0x2   :  { %s19_s25 = sshll.u32 %s5712_s24, 4  ;;  %p5665_p0 = scmp.ne.s32.totalorder %s7719_s0, %s5664_s28  ;;  %s20_s25 = int_to_ptr.vmem [resolvable:$true] %s19_s25 }
   0x3   :  { %p5668_p1 = scmp.lt.u32.totalorder %s5664_s28, %s7719_s0 }
   0x5   :  { %p5670_p2 = pnand %p5668_p1, %p5665_p0 }
   0x7   :  { %5673 = shalt.err (!%p5670_p2)
}
   0x8   :  { %s5674_s10 = scalar_lea.vmem %s20_s25, 8192  ;;  %p5679_p4 = scmp.lt.s32.totalorder %s20_s25, %s20_s25 }
   0x9   :  { %p5675_p3 = scmp.ne.s32.totalorder %s20_s25, %s5674_s10  ;;  %p5680_p5 = scmp.lt.s32.totalorder %s5674_s10, %s5674_s10 }
   0xb   :  { %p5681_p6 = por %p5680_p5, %p5679_p4 }
   0xd   :  { %p5682_p7 = pnand %p5681_p6, %p5675_p3 }
   0xf   :  { %5685 = shalt.err (!%p5682_p7)
}
  0x10   :  { %s5713_s11 = smov 128   ;;  %s5714_s12 = smov 8  }
  0x11   :  { %25 = dma.hbm_to_vmem [thread:$0]  %s7719_s0, 8192, %s20_s25, [#allocation5], %s5713_s11, %s5713_s11, %s5714_s12  }
  0x12   :  { %5708 = dma.done.wait [#allocation5], 8192  }
  0x13   :  { %5709 = vsyncadd [#allocation5], 4294959104  ;;  %vm604_vm0 = vcmask 31744   ;;  %v5715_v0 = vmov 0.0   ;;  %vm671_vm1 = vcmask 25600   ;;  %v5657_v1 = vld [vmem:[%s7720_s1] sm:$0xff]  }
  0x14   :  { %669 = vst.msk [vmem:[#allocation2] sm:$0xff] %vm604_vm0, %v5715_v0  ;;  %670 = vst.msk [vmem:[#allocation2 + $0x8] sm:$0xff] %vm604_vm0, %v5715_v0  ;;  %v42_v2 = vld [vmem:[#allocation4] sm:$0xff]  ;;  %v43_v3 = vld [vmem:[#allocation4 + $0x8] sm:$0xff]  ;;  %vm153_vm2 = vcmask 130048   ;;  %5439 = vmatprep.subr.bf16.mxu0 %v5657_v1  ;;  %5641 = vmatprep.subr.bf16.mxu1 %v5657_v1  ;;  %s5716_s1 = smov 4  }
  0x15   :  { %673 = vst.msk [vmem:[#allocation2 + $0x1b0] sm:$0xff] %vm604_vm0, %v5715_v0  ;;  %674 = vst.msk [vmem:[#allocation2 + $0x1b8] sm:$0xff] %vm604_vm0, %v5715_v0  ;;  %v44_v4 = vld [vmem:[#allocation4 + $0x10] sm:$0xff]  ;;  %v106_v5 = vpack.c.bf16 %v43_v3, %v42_v2  ;;  %v45_v6 = vld [vmem:[#allocation4 + $0x18] sm:$0xff]  ;;  %5440 = vmatpush3.bf16.msra.mxu0 %v5657_v1  ;;  %5642 = vmatpush3.bf16.msra.mxu1 %v5657_v1  ;;  %vm683_vm3 = vcmask 24576   ;;  %vm1196_vm4 = vcmask 64544  }
  0x16   :  { %677 = vst.msk [vmem:[#allocation2 + $0x198] sm:$0xff] %vm604_vm0, %v5715_v0  ;;  %678 = vst.msk [vmem:[#allocation2 + $0x1a0] sm:$0xff] %vm604_vm0, %v5715_v0  ;;  %v74_v7 = vld [vmem:[#allocation4 + $0x100] sm:$0xff]  ;;  %v75_v8 = vld [vmem:[#allocation4 + $0x108] sm:$0xff]  ;;  %v107_v9 = vpack.c.bf16 %v45_v6, %v44_v4  ;;  %vm1581_vm5 = vcmask 97344   ;;  %vm1966_vm6 = vcmask 130144  }
  0x17   :  { %680 = vst.msk [vmem:[#allocation2 + $0x348] sm:$0xff] %vm604_vm0, %v5715_v0  ;;  %681 = vst.msk [vmem:[#allocation2 + $0x350] sm:$0xff] %vm604_vm0, %v5715_v0  ;;  %v122_v10 = vpack.c.bf16 %v75_v8, %v74_v7  ;;  %v76_v11 = vld [vmem:[#allocation4 + $0x110] sm:$0xff]  ;;  %v77_v12 = vld [vmem:[#allocation4 + $0x118] sm:$0xff]  ;;  %5441 = vmatprep.mubr.msk.bf16.mxu0 %vm153_vm2, %v106_v5  ;;  %s5718_s18 = smov 16   ;;  %s5719_s19 = smov 20  }
  0x18   :  { %672 = vst.msk [vmem:[#allocation2 + $0x10] sm:$0x3] %vm671_vm1, %v5715_v0  ;;  %675 = vst.msk [vmem:[#allocation2 + $0x1c0] sm:$0x3] %vm671_vm1, %v5715_v0  ;;  %v46_v13 = vld [vmem:[#allocation4 + $0x20] sm:$0xff]  ;;  %v123_v14 = vpack.c.bf16 %v77_v12, %v76_v11  ;;  %v47_v15 = vld [vmem:[#allocation4 + $0x28] sm:$0xff]  ;;  %5442 = vmatmul.mubr.msk.bf16.vlgmr.msra.gmra.mrb[0].mxu0 %vm153_vm2, %v107_v9 }
  0x19   :  { %679 = vst.msk [vmem:[#allocation2 + $0x1a8] sm:$0x3] %vm671_vm1, %v5715_v0  ;;  %682 = vst.msk [vmem:[#allocation2 + $0x358] sm:$0x3] %vm671_vm1, %v5715_v0  ;;  %5473 = vmatprep.mubr.msk.bf16.mxu1 %vm153_vm2, %v122_v10  ;;  %v108_v16 = vpack.c.bf16 %v47_v15, %v46_v13  ;;  %v78_v17 = vld [vmem:[#allocation4 + $0x120] sm:$0xff]  ;;  %v79_v18 = vld [vmem:[#allocation4 + $0x128] sm:$0xff] }
  0x1a   :  { %5474 = vmatmul.mubr.msk.bf16.vlgmr.msra.gmra.mrb[0].mxu1 %vm153_vm2, %v123_v14  ;;  %v48_v19 = vld [vmem:[#allocation4 + $0x30] sm:$0xff]  ;;  %v49_v20 = vld [vmem:[#allocation4 + $0x38] sm:$0xff]  ;;  %v124_v21 = vpack.c.bf16 %v79_v18, %v78_v17  ;;  %v50_v24 = vld [vmem:[#allocation4 + $0x40] sm:$0xff]  ;;  %685 = vst.msk [vmem:[#allocation2 + $0x30] sm:$0x1] %vm683_vm3, %v5715_v0  ;;  %s5720_s20 = smov 24  }
  0x1b   :  { %5445 = vmatprep.mubr.msk.bf16.mxu0 %vm153_vm2, %v108_v16  ;;  %v80_v22 = vld [vmem:[#allocation4 + $0x130] sm:$0xff]  ;;  %v81_v23 = vld [vmem:[#allocation4 + $0x138] sm:$0xff]  ;;  %v51_v25 = vld [vmem:[#allocation4 + $0x48] sm:$0xff]  ;;  %v109_v28 = vpack.c.bf16 %v49_v20, %v48_v19  ;;  %684 = vst.msk [vmem:[#allocation2 + $0x18] sm:$0x1] %vm683_vm3, %v5715_v0  ;;  %s5721_s21 = smov 28  }
  0x1c   :  { %5477 = vmatprep.mubr.msk.bf16.mxu1 %vm153_vm2, %v124_v21  ;;  %v82_v26 = vld [vmem:[#allocation4 + $0x140] sm:$0xff]  ;;  %v83_v27 = vld [vmem:[#allocation4 + $0x148] sm:$0xff]  ;;  %v125_v29 = vpack.c.bf16 %v81_v23, %v80_v22  ;;  %v110_v30 = vpack.c.bf16 %v51_v25, %v50_v24  ;;  %v52_v32 = vld [vmem:[#allocation4 + $0x50] sm:$0xff]  ;;  %686 = vst.msk [vmem:[#allocation2 + $0x48] sm:$0x1] %vm683_vm3, %v5715_v0  ;;  %s5722_s24 = smov 32  }
  0x1d   :  { %v126_v31 = vpack.c.bf16 %v83_v27, %v82_v26  ;;  %v53_v33 = vld [vmem:[#allocation4 + $0x58] sm:$0xff]  ;;  %v84_v34 = vld [vmem:[#allocation4 + $0x150] sm:$0xff]  ;;  %v54_v36 = vld [vmem:[#allocation4 + $0x60] sm:$0xff]  ;;  %687 = vst.msk [vmem:[#allocation2 + $0x60] sm:$0x1] %vm683_vm3, %v5715_v0  ;;  %vm4177_vm7 = vcmask 1041408  }
  0x1e   :  { %v85_v35 = vld [vmem:[#allocation4 + $0x158] sm:$0xff]  ;;  %v55_v37 = vld [vmem:[#allocation4 + $0x68] sm:$0xff]  ;;  %v86_v38 = vld [vmem:[#allocation4 + $0x160] sm:$0xff]  ;;  %v111_v41 = vpack.c.bf16 %v53_v33, %v52_v32  ;;  %688 = vst.msk [vmem:[#allocation2 + $0x78] sm:$0x1] %vm683_vm3, %v5715_v0  ;;  %vm2351_vm8 = vcmask 162944  }
  0x1f   :  { %v87_v39 = vld [vmem:[#allocation4 + $0x168] sm:$0xff]  ;;  %v127_v42 = vpack.c.bf16 %v85_v35, %v84_v34  ;;  %v112_v43 = vpack.c.bf16 %v55_v37, %v54_v36  ;;  %v56_v46 = vld [vmem:[#allocation4 + $0x70] sm:$0xff]  ;;  %v57_v47 = vld [vmem:[#allocation4 + $0x78] sm:$0xff]  ;;  %689 = vst.msk [vmem:[#allocation2 + $0x90] sm:$0x1] %vm683_vm3, %v5715_v0  ;;  %vm2736_vm9 = vcmask 195744  }
  0x20   :  { %5446 = vmatmul.mubr.msk.bf16.gmra.mrb[4].mxu0 %vm153_vm2, %v109_v28  ;;  %v876_v40 = vld [vmem:[#allocation2 + $0x1] sm:$0xff]  ;;  %v128_v44 = vpack.c.bf16 %v87_v39, %v86_v38  ;;  %v877_v45 = vld [vmem:[#allocation2 + $0x9] sm:$0xff]  ;;  %v89_v49 = vld [vmem:[#allocation4 + $0x178] sm:$0xff]  ;;  %v113_v54 = vpack.c.bf16 %v57_v47, %v56_v46  ;;  %690 = vst.msk [vmem:[#allocation2 + $0xa8] sm:$0x1] %vm683_vm3, %v5715_v0  ;;  %vm3122_vm10 = vcmask 228544  }
  0x21   :  { %5449 = vmatprep.mubr.msk.bf16.mxu0 %vm153_vm2, %v110_v30  ;;  %1004 = vrot.lane.b32.xlu0 %v876_v40, %s5716_s1  ;;  %v88_v48 = vld [vmem:[#allocation4 + $0x170] sm:$0xff]  ;;  %v58_v50 = vld [vmem:[#allocation4 + $0x80] sm:$0xff]  ;;  %v59_v51 = vld [vmem:[#allocation4 + $0x88] sm:$0xff]  ;;  %691 = vst.msk [vmem:[#allocation2 + $0xc0] sm:$0x1] %vm683_vm3, %v5715_v0  ;;  %vm3507_vm11 = vcmask 261344  }
  0x22   :  { %5478 = vmatmul.mubr.msk.bf16.gmra.mrb[4].mxu1 %vm153_vm2, %v125_v29  ;;  %v90_v52 = vld [vmem:[#allocation4 + $0x180] sm:$0xff]  ;;  %v91_v53 = vld [vmem:[#allocation4 + $0x188] sm:$0xff]  ;;  %v129_v55 = vpack.c.bf16 %v89_v49, %v88_v48  ;;  %v114_v56 = vpack.c.bf16 %v59_v51, %v58_v50  ;;  %v60_v58 = vld [vmem:[#allocation4 + $0x90] sm:$0xff]  ;;  %692 = vst.msk [vmem:[#allocation2 + $0xd8] sm:$0x1] %vm683_vm3, %v5715_v0  ;;  %vm3892_vm12 = vcmask 294144  }
  0x23   :  { %5481 = vmatprep.mubr.msk.bf16.mxu1 %vm153_vm2, %v126_v31  ;;  %v130_v57 = vpack.c.bf16 %v91_v53, %v90_v52  ;;  %v61_v59 = vld [vmem:[#allocation4 + $0x98] sm:$0xff]  ;;  %v92_v60 = vld [vmem:[#allocation4 + $0x190] sm:$0xff]  ;;  %v62_v62 = vld [vmem:[#allocation4 + $0xa0] sm:$0xff]  ;;  %693 = vst.msk [vmem:[#allocation2 + $0xf0] sm:$0x1] %vm683_vm3, %v5715_v0  ;;  %vm4080_vm13 = vcmask 293888  }
  0x24   :  { %v93_v61 = vld [vmem:[#allocation4 + $0x198] sm:$0xff]  ;;  %v63_v63 = vld [vmem:[#allocation4 + $0xa8] sm:$0xff]  ;;  %v94_v1 = vld [vmem:[#allocation4 + $0x1a0] sm:$0xff]  ;;  %v115_v3 = vpack.c.bf16 %v61_v59, %v60_v58  ;;  %694 = vst.msk [vmem:[#allocation2 + $0x108] sm:$0x1] %vm683_vm3, %v5715_v0 }
  0x25   :  { %1006 = vrot.lane.b32.xlu0 %v877_v45, %s5716_s1  ;;  %v95_v2 = vld [vmem:[#allocation4 + $0x1a8] sm:$0xff]  ;;  %v131_v4 = vpack.c.bf16 %v93_v61, %v92_v60  ;;  %v116_v5 = vpack.c.bf16 %v63_v63, %v62_v62  ;;  %v64_v7 = vld [vmem:[#allocation4 + $0xb0] sm:$0xff]  ;;  %v65_v8 = vld [vmem:[#allocation4 + $0xb8] sm:$0xff]  ;;  %695 = vst.msk [vmem:[#allocation2 + $0x120] sm:$0x1] %vm683_vm3, %v5715_v0 }
  0x26   :  { %v132_v6 = vpack.c.bf16 %v95_v2, %v94_v1  ;;  %v96_v9 = vld [vmem:[#allocation4 + $0x1b0] sm:$0xff]  ;;  %v97_v10 = vld [vmem:[#allocation4 + $0x1b8] sm:$0xff]  ;;  %v117_v11 = vpack.c.bf16 %v65_v8, %v64_v7  ;;  %v1261_v15 = vld [vmem:[#allocation2 + $0x2] sm:$0xff]  ;;  %696 = vst.msk [vmem:[#allocation2 + $0x138] sm:$0x1] %vm683_vm3, %v5715_v0 }
  0x27   :  { %v133_v12 = vpack.c.bf16 %v97_v10, %v96_v9  ;;  %v908_v13 = vld [vmem:[#allocation2 + $0x1b1] sm:$0xff]  ;;  %v909_v14 = vld [vmem:[#allocation2 + $0x1b9] sm:$0xff]  ;;  %697 = vst.msk [vmem:[#allocation2 + $0x150] sm:$0x1] %vm683_vm3, %v5715_v0  ;;  %698 = vst.msk [vmem:[#allocation2 + $0x168] sm:$0x1] %vm683_vm3, %v5715_v0 }
  0x28   :  { %5450 = vmatmul.mubr.msk.bf16.gmra.mrb[8].mxu0 %vm153_vm2, %v111_v41  ;;  %1070 = vrot.lane.b32.xlu1 %v909_v14, %s5716_s1  ;;  %v5831_v16 = vld [vmem:[#allocation2 + $0xa] sm:$0xff]  ;;  %699 = vst.msk [vmem:[#allocation2 + $0x180] sm:$0x1] %vm683_vm3, %v5715_v0  ;;  %700 = vst.msk [vmem:[#allocation2 + $0x1c8] sm:$0x1] %vm683_vm3, %v5715_v0  ;;  %v1293_v17 = vld [vmem:[#allocation2 + $0x1b2] sm:$0xff] }
  0x29   :  { %5453 = vmatprep.mubr.msk.bf16.mxu0 %vm153_vm2, %v112_v43  ;;  %1068 = vrot.lane.b32.xlu0 %v908_v13, %s5716_s1  ;;  %701 = vst.msk [vmem:[#allocation2 + $0x1e0] sm:$0x1] %vm683_vm3, %v5715_v0  ;;  %702 = vst.msk [vmem:[#allocation2 + $0x1f8] sm:$0x1] %vm683_vm3, %v5715_v0  ;;  %v1294_v18 = vld [vmem:[#allocation2 + $0x1ba] sm:$0xff]  ;;  %v67_v20 = vld [vmem:[#allocation4 + $0xc8] sm:$0xff] }
  0x2a   :  { %5482 = vmatmul.mubr.msk.bf16.gmra.mrb[8].mxu1 %vm153_vm2, %v127_v42  ;;  %703 = vst.msk [vmem:[#allocation2 + $0x210] sm:$0x1] %vm683_vm3, %v5715_v0  ;;  %704 = vst.msk [vmem:[#allocation2 + $0x228] sm:$0x1] %vm683_vm3, %v5715_v0  ;;  %v66_v19 = vld [vmem:[#allocation4 + $0xc0] sm:$0xff]  ;;  %v68_v22 = vld [vmem:[#allocation4 + $0xd0] sm:$0xff] }
  0x2b   :  { %5485 = vmatprep.mubr.msk.bf16.mxu1 %vm153_vm2, %v128_v44  ;;  %705 = vst.msk [vmem:[#allocation2 + $0x240] sm:$0x1] %vm683_vm3, %v5715_v0  ;;  %706 = vst.msk [vmem:[#allocation2 + $0x258] sm:$0x1] %vm683_vm3, %v5715_v0  ;;  %v118_v21 = vpack.c.bf16 %v67_v20, %v66_v19  ;;  %v69_v23 = vld [vmem:[#allocation4 + $0xd8] sm:$0xff]  ;;  %v99_v25 = vld [vmem:[#allocation4 + $0x1c8] sm:$0xff] }
  0x2c   :  { %707 = vst.msk [vmem:[#allocation2 + $0x270] sm:$0x1] %vm683_vm3, %v5715_v0  ;;  %708 = vst.msk [vmem:[#allocation2 + $0x288] sm:$0x1] %vm683_vm3, %v5715_v0  ;;  %1391 = vrot.lane.b32.xlu1 %v5831_v16, %s5714_s12  ;;  %v119_v24 = vpack.c.bf16 %v69_v23, %v68_v22  ;;  %v100_v27 = vld [vmem:[#allocation4 + $0x1d0] sm:$0xff]  ;;  %v101_v28 = vld [vmem:[#allocation4 + $0x1d8] sm:$0xff] }
  0x2d   :  { %1389 = vrot.lane.b32.xlu0 %v1261_v15, %s5714_s12  ;;  %709 = vst.msk [vmem:[#allocation2 + $0x2a0] sm:$0x1] %vm683_vm3, %v5715_v0  ;;  %710 = vst.msk [vmem:[#allocation2 + $0x2b8] sm:$0x1] %vm683_vm3, %v5715_v0  ;;  %v135_v29 = vpack.c.bf16 %v101_v28, %v100_v27  ;;  %v70_v30 = vld [vmem:[#allocation4 + $0xe0] sm:$0xff]  ;;  %v71_v31 = vld [vmem:[#allocation4 + $0xe8] sm:$0xff] }
  0x2e   :  { %711 = vst.msk [vmem:[#allocation2 + $0x2d0] sm:$0x1] %vm683_vm3, %v5715_v0  ;;  %712 = vst.msk [vmem:[#allocation2 + $0x2e8] sm:$0x1] %vm683_vm3, %v5715_v0  ;;  %v72_v32 = vld [vmem:[#allocation4 + $0xf0] sm:$0xff]  ;;  %v120_v33 = vpack.c.bf16 %v71_v31, %v70_v30  ;;  %v73_v34 = vld [vmem:[#allocation4 + $0xf8] sm:$0xff] }
  0x2f   :  { %713 = vst.msk [vmem:[#allocation2 + $0x300] sm:$0x1] %vm683_vm3, %v5715_v0  ;;  %714 = vst.msk [vmem:[#allocation2 + $0x318] sm:$0x1] %vm683_vm3, %v5715_v0  ;;  %v121_v35 = vpack.c.bf16 %v73_v34, %v72_v32  ;;  %v102_v36 = vld [vmem:[#allocation4 + $0x1e0] sm:$0xff]  ;;  %v103_v37 = vld [vmem:[#allocation4 + $0x1e8] sm:$0xff] }
  0x30   :  { %5454 = vmatmul.mubr.msk.bf16.gmra.mrb[12].mxu0 %vm153_vm2, %v113_v54  ;;  %715 = vst.msk [vmem:[#allocation2 + $0x330] sm:$0x1] %vm683_vm3, %v5715_v0  ;;  %716 = vst.msk [vmem:[#allocation2 + $0x29] sm:$0x1] %vm683_vm3, %v5715_v0  ;;  %1455 = vrot.lane.b32.xlu1 %v1294_v18, %s5714_s12  ;;  %v104_v38 = vld [vmem:[#allocation4 + $0x1f0] sm:$0xff]  ;;  %v136_v39 = vpack.c.bf16 %v103_v37, %v102_v36  ;;  %v105_v40 = vld [vmem:[#allocation4 + $0x1f8] sm:$0xff] }
  0x31   :  { %5457 = vmatprep.mubr.msk.bf16.mxu0 %vm153_vm2, %v114_v56  ;;  %717 = vst.msk [vmem:[#allocation2 + $0x41] sm:$0x1] %vm683_vm3, %v5715_v0  ;;  %718 = vst.msk [vmem:[#allocation2 + $0x59] sm:$0x1] %vm683_vm3, %v5715_v0  ;;  %1453 = vrot.lane.b32.xlu0 %v1293_v17, %s5714_s12  ;;  %v137_v41 = vpack.c.bf16 %v105_v40, %v104_v38  ;;  %v748_v43 = vld [vmem:[#allocation2] sm:$0xff]  ;;  %v749_v44 = vld [vmem:[#allocation2 + $0x8] sm:$0xff] }
  0x32   :  { %5486 = vmatmul.mubr.msk.bf16.gmra.mrb[12].mxu1 %vm153_vm2, %v129_v55  ;;  %719 = vst.msk [vmem:[#allocation2 + $0x71] sm:$0x1] %vm683_vm3, %v5715_v0  ;;  %720 = vst.msk [vmem:[#allocation2 + $0x89] sm:$0x1] %vm683_vm3, %v5715_v0  ;;  %v780_v46 = vld [vmem:[#allocation2 + $0x1b0] sm:$0xff]  ;;  %v781_v47 = vld [vmem:[#allocation2 + $0x1b8] sm:$0xff] }
  0x33   :  { %5489 = vmatprep.mubr.msk.bf16.mxu1 %vm153_vm2, %v130_v57  ;;  %721 = vst.msk [vmem:[#allocation2 + $0xa1] sm:$0x1] %vm683_vm3, %v5715_v0  ;;  %722 = vst.msk [vmem:[#allocation2 + $0xb9] sm:$0x1] %vm683_vm3, %v5715_v0  ;;  %v5988_v54 = vld [vmem:[%s7721_s2] ss:$0 sm:$0xff] }
  0x34   :  { %723 = vst.msk [vmem:[#allocation2 + $0xd1] sm:$0x1] %vm683_vm3, %v5715_v0  ;;  %724 = vst.msk [vmem:[#allocation2 + $0xe9] sm:$0x1] %vm683_vm3, %v5715_v0  ;;  %s5717_s2 = smov 12  }
  0x35   :  { %725 = vst.msk [vmem:[#allocation2 + $0x101] sm:$0x1] %vm683_vm3, %v5715_v0  ;;  %726 = vst.msk [vmem:[#allocation2 + $0x119] sm:$0x1] %vm683_vm3, %v5715_v0 }
  0x36   :  { %727 = vst.msk [vmem:[#allocation2 + $0x131] sm:$0x1] %vm683_vm3, %v5715_v0  ;;  %728 = vst.msk [vmem:[#allocation2 + $0x149] sm:$0x1] %vm683_vm3, %v5715_v0 }
  0x37   :  { %729 = vst.msk [vmem:[#allocation2 + $0x161] sm:$0x1] %vm683_vm3, %v5715_v0  ;;  %730 = vst.msk [vmem:[#allocation2 + $0x179] sm:$0x1] %vm683_vm3, %v5715_v0 }
  0x38   :  { %5458 = vmatmul.mubr.msk.bf16.gmra.mrb[16].mxu0 %vm153_vm2, %v115_v3  ;;  %731 = vst.msk [vmem:[#allocation2 + $0x191] sm:$0x1] %vm683_vm3, %v5715_v0  ;;  %732 = vst.msk [vmem:[#allocation2 + $0x1d9] sm:$0x1] %vm683_vm3, %v5715_v0 }
  0x39   :  { %5461 = vmatprep.mubr.msk.bf16.mxu0 %vm153_vm2, %v116_v5  ;;  %733 = vst.msk [vmem:[#allocation2 + $0x1f1] sm:$0x1] %vm683_vm3, %v5715_v0  ;;  %734 = vst.msk [vmem:[#allocation2 + $0x209] sm:$0x1] %vm683_vm3, %v5715_v0 }
  0x3a   :  { %5490 = vmatmul.mubr.msk.bf16.gmra.mrb[16].mxu1 %vm153_vm2, %v131_v4  ;;  %735 = vst.msk [vmem:[#allocation2 + $0x221] sm:$0x1] %vm683_vm3, %v5715_v0  ;;  %736 = vst.msk [vmem:[#allocation2 + $0x239] sm:$0x1] %vm683_vm3, %v5715_v0 }
  0x3b   :  { %5493 = vmatprep.mubr.msk.bf16.mxu1 %vm153_vm2, %v132_v6  ;;  %737 = vst.msk [vmem:[#allocation2 + $0x251] sm:$0x1] %vm683_vm3, %v5715_v0  ;;  %738 = vst.msk [vmem:[#allocation2 + $0x269] sm:$0x1] %vm683_vm3, %v5715_v0 }
  0x3c   :  { %739 = vst.msk [vmem:[#allocation2 + $0x281] sm:$0x1] %vm683_vm3, %v5715_v0  ;;  %740 = vst.msk [vmem:[#allocation2 + $0x299] sm:$0x1] %vm683_vm3, %v5715_v0 }
  0x3d   :  { %741 = vst.msk [vmem:[#allocation2 + $0x2b1] sm:$0x1] %vm683_vm3, %v5715_v0  ;;  %742 = vst.msk [vmem:[#allocation2 + $0x2c9] sm:$0x1] %vm683_vm3, %v5715_v0 }
  0x3e   :  { %743 = vst.msk [vmem:[#allocation2 + $0x2e1] sm:$0x1] %vm683_vm3, %v5715_v0  ;;  %744 = vst.msk [vmem:[#allocation2 + $0x2f9] sm:$0x1] %vm683_vm3, %v5715_v0 }
  0x3f   :  { %745 = vst.msk [vmem:[#allocation2 + $0x311] sm:$0x1] %vm683_vm3, %v5715_v0  ;;  %746 = vst.msk [vmem:[#allocation2 + $0x329] sm:$0x1] %vm683_vm3, %v5715_v0 }
  0x40   :  { %5462 = vmatmul.mubr.msk.bf16.gmra.mrb[20].mxu0 %vm153_vm2, %v117_v11  ;;  %747 = vst.msk [vmem:[#allocation2 + $0x341] sm:$0x1] %vm683_vm3, %v5715_v0  ;;  %v98_v0 = vld [vmem:[#allocation4 + $0x1c0] sm:$0xff] }
  0x41   :  { %5465 = vmatprep.mubr.msk.bf16.mxu0 %vm153_vm2, %v118_v21  ;;  %v134_v26 = vpack.c.bf16 %v99_v25, %v98_v0  ;;  %812 = vst.msk [vmem:[#allocation3] sm:$0xff] %vm604_vm0, %v748_v43  ;;  %813 = vst.msk [vmem:[#allocation3 + $0x8] sm:$0xff] %vm604_vm0, %v749_v44 }
  0x42   :  { %5494 = vmatmul.mubr.msk.bf16.gmra.mrb[20].mxu1 %vm153_vm2, %v133_v12  ;;  %844 = vst.msk [vmem:[#allocation3 + $0x100] sm:$0xff] %vm604_vm0, %v780_v46  ;;  %845 = vst.msk [vmem:[#allocation3 + $0x108] sm:$0xff] %vm604_vm0, %v781_v47 }
  0x43   :  { %5497 = vmatprep.mubr.msk.bf16.mxu1 %vm153_vm2, %v134_v26 }
  0x48   :  { %5466 = vmatmul.mubr.msk.bf16.gmra.mrb[24].mxu0 %vm153_vm2, %v119_v24 }
  0x49   :  { %5469 = vmatprep.mubr.msk.bf16.mxu0 %vm153_vm2, %v120_v33 }
  0x4a   :  { %5498 = vmatmul.mubr.msk.bf16.gmra.mrb[24].mxu1 %vm153_vm2, %v135_v29 }
  0x4b   :  { %5501 = vmatprep.mubr.msk.bf16.mxu1 %vm153_vm2, %v136_v39 }
  0x50   :  { %5470 = vmatmul.mubr.msk.bf16.gmra.mrb[28].mxu0 %vm153_vm2, %v121_v35 }
  0x52   :  { %5502 = vmatmul.mubr.msk.bf16.gmra.mrb[28].mxu1 %vm153_vm2, %v137_v41 }
  0x93   :  { %v1005_v42 = vpop.permute.xlu0 %1004 }
  0x94   :  { %1197 = vst.msk [vmem:[#allocation3] sm:$0xff] %vm1196_vm4, %v1005_v42 }
  0x97   :  { %v1007_v45 = vpop.permute.xlu0 %1006 }
  0x98   :  { %1198 = vst.msk [vmem:[#allocation3 + $0x8] sm:$0xff] %vm1196_vm4, %v1007_v45 }
  0x9a   :  { %v1071_v49 = vpop.permute.xlu1 %1070 }
  0x9b   :  { %v1069_v48 = vpop.permute.xlu0 %1068  ;;  %1230 = vst.msk [vmem:[#allocation3 + $0x108] sm:$0xff] %vm1196_vm4, %v1071_v49 }
  0x9c   :  { %1229 = vst.msk [vmem:[#allocation3 + $0x100] sm:$0xff] %vm1196_vm4, %v1069_v48 }
  0x9e   :  { %v1392_v51 = vpop.permute.xlu1 %1391 }
  0x9f   :  { %v1390_v50 = vpop.permute.xlu0 %1389  ;;  %1583 = vst.msk [vmem:[#allocation3 + $0x8] sm:$0xff] %vm1581_vm5, %v1392_v51 }
  0xa0   :  { %1582 = vst.msk [vmem:[#allocation3] sm:$0xff] %vm1581_vm5, %v1390_v50 }
  0xa2   :  { %v1456_v53 = vpop.permute.xlu1 %1455 }
  0xa3   :  { %v1454_v52 = vpop.permute.xlu0 %1453  ;;  %1615 = vst.msk [vmem:[#allocation3 + $0x108] sm:$0xff] %vm1581_vm5, %v1456_v53 }
  0xa4   :  { %1614 = vst.msk [vmem:[#allocation3 + $0x100] sm:$0xff] %vm1581_vm5, %v1454_v52 }
  0xeb   :  { %v5443_v55 = vpop.f32.mrb[0].mxu0 }
  0xec   :  { %v293_v57 = vadd.f32 %v5443_v55, %v5988_v54  ;;  %v284_v58 = vpop.f32.mrb[1].mxu0 }
  0xed   :  { %v5475_v56 = vpop.f32.mrb[0].mxu1  ;;  %v285_v61 = vadd.f32 %v5988_v54, %v284_v58  ;;  %v5444_v62 = vpop.f32.mrb[2].mxu0 }
  0xee   :  { %v421_v59 = vadd.f32 %v5475_v56, %v5988_v54  ;;  %v412_v60 = vpop.f32.mrb[1].mxu1  ;;  %v541_v2 = vmax.f32 %v293_v57, 0.0  ;;  %v296_v3 = vadd.f32 %v5444_v62, %v5988_v54  ;;  %v287_v4 = vpop.f32.mrb[3].mxu0 }
  0xef   :  { %v413_v63 = vadd.f32 %v5988_v54, %v412_v60  ;;  %v5476_v1 = vpop.f32.mrb[2].mxu1  ;;  %v539_v8 = vmax.f32 %v285_v61, 0.0  ;;  %v288_v9 = vadd.f32 %v5988_v54, %v287_v4 }
  0xf0   :  { %v573_v5 = vmax.f32 %v421_v59, 0.0  ;;  %v424_v6 = vadd.f32 %v5476_v1, %v5988_v54  ;;  %v415_v7 = vpop.f32.mrb[3].mxu1  ;;  %607 = vst.msk [vmem:[#allocation2 + $0x31] sm:$0xff] %vm604_vm0, %v541_v2  ;;  %v542_v12 = vmax.f32 %v296_v3, 0.0 }
  0xf1   :  { %v571_v10 = vmax.f32 %v413_v63, 0.0  ;;  %v416_v11 = vadd.f32 %v5988_v54, %v415_v7  ;;  %605 = vst.msk [vmem:[#allocation2 + $0x19] sm:$0xff] %vm604_vm0, %v539_v8  ;;  %v540_v14 = vmax.f32 %v288_v9, 0.0 }
  0xf2   :  { %639 = vst.msk [vmem:[#allocation2 + $0x1e1] sm:$0xff] %vm604_vm0, %v573_v5  ;;  %v574_v13 = vmax.f32 %v424_v6, 0.0  ;;  %608 = vst.msk [vmem:[#allocation2 + $0x39] sm:$0xff] %vm604_vm0, %v542_v12 }
  0xf3   :  { %637 = vst.msk [vmem:[#allocation2 + $0x1c9] sm:$0xff] %vm604_vm0, %v571_v10  ;;  %v572_v15 = vmax.f32 %v416_v11, 0.0  ;;  %606 = vst.msk [vmem:[#allocation2 + $0x21] sm:$0xff] %vm604_vm0, %v540_v14  ;;  %v5447_v16 = vpop.f32.mrb[4].mxu0 }
  0xf4   :  { %640 = vst.msk [vmem:[#allocation2 + $0x1e9] sm:$0xff] %vm604_vm0, %v574_v13  ;;  %v309_v18 = vadd.f32 %v5447_v16, %v5988_v54  ;;  %v300_v20 = vpop.f32.mrb[5].mxu0 }
  0xf5   :  { %638 = vst.msk [vmem:[#allocation2 + $0x1d1] sm:$0xff] %vm604_vm0, %v572_v15  ;;  %v5479_v17 = vpop.f32.mrb[4].mxu1  ;;  %v301_v22 = vadd.f32 %v5988_v54, %v300_v20  ;;  %v5448_v23 = vpop.f32.mrb[6].mxu0 }
  0xf6   :  { %v437_v19 = vadd.f32 %v5479_v17, %v5988_v54  ;;  %v428_v21 = vpop.f32.mrb[5].mxu1  ;;  %v545_v25 = vmax.f32 %v309_v18, 0.0  ;;  %v312_v27 = vadd.f32 %v5448_v23, %v5988_v54  ;;  %v303_v28 = vpop.f32.mrb[7].mxu0 }
  0xf7   :  { %v429_v24 = vadd.f32 %v5988_v54, %v428_v21  ;;  %v5480_v0 = vpop.f32.mrb[6].mxu1  ;;  %v880_v31 = vld [vmem:[#allocation2 + $0x31] sm:$0xff]  ;;  %v543_v33 = vmax.f32 %v301_v22, 0.0  ;;  %v304_v34 = vadd.f32 %v5988_v54, %v303_v28 }
  0xf8   :  { %v577_v26 = vmax.f32 %v437_v19, 0.0  ;;  %v440_v29 = vadd.f32 %v5480_v0, %v5988_v54  ;;  %v431_v30 = vpop.f32.mrb[7].mxu1  ;;  %v1648_v32 = vld [vmem:[#allocation2 + $0x30] sm:$0xff]  ;;  %1012 = vrot.lane.b32.xlu0 %v880_v31, %s5716_s1  ;;  %v878_v37 = vld [vmem:[#allocation2 + $0x19] sm:$0xff]  ;;  %611 = vst.msk [vmem:[#allocation2 + $0x61] sm:$0xff] %vm604_vm0, %v545_v25  ;;  %v546_v39 = vmax.f32 %v312_v27, 0.0 }
  0xf9   :  { %v575_v35 = vmax.f32 %v429_v24, 0.0  ;;  %v432_v36 = vadd.f32 %v5988_v54, %v431_v30  ;;  %v6015_v38 = vld [vmem:[#allocation2 + $0x18] sm:$0xff]  ;;  %816 = vst.msk [vmem:[#allocation3 + $0x20] sm:$0xff] %vm604_vm0, %v1648_v32  ;;  %1008 = vrot.lane.b32.xlu1 %v878_v37, %s5716_s1  ;;  %v912_v41 = vld [vmem:[#allocation2 + $0x1e1] sm:$0xff]  ;;  %609 = vst.msk [vmem:[#allocation2 + $0x49] sm:$0xff] %vm604_vm0, %v543_v33  ;;  %v544_v42 = vmax.f32 %v304_v34, 0.0 }
  0xfa   :  { %643 = vst.msk [vmem:[#allocation2 + $0x211] sm:$0xff] %vm604_vm0, %v577_v26  ;;  %v578_v40 = vmax.f32 %v440_v29, 0.0  ;;  %814 = vst.msk [vmem:[#allocation3 + $0x10] sm:$0xff] %vm604_vm0, %v6015_v38  ;;  %v6025_v44 = vld [vmem:[#allocation2 + $0x38] sm:$0xff]  ;;  %v6037_v52 = vld [vmem:[#allocation2 + $0x20] sm:$0xff] }
  0xfb   :  { %641 = vst.msk [vmem:[#allocation2 + $0x1f9] sm:$0xff] %vm604_vm0, %v575_v35  ;;  %v576_v43 = vmax.f32 %v432_v36, 0.0  ;;  %612 = vst.msk [vmem:[#allocation2 + $0x69] sm:$0xff] %vm604_vm0, %v546_v39  ;;  %v5451_v45 = vpop.f32.mrb[8].mxu0  ;;  %v881_v47 = vld [vmem:[#allocation2 + $0x39] sm:$0xff]  ;;  %v785_v2 = vld [vmem:[#allocation2 + $0x1e8] sm:$0xff] }
  0xfc   :  { %644 = vst.msk [vmem:[#allocation2 + $0x219] sm:$0xff] %vm604_vm0, %v578_v40  ;;  %610 = vst.msk [vmem:[#allocation2 + $0x51] sm:$0xff] %vm604_vm0, %v544_v42  ;;  %1076 = vrot.lane.b32.xlu0 %v912_v41, %s5716_s1  ;;  %v325_v48 = vadd.f32 %v5451_v45, %v5988_v54  ;;  %v316_v50 = vpop.f32.mrb[9].mxu0  ;;  %v784_v58 = vld [vmem:[#allocation2 + $0x1e0] sm:$0xff]  ;;  %v782_v3 = vld [vmem:[#allocation2 + $0x1c8] sm:$0xff] }
  0xfd   :  { %642 = vst.msk [vmem:[#allocation2 + $0x201] sm:$0xff] %vm604_vm0, %v576_v43  ;;  %v5483_v46 = vpop.f32.mrb[8].mxu1  ;;  %817 = vst.msk [vmem:[#allocation3 + $0x28] sm:$0xff] %vm604_vm0, %v6025_v44  ;;  %1014 = vrot.lane.b32.xlu1 %v881_v47, %s5716_s1  ;;  %v317_v53 = vadd.f32 %v5988_v54, %v316_v50  ;;  %v5452_v55 = vpop.f32.mrb[10].mxu0  ;;  %v913_v9 = vld [vmem:[#allocation2 + $0x1e9] sm:$0xff]  ;;  %v1266_v19 = vld [vmem:[#allocation2 + $0x3a] sm:$0xff] }
  0xfe   :  { %v453_v49 = vadd.f32 %v5483_v46, %v5988_v54  ;;  %v444_v51 = vpop.f32.mrb[9].mxu1  ;;  %v549_v59 = vmax.f32 %v325_v48, 0.0  ;;  %v328_v61 = vadd.f32 %v5452_v55, %v5988_v54  ;;  %v319_v62 = vpop.f32.mrb[11].mxu0  ;;  %848 = vst.msk [vmem:[#allocation3 + $0x120] sm:$0xff] %vm604_vm0, %v784_v58  ;;  %815 = vst.msk [vmem:[#allocation3 + $0x18] sm:$0xff] %vm604_vm0, %v6037_v52  ;;  %v910_v16 = vld [vmem:[#allocation2 + $0x1c9] sm:$0xff] }
  0xff   :  { %v445_v56 = vadd.f32 %v5988_v54, %v444_v51  ;;  %v5484_v57 = vpop.f32.mrb[10].mxu1  ;;  %v6046_v4 = vld [vmem:[#allocation2 + $0x60] sm:$0xff]  ;;  %v547_v5 = vmax.f32 %v317_v53, 0.0  ;;  %v320_v6 = vadd.f32 %v5988_v54, %v319_v62  ;;  %849 = vst.msk [vmem:[#allocation3 + $0x128] sm:$0xff] %vm604_vm0, %v785_v2  ;;  %846 = vst.msk [vmem:[#allocation3 + $0x110] sm:$0xff] %vm604_vm0, %v782_v3  ;;  %v783_v28 = vld [vmem:[#allocation2 + $0x1d0] sm:$0xff] }
 0x100   :  { %v581_v60 = vmax.f32 %v453_v49, 0.0  ;;  %v456_v63 = vadd.f32 %v5484_v57, %v5988_v54  ;;  %v447_v1 = vpop.f32.mrb[11].mxu1  ;;  %1778 = vrot.lane.b32.xlu0 %v1648_v32, %s5717_s2  ;;  %v6053_v10 = vld [vmem:[#allocation2 + $0x48] sm:$0xff]  ;;  %615 = vst.msk [vmem:[#allocation2 + $0x91] sm:$0xff] %vm604_vm0, %v549_v59  ;;  %v550_v11 = vmax.f32 %v328_v61, 0.0  ;;  %820 = vst.msk [vmem:[#allocation3 + $0x40] sm:$0xff] %vm604_vm0, %v6046_v4 }
 0x101   :  { %v579_v7 = vmax.f32 %v445_v56, 0.0  ;;  %v448_v8 = vadd.f32 %v5988_v54, %v447_v1  ;;  %1078 = vrot.lane.b32.xlu1 %v913_v9, %s5716_s1  ;;  %613 = vst.msk [vmem:[#allocation2 + $0x79] sm:$0xff] %vm604_vm0, %v547_v5  ;;  %v548_v13 = vmax.f32 %v320_v6, 0.0  ;;  %818 = vst.msk [vmem:[#allocation3 + $0x30] sm:$0xff] %vm604_vm0, %v6053_v10  ;;  %v6083_v35 = vld [vmem:[#allocation2 + $0x210] sm:$0xff] }
 0x102   :  { %647 = vst.msk [vmem:[#allocation2 + $0x241] sm:$0xff] %vm604_vm0, %v581_v60  ;;  %v582_v12 = vmax.f32 %v456_v63, 0.0  ;;  %v6064_v15 = vld [vmem:[#allocation2 + $0x68] sm:$0xff]  ;;  %616 = vst.msk [vmem:[#allocation2 + $0x99] sm:$0xff] %vm604_vm0, %v550_v11  ;;  %v1265_v50 = vld [vmem:[#allocation2 + $0x32] sm:$0xff] }
 0x103   :  { %645 = vst.msk [vmem:[#allocation2 + $0x229] sm:$0xff] %vm604_vm0, %v579_v7  ;;  %v580_v14 = vmax.f32 %v448_v8, 0.0  ;;  %614 = vst.msk [vmem:[#allocation2 + $0x81] sm:$0xff] %vm604_vm0, %v548_v13  ;;  %v5455_v17 = vpop.f32.mrb[12].mxu0  ;;  %v6076_v24 = vld [vmem:[#allocation2 + $0x50] sm:$0xff]  ;;  %v6085_v36 = vld [vmem:[#allocation2 + $0x218] sm:$0xff] }
 0x104   :  { %648 = vst.msk [vmem:[#allocation2 + $0x249] sm:$0xff] %vm604_vm0, %v582_v12  ;;  %821 = vst.msk [vmem:[#allocation3 + $0x48] sm:$0xff] %vm604_vm0, %v6064_v15  ;;  %1072 = vrot.lane.b32.xlu0 %v910_v16, %s5716_s1  ;;  %v341_v20 = vadd.f32 %v5455_v17, %v5988_v54  ;;  %v332_v22 = vpop.f32.mrb[13].mxu0  ;;  %v1298_v43 = vld [vmem:[#allocation2 + $0x1ea] sm:$0xff]  ;;  %v6125_v59 = vld [vmem:[#allocation2 + $0x1f8] sm:$0xff] }
 0x105   :  { %646 = vst.msk [vmem:[#allocation2 + $0x231] sm:$0xff] %vm604_vm0, %v580_v14  ;;  %v5487_v18 = vpop.f32.mrb[12].mxu1  ;;  %1399 = vrot.lane.b32.xlu1 %v1266_v19, %s5714_s12  ;;  %v333_v0 = vadd.f32 %v5988_v54, %v332_v22  ;;  %v5456_v25 = vpop.f32.mrb[14].mxu0  ;;  %847 = vst.msk [vmem:[#allocation3 + $0x118] sm:$0xff] %vm604_vm0, %v783_v28  ;;  %v6130_v1 = vld [vmem:[#allocation2 + $0x200] sm:$0xff] }
 0x106   :  { %v469_v21 = vadd.f32 %v5487_v18, %v5988_v54  ;;  %v460_v23 = vpop.f32.mrb[13].mxu1  ;;  %v553_v29 = vmax.f32 %v341_v20, 0.0  ;;  %v344_v31 = vadd.f32 %v5456_v25, %v5988_v54  ;;  %v335_v32 = vpop.f32.mrb[15].mxu0  ;;  %819 = vst.msk [vmem:[#allocation3 + $0x38] sm:$0xff] %vm604_vm0, %v6076_v24  ;;  %852 = vst.msk [vmem:[#allocation3 + $0x140] sm:$0xff] %vm604_vm0, %v6083_v35  ;;  %v879_v8 = vld [vmem:[#allocation2 + $0x21] sm:$0xff] }
 0x107   :  { %v461_v26 = vadd.f32 %v5988_v54, %v460_v23  ;;  %v5488_v27 = vpop.f32.mrb[14].mxu1  ;;  %v6089_v37 = vld [vmem:[#allocation2 + $0x90] sm:$0xff]  ;;  %v551_v39 = vmax.f32 %v333_v0, 0.0  ;;  %v336_v40 = vadd.f32 %v5988_v54, %v335_v32  ;;  %853 = vst.msk [vmem:[#allocation3 + $0x148] sm:$0xff] %vm604_vm0, %v6085_v36  ;;  %850 = vst.msk [vmem:[#allocation3 + $0x130] sm:$0xff] %vm604_vm0, %v6125_v59  ;;  %v1263_v22 = vld [vmem:[#allocation2 + $0x1a] sm:$0xff] }
 0x108   :  { %v585_v30 = vmax.f32 %v469_v21, 0.0  ;;  %v472_v33 = vadd.f32 %v5488_v27, %v5988_v54  ;;  %v463_v34 = vpop.f32.mrb[15].mxu1  ;;  %1774 = vrot.lane.b32.xlu0 %v6015_v38, %s5717_s2  ;;  %v6099_v45 = vld [vmem:[#allocation2 + $0x78] sm:$0xff]  ;;  %619 = vst.msk [vmem:[#allocation2 + $0xc1] sm:$0xff] %vm604_vm0, %v553_v29  ;;  %v554_v46 = vmax.f32 %v344_v31, 0.0  ;;  %824 = vst.msk [vmem:[#allocation3 + $0x60] sm:$0xff] %vm604_vm0, %v6089_v37 }
 0x109   :  { %v583_v41 = vmax.f32 %v461_v26, 0.0  ;;  %v464_v42 = vadd.f32 %v5988_v54, %v463_v34  ;;  %1463 = vrot.lane.b32.xlu1 %v1298_v43, %s5714_s12  ;;  %617 = vst.msk [vmem:[#allocation2 + $0xa9] sm:$0xff] %vm604_vm0, %v551_v39  ;;  %v552_v48 = vmax.f32 %v336_v40, 0.0  ;;  %822 = vst.msk [vmem:[#allocation3 + $0x50] sm:$0xff] %vm604_vm0, %v6099_v45  ;;  %v6110_v49 = vld [vmem:[#allocation2 + $0x98] sm:$0xff]  ;;  %v6132_v2 = vld [vmem:[#allocation2 + $0x240] sm:$0xff] }
 0x10a   :  { %651 = vst.msk [vmem:[#allocation2 + $0x271] sm:$0xff] %vm604_vm0, %v585_v30  ;;  %v586_v47 = vmax.f32 %v472_v33, 0.0  ;;  %620 = vst.msk [vmem:[#allocation2 + $0xc9] sm:$0xff] %vm604_vm0, %v554_v46  ;;  %v6123_v57 = vld [vmem:[#allocation2 + $0x80] sm:$0xff]  ;;  %v911_v25 = vld [vmem:[#allocation2 + $0x1d1] sm:$0xff] }
 0x10b   :  { %649 = vst.msk [vmem:[#allocation2 + $0x259] sm:$0xff] %vm604_vm0, %v583_v41  ;;  %v584_v38 = vmax.f32 %v464_v42, 0.0  ;;  %618 = vst.msk [vmem:[#allocation2 + $0xb1] sm:$0xff] %vm604_vm0, %v552_v48  ;;  %v5459_v51 = vpop.f32.mrb[16].mxu0  ;;  %v6134_v3 = vld [vmem:[#allocation2 + $0x248] sm:$0xff]  ;;  %v1296_v42 = vld [vmem:[#allocation2 + $0x1d2] sm:$0xff] }
 0x10c   :  { %652 = vst.msk [vmem:[#allocation2 + $0x279] sm:$0xff] %vm604_vm0, %v586_v47  ;;  %825 = vst.msk [vmem:[#allocation3 + $0x68] sm:$0xff] %vm604_vm0, %v6110_v49  ;;  %1397 = vrot.lane.b32.xlu0 %v1265_v50, %s5714_s12  ;;  %v357_v55 = vadd.f32 %v5459_v51, %v5988_v54  ;;  %v348_v58 = vpop.f32.mrb[17].mxu0  ;;  %v6173_v29 = vld [vmem:[#allocation2 + $0x228] sm:$0xff]  ;;  %v6178_v30 = vld [vmem:[#allocation2 + $0x230] sm:$0xff] }
 0x10d   :  { %650 = vst.msk [vmem:[#allocation2 + $0x261] sm:$0xff] %vm604_vm0, %v584_v38  ;;  %v5491_v53 = vpop.f32.mrb[16].mxu1  ;;  %1780 = vrot.lane.b32.xlu1 %v6025_v44, %s5717_s2  ;;  %v349_v62 = vadd.f32 %v5988_v54, %v348_v58  ;;  %v5460_v63 = vpop.f32.mrb[18].mxu0  ;;  %823 = vst.msk [vmem:[#allocation3 + $0x58] sm:$0xff] %vm604_vm0, %v6123_v57  ;;  %v1297_v44 = vld [vmem:[#allocation2 + $0x1e2] sm:$0xff]  ;;  %v1295_v33 = vld [vmem:[#allocation2 + $0x1ca] sm:$0xff] }
 0x10e   :  { %v485_v56 = vadd.f32 %v5491_v53, %v5988_v54  ;;  %v557_v60 = vmax.f32 %v357_v55, 0.0  ;;  %v360_v6 = vadd.f32 %v5460_v63, %v5988_v54  ;;  %v351_v7 = vpop.f32.mrb[19].mxu0  ;;  %851 = vst.msk [vmem:[#allocation3 + $0x138] sm:$0xff] %vm604_vm0, %v6130_v1  ;;  %856 = vst.msk [vmem:[#allocation3 + $0x160] sm:$0xff] %vm604_vm0, %v6132_v2  ;;  %v476_v13 = vpop.f32.mrb[17].mxu1  ;;  %v1264_v40 = vld [vmem:[#allocation2 + $0x22] sm:$0xff] }
 0x10f   :  { %v6138_v5 = vld [vmem:[#allocation2 + $0xc0] sm:$0xff]  ;;  %857 = vst.msk [vmem:[#allocation3 + $0x168] sm:$0xff] %vm604_vm0, %v6134_v3  ;;  %v555_v11 = vmax.f32 %v349_v62, 0.0  ;;  %v352_v12 = vadd.f32 %v5988_v54, %v351_v7  ;;  %v477_v16 = vadd.f32 %v5988_v54, %v476_v13  ;;  %v5492_v17 = vpop.f32.mrb[18].mxu1  ;;  %854 = vst.msk [vmem:[#allocation3 + $0x150] sm:$0xff] %vm604_vm0, %v6173_v29  ;;  %v916_v46 = vld [vmem:[#allocation2 + $0x211] sm:$0xff] }
 0x110   :  { %v589_v61 = vmax.f32 %v485_v56, 0.0  ;;  %1461 = vrot.lane.b32.xlu0 %v1297_v44, %s5714_s12  ;;  %v6148_v9 = vld [vmem:[#allocation2 + $0xa8] sm:$0xff]  ;;  %623 = vst.msk [vmem:[#allocation2 + $0xf1] sm:$0xff] %vm604_vm0, %v557_v60  ;;  %828 = vst.msk [vmem:[#allocation3 + $0x80] sm:$0xff] %vm604_vm0, %v6138_v5  ;;  %v558_v14 = vmax.f32 %v360_v6, 0.0  ;;  %v488_v20 = vadd.f32 %v5492_v17, %v5988_v54  ;;  %v479_v21 = vpop.f32.mrb[19].mxu1 }
 0x111   :  { %1010 = vrot.lane.b32.xlu1 %v879_v8, %s5716_s1  ;;  %826 = vst.msk [vmem:[#allocation3 + $0x70] sm:$0xff] %vm604_vm0, %v6148_v9  ;;  %v6159_v18 = vld [vmem:[#allocation2 + $0xc8] sm:$0xff]  ;;  %621 = vst.msk [vmem:[#allocation2 + $0xd9] sm:$0xff] %vm604_vm0, %v555_v11  ;;  %v556_v19 = vmax.f32 %v352_v12, 0.0  ;;  %v587_v23 = vmax.f32 %v477_v16, 0.0  ;;  %v480_v0 = vadd.f32 %v5988_v54, %v479_v21  ;;  %v6180_v31 = vld [vmem:[#allocation2 + $0x270] sm:$0xff] }
 0x112   :  { %655 = vst.msk [vmem:[#allocation2 + $0x2a1] sm:$0xff] %vm604_vm0, %v589_v61  ;;  %624 = vst.msk [vmem:[#allocation2 + $0xf9] sm:$0xff] %vm604_vm0, %v558_v14  ;;  %v590_v26 = vmax.f32 %v488_v20, 0.0  ;;  %v6171_v28 = vld [vmem:[#allocation2 + $0xb0] sm:$0xff]  ;;  %v6193_v34 = vld [vmem:[#allocation2 + $0x258] sm:$0xff] }
 0x113   :  { %829 = vst.msk [vmem:[#allocation3 + $0x88] sm:$0xff] %vm604_vm0, %v6159_v18  ;;  %622 = vst.msk [vmem:[#allocation2 + $0xe1] sm:$0xff] %vm604_vm0, %v556_v19  ;;  %v588_v27 = vmax.f32 %v480_v0, 0.0  ;;  %v6182_v32 = vld [vmem:[#allocation2 + $0x278] sm:$0xff]  ;;  %v884_v41 = vld [vmem:[#allocation2 + $0x61] sm:$0xff]  ;;  %v5463_v61 = vpop.f32.mrb[20].mxu0 }
 0x114   :  { %1393 = vrot.lane.b32.xlu0 %v1263_v22, %s5714_s12  ;;  %653 = vst.msk [vmem:[#allocation2 + $0x289] sm:$0xff] %vm604_vm0, %v587_v23  ;;  %656 = vst.msk [vmem:[#allocation2 + $0x2a9] sm:$0xff] %vm604_vm0, %v590_v26  ;;  %v6195_v39 = vld [vmem:[#allocation2 + $0x260] sm:$0xff]  ;;  %v885_v50 = vld [vmem:[#allocation2 + $0x69] sm:$0xff]  ;;  %v373_v62 = vadd.f32 %v5463_v61, %v5988_v54  ;;  %v364_v8 = vpop.f32.mrb[21].mxu0 }
 0x115   :  { %1074 = vrot.lane.b32.xlu1 %v911_v25, %s5716_s1  ;;  %827 = vst.msk [vmem:[#allocation3 + $0x78] sm:$0xff] %vm604_vm0, %v6171_v28  ;;  %654 = vst.msk [vmem:[#allocation2 + $0x291] sm:$0xff] %vm604_vm0, %v588_v27  ;;  %v882_v51 = vld [vmem:[#allocation2 + $0x49] sm:$0xff]  ;;  %v917_v56 = vld [vmem:[#allocation2 + $0x219] sm:$0xff]  ;;  %v5495_v6 = vpop.f32.mrb[20].mxu1  ;;  %v365_v11 = vadd.f32 %v5988_v54, %v364_v8  ;;  %v5464_v12 = vpop.f32.mrb[22].mxu0 }
 0x116   :  { %855 = vst.msk [vmem:[#allocation3 + $0x158] sm:$0xff] %vm604_vm0, %v6178_v30  ;;  %860 = vst.msk [vmem:[#allocation3 + $0x180] sm:$0xff] %vm604_vm0, %v6180_v31  ;;  %v1270_v58 = vld [vmem:[#allocation2 + $0x6a] sm:$0xff]  ;;  %v1302_v60 = vld [vmem:[#allocation2 + $0x21a] sm:$0xff]  ;;  %v561_v44 = vmax.f32 %v373_v62, 0.0  ;;  %v501_v7 = vadd.f32 %v5495_v6, %v5988_v54  ;;  %v376_v14 = vadd.f32 %v5464_v12, %v5988_v54  ;;  %v367_v16 = vpop.f32.mrb[23].mxu0 }
 0x117   :  { %861 = vst.msk [vmem:[#allocation3 + $0x188] sm:$0xff] %vm604_vm0, %v6182_v32  ;;  %858 = vst.msk [vmem:[#allocation3 + $0x170] sm:$0xff] %vm604_vm0, %v6193_v34  ;;  %v6204_v43 = vld [vmem:[#allocation2 + $0xf0] sm:$0xff]  ;;  %v1269_v63 = vld [vmem:[#allocation2 + $0x62] sm:$0xff]  ;;  %v559_v19 = vmax.f32 %v365_v11, 0.0  ;;  %v368_v20 = vadd.f32 %v5988_v54, %v367_v16 }
 0x118   :  { %1457 = vrot.lane.b32.xlu0 %v1295_v33, %s5714_s12  ;;  %859 = vst.msk [vmem:[#allocation3 + $0x178] sm:$0xff] %vm604_vm0, %v6195_v39  ;;  %832 = vst.msk [vmem:[#allocation3 + $0xa0] sm:$0xff] %vm604_vm0, %v6204_v43  ;;  %v6212_v47 = vld [vmem:[#allocation2 + $0xd8] sm:$0xff]  ;;  %v562_v22 = vmax.f32 %v376_v14, 0.0  ;;  %v1267_v33 = vld [vmem:[#allocation2 + $0x4a] sm:$0xff] }
 0x119   :  { %1395 = vrot.lane.b32.xlu1 %v1264_v40, %s5714_s12  ;;  %v6214_v48 = vld [vmem:[#allocation2 + $0xf8] sm:$0xff]  ;;  %830 = vst.msk [vmem:[#allocation3 + $0x90] sm:$0xff] %vm604_vm0, %v6212_v47  ;;  %627 = vst.msk [vmem:[#allocation2 + $0x121] sm:$0xff] %vm604_vm0, %v561_v44  ;;  %v560_v25 = vmax.f32 %v368_v20, 0.0  ;;  %v918_v8 = vld [vmem:[#allocation2 + $0x229] sm:$0xff] }
 0x11a   :  { %v6218_v38 = vld [vmem:[#allocation2 + $0xe0] sm:$0xff]  ;;  %833 = vst.msk [vmem:[#allocation3 + $0xa8] sm:$0xff] %vm604_vm0, %v6214_v48  ;;  %v1301_v13 = vld [vmem:[#allocation2 + $0x212] sm:$0xff]  ;;  %625 = vst.msk [vmem:[#allocation2 + $0x109] sm:$0xff] %vm604_vm0, %v559_v19 }
 0x11b   :  { %831 = vst.msk [vmem:[#allocation3 + $0x98] sm:$0xff] %vm604_vm0, %v6218_v38  ;;  %v6231_v53 = vld [vmem:[#allocation2 + $0x2a8] sm:$0xff]  ;;  %v883_v17 = vld [vmem:[#allocation2 + $0x51] sm:$0xff]  ;;  %628 = vst.msk [vmem:[#allocation2 + $0x129] sm:$0xff] %vm604_vm0, %v562_v22 }
 0x11c   :  { %1020 = vrot.lane.b32.xlu0 %v884_v41, %s5716_s1  ;;  %v6233_v55 = vld [vmem:[#allocation2 + $0x288] sm:$0xff]  ;;  %865 = vst.msk [vmem:[#allocation3 + $0x1a8] sm:$0xff] %vm604_vm0, %v6231_v53  ;;  %v6257_v21 = vld [vmem:[#allocation2 + $0x290] sm:$0xff]  ;;  %626 = vst.msk [vmem:[#allocation2 + $0x111] sm:$0xff] %vm604_vm0, %v560_v25 }
 0x11d   :  { %1459 = vrot.lane.b32.xlu1 %v1296_v42, %s5714_s12  ;;  %862 = vst.msk [vmem:[#allocation3 + $0x190] sm:$0xff] %vm604_vm0, %v6233_v55  ;;  %863 = vst.msk [vmem:[#allocation3 + $0x198] sm:$0xff] %vm604_vm0, %v6257_v21  ;;  %v915_v42 = vld [vmem:[#allocation2 + $0x201] sm:$0xff]  ;;  %v889_v6 = vld [vmem:[#allocation2 + $0x99] sm:$0xff] }
 0x120   :  { %1084 = vrot.lane.b32.xlu0 %v916_v46, %s5716_s1 }
 0x121   :  { %1776 = vrot.lane.b32.xlu1 %v6037_v52, %s5717_s2  ;;  %v6227_v52 = vld [vmem:[#allocation2 + $0x2a0] sm:$0xff]  ;;  %v6280_v61 = vld [vmem:[#allocation2 + $0x108] sm:$0xff] }
 0x122   :  { %864 = vst.msk [vmem:[#allocation3 + $0x1a0] sm:$0xff] %vm604_vm0, %v6227_v52  ;;  %834 = vst.msk [vmem:[#allocation3 + $0xb0] sm:$0xff] %vm604_vm0, %v6280_v61  ;;  %v6288_v44 = vld [vmem:[#allocation2 + $0x128] sm:$0xff] }
 0x123   :  { %v6284_v62 = vld [vmem:[#allocation2 + $0x110] sm:$0xff]  ;;  %837 = vst.msk [vmem:[#allocation3 + $0xc8] sm:$0xff] %vm604_vm0, %v6288_v44 }
 0x124   :  { %1786 = vrot.lane.b32.xlu0 %v6046_v4, %s5717_s2  ;;  %v914_v4 = vld [vmem:[#allocation2 + $0x1f9] sm:$0xff]  ;;  %835 = vst.msk [vmem:[#allocation3 + $0xb8] sm:$0xff] %vm604_vm0, %v6284_v62 }
 0x125   :  { %1022 = vrot.lane.b32.xlu1 %v885_v50, %s5716_s1 }
 0x128   :  { %1016 = vrot.lane.b32.xlu0 %v882_v51, %s5716_s1  ;;  %v1299_v51 = vld [vmem:[#allocation2 + $0x1fa] sm:$0xff] }
 0x129   :  { %1086 = vrot.lane.b32.xlu1 %v917_v56, %s5716_s1  ;;  %v1268_v56 = vld [vmem:[#allocation2 + $0x52] sm:$0xff] }
 0x12c   :  { %1080 = vrot.lane.b32.xlu0 %v914_v4, %s5716_s1  ;;  %v888_v4 = vld [vmem:[#allocation2 + $0x91] sm:$0xff] }
 0x12d   :  { %1407 = vrot.lane.b32.xlu1 %v1270_v58, %s5714_s12  ;;  %v1300_v58 = vld [vmem:[#allocation2 + $0x202] sm:$0xff] }
 0x130   :  { %1782 = vrot.lane.b32.xlu0 %v6053_v10, %s5717_s2  ;;  %v593_v10 = vmax.f32 %v501_v7, 0.0  ;;  %v921_v7 = vld [vmem:[#allocation2 + $0x249] sm:$0xff] }
 0x131   :  { %1471 = vrot.lane.b32.xlu1 %v1302_v60, %s5714_s12  ;;  %v920_v60 = vld [vmem:[#allocation2 + $0x241] sm:$0xff] }
 0x132   :  { %659 = vst.msk [vmem:[#allocation2 + $0x2d1] sm:$0xff] %vm604_vm0, %v593_v10  ;;  %v1274_v10 = vld [vmem:[#allocation2 + $0x9a] sm:$0xff] }
 0x134   :  { %1405 = vrot.lane.b32.xlu0 %v1269_v63, %s5714_s12  ;;  %v6286_v63 = vld [vmem:[#allocation2 + $0x120] sm:$0xff] }
 0x135   :  { %1788 = vrot.lane.b32.xlu1 %v6064_v15, %s5717_s2  ;;  %v492_v15 = vpop.f32.mrb[21].mxu1  ;;  %836 = vst.msk [vmem:[#allocation3 + $0xc0] sm:$0xff] %vm604_vm0, %v6286_v63 }
 0x136   :  { %v493_v23 = vadd.f32 %v5988_v54, %v492_v15  ;;  %v5496_v0 = vpop.f32.mrb[22].mxu1 }
 0x137   :  { %v504_v26 = vadd.f32 %v5496_v0, %v5988_v54  ;;  %v495_v27 = vpop.f32.mrb[23].mxu1 }
 0x138   :  { %1469 = vrot.lane.b32.xlu0 %v1301_v13, %s5714_s12  ;;  %v591_v40 = vmax.f32 %v493_v23, 0.0  ;;  %v496_v41 = vadd.f32 %v5988_v54, %v495_v27  ;;  %v1306_v13 = vld [vmem:[#allocation2 + $0x24a] sm:$0xff]  ;;  %v5499_v14 = vpop.f32.mrb[24].mxu1  ;;  %v1273_v23 = vld [vmem:[#allocation2 + $0x92] sm:$0xff] }
 0x139   :  { %1018 = vrot.lane.b32.xlu1 %v883_v17, %s5716_s1  ;;  %v594_v46 = vmax.f32 %v504_v26, 0.0  ;;  %v517_v17 = vadd.f32 %v5499_v14, %v5988_v54 }
 0x13a   :  { %657 = vst.msk [vmem:[#allocation2 + $0x2b9] sm:$0xff] %vm604_vm0, %v591_v40  ;;  %v592_v50 = vmax.f32 %v496_v41, 0.0 }
 0x13b   :  { %660 = vst.msk [vmem:[#allocation2 + $0x2d9] sm:$0xff] %vm604_vm0, %v594_v46  ;;  %v597_v0 = vmax.f32 %v517_v17, 0.0  ;;  %v924_v17 = vld [vmem:[#allocation2 + $0x271] sm:$0xff] }
 0x13c   :  { %1401 = vrot.lane.b32.xlu0 %v1267_v33, %s5714_s12  ;;  %658 = vst.msk [vmem:[#allocation2 + $0x2c1] sm:$0xff] %vm604_vm0, %v592_v50  ;;  %v508_v33 = vpop.f32.mrb[25].mxu1 }
 0x13d   :  { %1082 = vrot.lane.b32.xlu1 %v915_v42, %s5716_s1  ;;  %663 = vst.msk [vmem:[#allocation2 + $0x301] sm:$0xff] %vm604_vm0, %v597_v0  ;;  %v509_v40 = vadd.f32 %v5988_v54, %v508_v33  ;;  %v5500_v41 = vpop.f32.mrb[26].mxu1  ;;  %v1305_v42 = vld [vmem:[#allocation2 + $0x242] sm:$0xff] }
 0x13e   :  { %v520_v46 = vadd.f32 %v5500_v41, %v5988_v54  ;;  %v511_v50 = vpop.f32.mrb[27].mxu1 }
 0x140   :  { %1465 = vrot.lane.b32.xlu0 %v1299_v51, %s5714_s12  ;;  %v595_v51 = vmax.f32 %v509_v40, 0.0 }
 0x141   :  { %1403 = vrot.lane.b32.xlu1 %v1268_v56, %s5714_s12  ;;  %v512_v56 = vadd.f32 %v5988_v54, %v511_v50 }
 0x142   :  { %661 = vst.msk [vmem:[#allocation2 + $0x2e9] sm:$0xff] %vm604_vm0, %v595_v51 }
 0x144   :  { %1028 = vrot.lane.b32.xlu0 %v888_v4, %s5716_s1  ;;  %v598_v4 = vmax.f32 %v520_v46, 0.0  ;;  %v890_v46 = vld [vmem:[#allocation2 + $0xa9] sm:$0xff] }
 0x145   :  { %1467 = vrot.lane.b32.xlu1 %v1300_v58, %s5714_s12  ;;  %v6324_v58 = vld [vmem:[#allocation2 + $0x2d0] sm:$0xff] }
 0x146   :  { %868 = vst.msk [vmem:[#allocation3 + $0x1c0] sm:$0xff] %vm604_vm0, %v6324_v58  ;;  %664 = vst.msk [vmem:[#allocation2 + $0x309] sm:$0xff] %vm604_vm0, %v598_v4 }
 0x148   :  { %1092 = vrot.lane.b32.xlu0 %v920_v60, %s5716_s1  ;;  %v6326_v60 = vld [vmem:[#allocation2 + $0x2b8] sm:$0xff] }
 0x149   :  { %1784 = vrot.lane.b32.xlu1 %v6076_v24, %s5717_s2  ;;  %v886_v24 = vld [vmem:[#allocation2 + $0x79] sm:$0xff]  ;;  %866 = vst.msk [vmem:[#allocation3 + $0x1b0] sm:$0xff] %vm604_vm0, %v6326_v60 }
 0x14c   :  { %1794 = vrot.lane.b32.xlu0 %v6089_v37, %s5717_s2  ;;  %v5467_v37 = vpop.f32.mrb[24].mxu0 }
 0x14d   :  { %1030 = vrot.lane.b32.xlu1 %v889_v6, %s5716_s1  ;;  %v389_v11 = vadd.f32 %v5467_v37, %v5988_v54  ;;  %v380_v16 = vpop.f32.mrb[25].mxu0  ;;  %v6328_v6 = vld [vmem:[#allocation2 + $0x2d8] sm:$0xff] }
 0x14e   :  { %v381_v19 = vadd.f32 %v5988_v54, %v380_v16  ;;  %v5468_v20 = vpop.f32.mrb[26].mxu0  ;;  %869 = vst.msk [vmem:[#allocation3 + $0x1c8] sm:$0xff] %vm604_vm0, %v6328_v6  ;;  %v919_v37 = vld [vmem:[#allocation2 + $0x231] sm:$0xff] }
 0x14f   :  { %v565_v12 = vmax.f32 %v389_v11, 0.0  ;;  %v392_v15 = vadd.f32 %v5468_v20, %v5988_v54  ;;  %v383_v22 = vpop.f32.mrb[27].mxu0  ;;  %v1272_v11 = vld [vmem:[#allocation2 + $0x82] sm:$0xff]  ;;  %v1304_v16 = vld [vmem:[#allocation2 + $0x232] sm:$0xff] }
 0x150   :  { %1024 = vrot.lane.b32.xlu0 %v886_v24, %s5716_s1  ;;  %v563_v25 = vmax.f32 %v381_v19, 0.0  ;;  %v596_v24 = vmax.f32 %v512_v56, 0.0  ;;  %v5503_v56 = vpop.f32.mrb[28].mxu1 }
 0x151   :  { %1094 = vrot.lane.b32.xlu1 %v921_v7, %s5716_s1  ;;  %631 = vst.msk [vmem:[#allocation2 + $0x151] sm:$0xff] %vm604_vm0, %v565_v12  ;;  %v566_v26 = vmax.f32 %v392_v15, 0.0  ;;  %v6337_v7 = vld [vmem:[#allocation2 + $0x2c0] sm:$0xff] }
 0x152   :  { %629 = vst.msk [vmem:[#allocation2 + $0x139] sm:$0xff] %vm604_vm0, %v563_v25  ;;  %867 = vst.msk [vmem:[#allocation3 + $0x1b8] sm:$0xff] %vm604_vm0, %v6337_v7  ;;  %v892_v12 = vld [vmem:[#allocation2 + $0xc1] sm:$0xff] }
 0x153   :  { %632 = vst.msk [vmem:[#allocation2 + $0x159] sm:$0xff] %vm604_vm0, %v566_v26  ;;  %662 = vst.msk [vmem:[#allocation2 + $0x2f1] sm:$0xff] %vm604_vm0, %v596_v24  ;;  %v893_v26 = vld [vmem:[#allocation2 + $0xc9] sm:$0xff] }
 0x154   :  { %1088 = vrot.lane.b32.xlu0 %v918_v8, %s5716_s1  ;;  %v1271_v8 = vld [vmem:[#allocation2 + $0x7a] sm:$0xff] }
 0x155   :  { %1415 = vrot.lane.b32.xlu1 %v1274_v10, %s5714_s12  ;;  %v1303_v10 = vld [vmem:[#allocation2 + $0x22a] sm:$0xff] }
 0x158   :  { %1790 = vrot.lane.b32.xlu0 %v6099_v45, %s5717_s2  ;;  %v384_v45 = vadd.f32 %v5988_v54, %v383_v22  ;;  %v6354_v22 = vld [vmem:[#allocation2 + $0x150] sm:$0xff] }
 0x159   :  { %1479 = vrot.lane.b32.xlu1 %v1306_v13, %s5714_s12  ;;  %v6351_v20 = vld [vmem:[#allocation2 + $0x138] sm:$0xff]  ;;  %840 = vst.msk [vmem:[#allocation3 + $0xe0] sm:$0xff] %vm604_vm0, %v6354_v22 }
 0x15a   :  { %v564_v27 = vmax.f32 %v384_v45, 0.0  ;;  %v6358_v0 = vld [vmem:[#allocation2 + $0x158] sm:$0xff]  ;;  %838 = vst.msk [vmem:[#allocation3 + $0xd0] sm:$0xff] %vm604_vm0, %v6351_v20 }
 0x15b   :  { %841 = vst.msk [vmem:[#allocation3 + $0xe8] sm:$0xff] %vm604_vm0, %v6358_v0 }
 0x15c   :  { %1413 = vrot.lane.b32.xlu0 %v1273_v23, %s5714_s12  ;;  %630 = vst.msk [vmem:[#allocation2 + $0x141] sm:$0xff] %vm604_vm0, %v564_v27  ;;  %v5471_v27 = vpop.f32.mrb[28].mxu0 }
 0x15d   :  { %1796 = vrot.lane.b32.xlu1 %v6110_v49, %s5717_s2  ;;  %v887_v49 = vld [vmem:[#allocation2 + $0x81] sm:$0xff]  ;;  %v405_v33 = vadd.f32 %v5471_v27, %v5988_v54  ;;  %v396_v40 = vpop.f32.mrb[29].mxu0 }
 0x15f   :  { %v569_v50 = vmax.f32 %v405_v33, 0.0 }
 0x160   :  { %1477 = vrot.lane.b32.xlu0 %v1305_v42, %s5714_s12  ;;  %v397_v42 = vadd.f32 %v5988_v54, %v396_v40 }
 0x161   :  { %1026 = vrot.lane.b32.xlu1 %v887_v49, %s5716_s1  ;;  %v5472_v49 = vpop.f32.mrb[30].mxu0  ;;  %635 = vst.msk [vmem:[#allocation2 + $0x181] sm:$0xff] %vm604_vm0, %v569_v50 }
 0x162   :  { %v567_v51 = vmax.f32 %v397_v42, 0.0  ;;  %v408_v4 = vadd.f32 %v5472_v49, %v5988_v54  ;;  %v399_v24 = vpop.f32.mrb[31].mxu0 }
 0x163   :  { %v6356_v23 = vld [vmem:[#allocation2 + $0x140] sm:$0xff] }
 0x164   :  { %1409 = vrot.lane.b32.xlu0 %v1271_v8, %s5714_s12  ;;  %839 = vst.msk [vmem:[#allocation3 + $0xd8] sm:$0xff] %vm604_vm0, %v6356_v23  ;;  %v533_v8 = vadd.f32 %v5503_v56, %v5988_v54  ;;  %633 = vst.msk [vmem:[#allocation2 + $0x169] sm:$0xff] %vm604_vm0, %v567_v51  ;;  %v6413_v51 = vld [vmem:[#allocation2 + $0x300] sm:$0xff] }
 0x165   :  { %1090 = vrot.lane.b32.xlu1 %v919_v37, %s5716_s1  ;;  %v524_v37 = vpop.f32.mrb[29].mxu1  ;;  %872 = vst.msk [vmem:[#allocation3 + $0x1e0] sm:$0xff] %vm604_vm0, %v6413_v51 }
 0x168   :  { %1473 = vrot.lane.b32.xlu0 %v1303_v10, %s5714_s12  ;;  %v400_v10 = vadd.f32 %v5988_v54, %v399_v24  ;;  %v6421_v24 = vld [vmem:[#allocation2 + $0x308] sm:$0xff] }
 0x169   :  { %1411 = vrot.lane.b32.xlu1 %v1272_v11, %s5714_s12  ;;  %873 = vst.msk [vmem:[#allocation3 + $0x1e8] sm:$0xff] %vm604_vm0, %v6421_v24 }
 0x16a   :  { %v1013_v13 = vpop.permute.xlu0 %1012 }
 0x16b   :  { %1201 = vst.msk [vmem:[#allocation3 + $0x20] sm:$0xff] %vm1196_vm4, %v1013_v13  ;;  %v1009_v14 = vpop.permute.xlu1 %1008  ;;  %v570_v13 = vmax.f32 %v408_v4, 0.0  ;;  %v6417_v4 = vld [vmem:[#allocation2 + $0x2f0] sm:$0xff] }
 0x16c   :  { %1199 = vst.msk [vmem:[#allocation3 + $0x10] sm:$0xff] %vm1196_vm4, %v1009_v14  ;;  %1036 = vrot.lane.b32.xlu0 %v892_v12, %s5716_s1  ;;  %v525_v12 = vadd.f32 %v5988_v54, %v524_v37  ;;  %v1309_v37 = vld [vmem:[#allocation2 + $0x272] sm:$0xff] }
 0x16d   :  { %1475 = vrot.lane.b32.xlu1 %v1304_v16, %s5714_s12  ;;  %v922_v16 = vld [vmem:[#allocation2 + $0x259] sm:$0xff]  ;;  %636 = vst.msk [vmem:[#allocation2 + $0x189] sm:$0xff] %vm604_vm0, %v570_v13  ;;  %871 = vst.msk [vmem:[#allocation3 + $0x1d8] sm:$0xff] %vm604_vm0, %v6417_v4  ;;  %v923_v13 = vld [vmem:[#allocation2 + $0x261] sm:$0xff] }
 0x16e   :  { %v1077_v19 = vpop.permute.xlu0 %1076 }
 0x16f   :  { %1233 = vst.msk [vmem:[#allocation3 + $0x120] sm:$0xff] %vm1196_vm4, %v1077_v19  ;;  %v1015_v15 = vpop.permute.xlu1 %1014  ;;  %v568_v19 = vmax.f32 %v400_v10, 0.0 }
 0x170   :  { %1202 = vst.msk [vmem:[#allocation3 + $0x28] sm:$0xff] %vm1196_vm4, %v1015_v15  ;;  %1100 = vrot.lane.b32.xlu0 %v924_v17, %s5716_s1  ;;  %v601_v17 = vmax.f32 %v533_v8, 0.0  ;;  %v1278_v15 = vld [vmem:[#allocation2 + $0xca] sm:$0xff] }
 0x171   :  { %1792 = vrot.lane.b32.xlu1 %v6123_v57, %s5717_s2  ;;  %634 = vst.msk [vmem:[#allocation2 + $0x171] sm:$0xff] %vm604_vm0, %v568_v19  ;;  %v1276_v19 = vld [vmem:[#allocation2 + $0xb2] sm:$0xff] }
 0x172   :  { %v6372_v25 = vpop.permute.xlu0 %1778  ;;  %667 = vst.msk [vmem:[#allocation2 + $0x331] sm:$0xff] %vm604_vm0, %v601_v17  ;;  %v1307_v17 = vld [vmem:[#allocation2 + $0x25a] sm:$0xff] }
 0x173   :  { %v1079_v45 = vpop.permute.xlu1 %1078 }
 0x174   :  { %1234 = vst.msk [vmem:[#allocation3 + $0x128] sm:$0xff] %vm1196_vm4, %v1079_v45  ;;  %1802 = vrot.lane.b32.xlu0 %v6138_v5, %s5717_s2  ;;  %v925_v5 = vld [vmem:[#allocation2 + $0x279] sm:$0xff]  ;;  %v599_v45 = vmax.f32 %v525_v12, 0.0  ;;  %v1275_v12 = vld [vmem:[#allocation2 + $0xaa] sm:$0xff] }
 0x175   :  { %1038 = vrot.lane.b32.xlu1 %v893_v26, %s5716_s1  ;;  %v5504_v26 = vpop.f32.mrb[30].mxu1 }
 0x176   :  { %v1073_v41 = vpop.permute.xlu0 %1072  ;;  %v536_v27 = vadd.f32 %v5504_v26, %v5988_v54  ;;  %v527_v33 = vpop.f32.mrb[31].mxu1  ;;  %665 = vst.msk [vmem:[#allocation2 + $0x319] sm:$0xff] %vm604_vm0, %v599_v45 }
 0x177   :  { %1231 = vst.msk [vmem:[#allocation3 + $0x110] sm:$0xff] %vm1196_vm4, %v1073_v41  ;;  %v1400_v57 = vpop.permute.xlu1 %1399  ;;  %v528_v41 = vadd.f32 %v5988_v54, %v527_v33  ;;  %v1277_v54 = vld [vmem:[#allocation2 + $0xc2] sm:$0xff] }
 0x178   :  { %1587 = vst.msk [vmem:[#allocation3 + $0x28] sm:$0xff] %vm1581_vm5, %v1400_v57  ;;  %1032 = vrot.lane.b32.xlu0 %v890_v46, %s5716_s1  ;;  %v602_v57 = vmax.f32 %v536_v27, 0.0  ;;  %v1310_v46 = vld [vmem:[#allocation2 + $0x27a] sm:$0xff]  ;;  %v1308_v27 = vld [vmem:[#allocation2 + $0x262] sm:$0xff] }
 0x179   :  { %1102 = vrot.lane.b32.xlu1 %v925_v5, %s5716_s1  ;;  %v600_v50 = vmax.f32 %v528_v41, 0.0  ;;  %v928_v33 = vld [vmem:[#allocation2 + $0x2a1] sm:$0xff] }
 0x17a   :  { %v1775_v11 = vpop.permute.xlu0 %1774  ;;  %668 = vst.msk [vmem:[#allocation2 + $0x339] sm:$0xff] %vm604_vm0, %v602_v57 }
 0x17b   :  { %1967 = vst.msk [vmem:[#allocation3] sm:$0xff] %vm1966_vm6, %v1775_v11  ;;  %v1464_v14 = vpop.permute.xlu1 %1463 }
 0x17c   :  { %1619 = vst.msk [vmem:[#allocation3 + $0x128] sm:$0xff] %vm1581_vm5, %v1464_v14  ;;  %1096 = vrot.lane.b32.xlu0 %v922_v16, %s5716_s1 }
 0x17d   :  { %1423 = vrot.lane.b32.xlu1 %v1278_v15, %s5714_s12  ;;  %666 = vst.msk [vmem:[#allocation2 + $0x321] sm:$0xff] %vm604_vm0, %v600_v50  ;;  %v896_v15 = vld [vmem:[#allocation2 + $0xf1] sm:$0xff] }
 0x17e   :  { %v1398_v40 = vpop.permute.xlu0 %1397 }
 0x17f   :  { %1586 = vst.msk [vmem:[#allocation3 + $0x20] sm:$0xff] %vm1581_vm5, %v1398_v40  ;;  %v1781_v42 = vpop.permute.xlu1 %1780 }
 0x180   :  { %1798 = vrot.lane.b32.xlu0 %v6148_v9, %s5717_s2  ;;  %v6411_v9 = vld [vmem:[#allocation2 + $0x2e8] sm:$0xff] }
 0x181   :  { %1487 = vrot.lane.b32.xlu1 %v1310_v46, %s5714_s12  ;;  %870 = vst.msk [vmem:[#allocation3 + $0x1d0] sm:$0xff] %vm604_vm0, %v6411_v9  ;;  %v897_v46 = vld [vmem:[#allocation2 + $0xf9] sm:$0xff] }
 0x182   :  { %v1462_v49 = vpop.permute.xlu0 %1461 }
 0x183   :  { %1618 = vst.msk [vmem:[#allocation3 + $0x120] sm:$0xff] %vm1581_vm5, %v1462_v49  ;;  %v1011_v5 = vpop.permute.xlu1 %1010 }
 0x184   :  { %1200 = vst.msk [vmem:[#allocation3 + $0x18] sm:$0xff] %vm1196_vm4, %v1011_v5  ;;  %1421 = vrot.lane.b32.xlu0 %v1277_v54, %s5714_s12  ;;  %v894_v5 = vld [vmem:[#allocation2 + $0xd9] sm:$0xff]  ;;  %v6460_v54 = vld [vmem:[#allocation2 + $0x170] sm:$0xff] }
 0x185   :  { %1804 = vrot.lane.b32.xlu1 %v6159_v18, %s5717_s2  ;;  %v891_v18 = vld [vmem:[#allocation2 + $0xb1] sm:$0xff]  ;;  %843 = vst.msk [vmem:[#allocation3 + $0xf8] sm:$0xff] %vm604_vm0, %v6460_v54 }
 0x186   :  { %v1394_v56 = vpop.permute.xlu0 %1393 }
 0x187   :  { %1584 = vst.msk [vmem:[#allocation3 + $0x10] sm:$0xff] %vm1581_vm5, %v1394_v56  ;;  %v1075_v8 = vpop.permute.xlu1 %1074 }
 0x188   :  { %1969 = vst.msk [vmem:[#allocation3 + $0x10] sm:$0xff] %vm1966_vm6, %v6372_v25  ;;  %1485 = vrot.lane.b32.xlu0 %v1309_v37, %s5714_s12  ;;  %v6438_v25 = vld [vmem:[#allocation2 + $0x168] sm:$0xff]  ;;  %v1282_v37 = vld [vmem:[#allocation2 + $0xfa] sm:$0xff] }
 0x189   :  { %1232 = vst.msk [vmem:[#allocation3 + $0x118] sm:$0xff] %vm1196_vm4, %v1075_v8  ;;  %1034 = vrot.lane.b32.xlu1 %v891_v18, %s5716_s1  ;;  %v926_v8 = vld [vmem:[#allocation2 + $0x289] sm:$0xff]  ;;  %v6470_v18 = vld [vmem:[#allocation2 + $0x318] sm:$0xff] }
 0x18a   :  { %v1458_v10 = vpop.permute.xlu0 %1457  ;;  %842 = vst.msk [vmem:[#allocation3 + $0xf0] sm:$0xff] %vm604_vm0, %v6438_v25  ;;  %874 = vst.msk [vmem:[#allocation3 + $0x1f0] sm:$0xff] %vm604_vm0, %v6470_v18 }
 0x18b   :  { %1616 = vst.msk [vmem:[#allocation3 + $0x110] sm:$0xff] %vm1581_vm5, %v1458_v10  ;;  %v1396_v11 = vpop.permute.xlu1 %1395 }
 0x18c   :  { %1585 = vst.msk [vmem:[#allocation3 + $0x18] sm:$0xff] %vm1581_vm5, %v1396_v11  ;;  %1417 = vrot.lane.b32.xlu0 %v1275_v12, %s5714_s12  ;;  %v1314_v12 = vld [vmem:[#allocation2 + $0x2aa] sm:$0xff] }
 0x18d   :  { %1970 = vst.msk [vmem:[#allocation3 + $0x18] sm:$0xff] %vm1966_vm6, %v1781_v42  ;;  %1098 = vrot.lane.b32.xlu1 %v923_v13, %s5716_s1 }
 0x18e   :  { %v1021_v14 = vpop.permute.xlu0 %1020 }
 0x18f   :  { %1205 = vst.msk [vmem:[#allocation3 + $0x40] sm:$0xff] %vm1196_vm4, %v1021_v14  ;;  %v1460_v16 = vpop.permute.xlu1 %1459  ;;  %v6479_v14 = vld [vmem:[#allocation2 + $0x320] sm:$0xff] }
 0x190   :  { %1617 = vst.msk [vmem:[#allocation3 + $0x118] sm:$0xff] %vm1581_vm5, %v1460_v16  ;;  %1481 = vrot.lane.b32.xlu0 %v1307_v17, %s5714_s12  ;;  %v1281_v17 = vld [vmem:[#allocation2 + $0xf2] sm:$0xff] }
 0x191   :  { %1419 = vrot.lane.b32.xlu1 %v1276_v19, %s5714_s12  ;;  %875 = vst.msk [vmem:[#allocation3 + $0x1f8] sm:$0xff] %vm604_vm0, %v6479_v14 }
 0x192   :  { %v1085_v45 = vpop.permute.xlu0 %1084 }
 0x193   :  { %1237 = vst.msk [vmem:[#allocation3 + $0x140] sm:$0xff] %vm1196_vm4, %v1085_v45  ;;  %v1777_v26 = vpop.permute.xlu1 %1776  ;;  %v895_v45 = vld [vmem:[#allocation2 + $0xe1] sm:$0xff] }
 0x194   :  { %1968 = vst.msk [vmem:[#allocation3 + $0x8] sm:$0xff] %vm1966_vm6, %v1777_v26  ;;  %1044 = vrot.lane.b32.xlu0 %v896_v15, %s5716_s1  ;;  %v1313_v15 = vld [vmem:[#allocation2 + $0x2a2] sm:$0xff] }
 0x195   :  { %1483 = vrot.lane.b32.xlu1 %v1308_v27, %s5714_s12 }
 0x196   :  { %v1787_v40 = vpop.permute.xlu0 %1786 }
 0x197   :  { %v1023_v41 = vpop.permute.xlu1 %1022 }
 0x198   :  { %1206 = vst.msk [vmem:[#allocation3 + $0x48] sm:$0xff] %vm1196_vm4, %v1023_v41  ;;  %1108 = vrot.lane.b32.xlu0 %v928_v33, %s5716_s1  ;;  %v1279_v33 = vld [vmem:[#allocation2 + $0xda] sm:$0xff] }
 0x199   :  { %1800 = vrot.lane.b32.xlu1 %v6171_v28, %s5717_s2  ;;  %v929_v28 = vld [vmem:[#allocation2 + $0x2a9] sm:$0xff] }
 0x19a   :  { %v1017_v42 = vpop.permute.xlu0 %1016 }
 0x19b   :  { %1203 = vst.msk [vmem:[#allocation3 + $0x30] sm:$0xff] %vm1196_vm4, %v1017_v42  ;;  %v1087_v57 = vpop.permute.xlu1 %1086  ;;  %v1311_v42 = vld [vmem:[#allocation2 + $0x28a] sm:$0xff] }
 0x19c   :  { %1238 = vst.msk [vmem:[#allocation3 + $0x148] sm:$0xff] %vm1196_vm4, %v1087_v57  ;;  %1810 = vrot.lane.b32.xlu0 %v6204_v43, %s5717_s2  ;;  %v1280_v57 = vld [vmem:[#allocation2 + $0xe2] sm:$0xff] }
 0x19d   :  { %1046 = vrot.lane.b32.xlu1 %v897_v46, %s5716_s1  ;;  %v900_v46 = vld [vmem:[#allocation2 + $0x121] sm:$0xff] }
 0x19e   :  { %v1081_v50 = vpop.permute.xlu0 %1080 }
 0x19f   :  { %1235 = vst.msk [vmem:[#allocation3 + $0x130] sm:$0xff] %vm1196_vm4, %v1081_v50  ;;  %v1408_v49 = vpop.permute.xlu1 %1407 }
 0x1a0   :  { %1591 = vst.msk [vmem:[#allocation3 + $0x48] sm:$0xff] %vm1581_vm5, %v1408_v49  ;;  %1040 = vrot.lane.b32.xlu0 %v894_v5, %s5716_s1  ;;  %v1312_v5 = vld [vmem:[#allocation2 + $0x292] sm:$0xff] }
 0x1a1   :  { %1110 = vrot.lane.b32.xlu1 %v929_v28, %s5716_s1  ;;  %v932_v28 = vld [vmem:[#allocation2 + $0x2d1] sm:$0xff] }
 0x1a2   :  { %v1783_v43 = vpop.permute.xlu0 %1782 }
 0x1a3   :  { %1971 = vst.msk [vmem:[#allocation3 + $0x20] sm:$0xff] %vm1966_vm6, %v1783_v43  ;;  %v1472_v56 = vpop.permute.xlu1 %1471 }
 0x1a4   :  { %1623 = vst.msk [vmem:[#allocation3 + $0x148] sm:$0xff] %vm1581_vm5, %v1472_v56  ;;  %1104 = vrot.lane.b32.xlu0 %v926_v8, %s5716_s1  ;;  %v898_v8 = vld [vmem:[#allocation2 + $0x109] sm:$0xff] }
 0x1a5   :  { %1431 = vrot.lane.b32.xlu1 %v1282_v37, %s5714_s12 }
 0x1a6   :  { %v1406_v10 = vpop.permute.xlu0 %1405 }
 0x1a7   :  { %1590 = vst.msk [vmem:[#allocation3 + $0x40] sm:$0xff] %vm1581_vm5, %v1406_v10  ;;  %v1789_v11 = vpop.permute.xlu1 %1788 }
 0x1a8   :  { %1806 = vrot.lane.b32.xlu0 %v6212_v47, %s5717_s2 }
 0x1a9   :  { %1495 = vrot.lane.b32.xlu1 %v1314_v12, %s5714_s12  ;;  %v930_v12 = vld [vmem:[#allocation2 + $0x2b9] sm:$0xff] }
 0x1aa   :  { %v1470_v13 = vpop.permute.xlu0 %1469 }
 0x1ab   :  { %1622 = vst.msk [vmem:[#allocation3 + $0x140] sm:$0xff] %vm1581_vm5, %v1470_v13  ;;  %v1019_v16 = vpop.permute.xlu1 %1018 }
 0x1ac   :  { %1204 = vst.msk [vmem:[#allocation3 + $0x38] sm:$0xff] %vm1196_vm4, %v1019_v16  ;;  %1429 = vrot.lane.b32.xlu0 %v1281_v17, %s5714_s12 }
 0x1ad   :  { %1812 = vrot.lane.b32.xlu1 %v6214_v48, %s5717_s2  ;;  %v927_v48 = vld [vmem:[#allocation2 + $0x291] sm:$0xff] }
 0x1ae   :  { %v1402_v47 = vpop.permute.xlu0 %1401 }
 0x1af   :  { %1588 = vst.msk [vmem:[#allocation3 + $0x30] sm:$0xff] %vm1581_vm5, %v1402_v47  ;;  %v1083_v19 = vpop.permute.xlu1 %1082 }
 0x1b0   :  { %1973 = vst.msk [vmem:[#allocation3 + $0x30] sm:$0xff] %vm1966_vm6, %v1787_v40  ;;  %1493 = vrot.lane.b32.xlu0 %v1313_v15, %s5714_s12 }
 0x1b1   :  { %1236 = vst.msk [vmem:[#allocation3 + $0x138] sm:$0xff] %vm1196_vm4, %v1083_v19  ;;  %1042 = vrot.lane.b32.xlu1 %v895_v45, %s5716_s1  ;;  %v1286_v19 = vld [vmem:[#allocation2 + $0x12a] sm:$0xff] }
 0x1b2   :  { %v1466_v26 = vpop.permute.xlu0 %1465 }
 0x1b3   :  { %1620 = vst.msk [vmem:[#allocation3 + $0x130] sm:$0xff] %vm1581_vm5, %v1466_v26  ;;  %v1404_v27 = vpop.permute.xlu1 %1403  ;;  %v1285_v26 = vld [vmem:[#allocation2 + $0x122] sm:$0xff] }
 0x1b4   :  { %1589 = vst.msk [vmem:[#allocation3 + $0x38] sm:$0xff] %vm1581_vm5, %v1404_v27  ;;  %1425 = vrot.lane.b32.xlu0 %v1279_v33, %s5714_s12  ;;  %v1318_v27 = vld [vmem:[#allocation2 + $0x2da] sm:$0xff] }
 0x1b5   :  { %1974 = vst.msk [vmem:[#allocation3 + $0x38] sm:$0xff] %vm1966_vm6, %v1789_v11  ;;  %1106 = vrot.lane.b32.xlu1 %v927_v48, %s5716_s1  ;;  %v901_v11 = vld [vmem:[#allocation2 + $0x129] sm:$0xff] }
 0x1b6   :  { %v1029_v40 = vpop.permute.xlu0 %1028 }
 0x1b7   :  { %1209 = vst.msk [vmem:[#allocation3 + $0x60] sm:$0xff] %vm1196_vm4, %v1029_v40  ;;  %v1468_v41 = vpop.permute.xlu1 %1467  ;;  %v1317_v40 = vld [vmem:[#allocation2 + $0x2d2] sm:$0xff] }
 0x1b8   :  { %1621 = vst.msk [vmem:[#allocation3 + $0x138] sm:$0xff] %vm1581_vm5, %v1468_v41  ;;  %1489 = vrot.lane.b32.xlu0 %v1311_v42, %s5714_s12 }
 0x1b9   :  { %1427 = vrot.lane.b32.xlu1 %v1280_v57, %s5714_s12  ;;  %v1283_v57 = vld [vmem:[#allocation2 + $0x10a] sm:$0xff] }
 0x1ba   :  { %v1093_v50 = vpop.permute.xlu0 %1092 }
 0x1bb   :  { %1241 = vst.msk [vmem:[#allocation3 + $0x160] sm:$0xff] %vm1196_vm4, %v1093_v50  ;;  %v1785_v49 = vpop.permute.xlu1 %1784 }
 0x1bc   :  { %1972 = vst.msk [vmem:[#allocation3 + $0x28] sm:$0xff] %vm1966_vm6, %v1785_v49  ;;  %1052 = vrot.lane.b32.xlu0 %v900_v46, %s5716_s1  ;;  %v931_v46 = vld [vmem:[#allocation2 + $0x2c1] sm:$0xff] }
 0x1bd   :  { %1491 = vrot.lane.b32.xlu1 %v1312_v5, %s5714_s12  ;;  %v1315_v5 = vld [vmem:[#allocation2 + $0x2ba] sm:$0xff] }
 0x1be   :  { %v1795_v43 = vpop.permute.xlu0 %1794 }
 0x1bf   :  { %v1031_v56 = vpop.permute.xlu1 %1030 }
 0x1c0   :  { %1210 = vst.msk [vmem:[#allocation3 + $0x68] sm:$0xff] %vm1196_vm4, %v1031_v56  ;;  %1116 = vrot.lane.b32.xlu0 %v932_v28, %s5716_s1  ;;  %v1284_v28 = vld [vmem:[#allocation2 + $0x112] sm:$0xff] }
 0x1c1   :  { %1808 = vrot.lane.b32.xlu1 %v6218_v38, %s5717_s2  ;;  %v933_v38 = vld [vmem:[#allocation2 + $0x2d9] sm:$0xff] }
 0x1c2   :  { %v1025_v37 = vpop.permute.xlu0 %1024 }
 0x1c3   :  { %1207 = vst.msk [vmem:[#allocation3 + $0x50] sm:$0xff] %vm1196_vm4, %v1025_v37  ;;  %v1095_v10 = vpop.permute.xlu1 %1094  ;;  %v1316_v37 = vld [vmem:[#allocation2 + $0x2c2] sm:$0xff] }
 0x1c4   :  { %1242 = vst.msk [vmem:[#allocation3 + $0x168] sm:$0xff] %vm1196_vm4, %v1095_v10  ;;  %1048 = vrot.lane.b32.xlu0 %v898_v8, %s5716_s1  ;;  %v936_v10 = vld [vmem:[#allocation2 + $0x301] sm:$0xff] }
 0x1c5   :  { %1054 = vrot.lane.b32.xlu1 %v901_v11, %s5716_s1 }
 0x1c6   :  { %v1089_v13 = vpop.permute.xlu0 %1088 }
 0x1c7   :  { %1239 = vst.msk [vmem:[#allocation3 + $0x150] sm:$0xff] %vm1196_vm4, %v1089_v13  ;;  %v1416_v16 = vpop.permute.xlu1 %1415  ;;  %v902_v13 = vld [vmem:[#allocation2 + $0x139] sm:$0xff] }
 0x1c8   :  { %1595 = vst.msk [vmem:[#allocation3 + $0x68] sm:$0xff] %vm1581_vm5, %v1416_v16  ;;  %1112 = vrot.lane.b32.xlu0 %v930_v12, %s5716_s1 }
 0x1c9   :  { %1118 = vrot.lane.b32.xlu1 %v933_v38, %s5716_s1 }
 0x1ca   :  { %v1791_v17 = vpop.permute.xlu0 %1790 }
 0x1cb   :  { %1975 = vst.msk [vmem:[#allocation3 + $0x40] sm:$0xff] %vm1966_vm6, %v1791_v17  ;;  %v1480_v47 = vpop.permute.xlu1 %1479  ;;  %v905_v17 = vld [vmem:[#allocation2 + $0x159] sm:$0xff] }
 0x1cc   :  { %1627 = vst.msk [vmem:[#allocation3 + $0x168] sm:$0xff] %vm1581_vm5, %v1480_v47  ;;  %1814 = vrot.lane.b32.xlu0 %v6280_v61, %s5717_s2  ;;  %v899_v61 = vld [vmem:[#allocation2 + $0x111] sm:$0xff]  ;;  %v934_v47 = vld [vmem:[#allocation2 + $0x2e9] sm:$0xff] }
 0x1cd   :  { %1439 = vrot.lane.b32.xlu1 %v1286_v19, %s5714_s12 }
 0x1ce   :  { %v1414_v15 = vpop.permute.xlu0 %1413 }
 0x1cf   :  { %1594 = vst.msk [vmem:[#allocation3 + $0x60] sm:$0xff] %vm1581_vm5, %v1414_v15  ;;  %v1797_v45 = vpop.permute.xlu1 %1796 }
 0x1d0   :  { %1437 = vrot.lane.b32.xlu0 %v1285_v26, %s5714_s12 }
 0x1d1   :  { %1503 = vrot.lane.b32.xlu1 %v1318_v27, %s5714_s12  ;;  %v1289_v27 = vld [vmem:[#allocation2 + $0x152] sm:$0xff] }
 0x1d2   :  { %v1478_v33 = vpop.permute.xlu0 %1477 }
 0x1d3   :  { %1626 = vst.msk [vmem:[#allocation3 + $0x160] sm:$0xff] %vm1581_vm5, %v1478_v33  ;;  %v1027_v48 = vpop.permute.xlu1 %1026  ;;  %v1290_v33 = vld [vmem:[#allocation2 + $0x15a] sm:$0xff] }
 0x1d4   :  { %1208 = vst.msk [vmem:[#allocation3 + $0x58] sm:$0xff] %vm1196_vm4, %v1027_v48  ;;  %1501 = vrot.lane.b32.xlu0 %v1317_v40, %s5714_s12 }
 0x1d5   :  { %1050 = vrot.lane.b32.xlu1 %v899_v61, %s5716_s1  ;;  %v1321_v61 = vld [vmem:[#allocation2 + $0x302] sm:$0xff] }
 0x1d6   :  { %v1410_v41 = vpop.permute.xlu0 %1409 }
 0x1d7   :  { %1592 = vst.msk [vmem:[#allocation3 + $0x50] sm:$0xff] %vm1581_vm5, %v1410_v41  ;;  %v1091_v42 = vpop.permute.xlu1 %1090  ;;  %v1322_v41 = vld [vmem:[#allocation2 + $0x30a] sm:$0xff] }
 0x1d8   :  { %1977 = vst.msk [vmem:[#allocation3 + $0x50] sm:$0xff] %vm1966_vm6, %v1795_v43  ;;  %1433 = vrot.lane.b32.xlu0 %v1283_v57, %s5714_s12  ;;  %v904_v43 = vld [vmem:[#allocation2 + $0x151] sm:$0xff] }
 0x1d9   :  { %1240 = vst.msk [vmem:[#allocation3 + $0x158] sm:$0xff] %vm1196_vm4, %v1091_v42  ;;  %1114 = vrot.lane.b32.xlu1 %v931_v46, %s5716_s1  ;;  %v1287_v46 = vld [vmem:[#allocation2 + $0x13a] sm:$0xff] }
 0x1da   :  { %v1474_v50 = vpop.permute.xlu0 %1473 }
 0x1db   :  { %1624 = vst.msk [vmem:[#allocation3 + $0x150] sm:$0xff] %vm1581_vm5, %v1474_v50  ;;  %v1412_v49 = vpop.permute.xlu1 %1411  ;;  %v903_v50 = vld [vmem:[#allocation2 + $0x141] sm:$0xff] }
 0x1dc   :  { %1593 = vst.msk [vmem:[#allocation3 + $0x58] sm:$0xff] %vm1581_vm5, %v1412_v49  ;;  %1497 = vrot.lane.b32.xlu0 %v1315_v5, %s5714_s12 }
 0x1dd   :  { %1978 = vst.msk [vmem:[#allocation3 + $0x58] sm:$0xff] %vm1966_vm6, %v1797_v45  ;;  %1435 = vrot.lane.b32.xlu1 %v1284_v28, %s5714_s12  ;;  %v1319_v28 = vld [vmem:[#allocation2 + $0x2ea] sm:$0xff] }
 0x1de   :  { %v1037_v56 = vpop.permute.xlu0 %1036 }
 0x1df   :  { %1213 = vst.msk [vmem:[#allocation3 + $0x80] sm:$0xff] %vm1196_vm4, %v1037_v56  ;;  %v1476_v8 = vpop.permute.xlu1 %1475  ;;  %v906_v56 = vld [vmem:[#allocation2 + $0x169] sm:$0xff] }
 0x1e0   :  { %1625 = vst.msk [vmem:[#allocation3 + $0x158] sm:$0xff] %vm1581_vm5, %v1476_v8  ;;  %1060 = vrot.lane.b32.xlu0 %v904_v43, %s5716_s1  ;;  %v935_v43 = vld [vmem:[#allocation2 + $0x2f1] sm:$0xff] }
 0x1e1   :  { %1499 = vrot.lane.b32.xlu1 %v1316_v37, %s5714_s12 }
 0x1e2   :  { %v1101_v11 = vpop.permute.xlu0 %1100 }
 0x1e3   :  { %1245 = vst.msk [vmem:[#allocation3 + $0x180] sm:$0xff] %vm1196_vm4, %v1101_v11  ;;  %v1793_v12 = vpop.permute.xlu1 %1792  ;;  %v938_v11 = vld [vmem:[#allocation2 + $0x319] sm:$0xff] }
 0x1e4   :  { %1976 = vst.msk [vmem:[#allocation3 + $0x48] sm:$0xff] %vm1966_vm6, %v1793_v12  ;;  %1124 = vrot.lane.b32.xlu0 %v936_v10, %s5716_s1  ;;  %v1288_v10 = vld [vmem:[#allocation2 + $0x142] sm:$0xff] }
 0x1e5   :  { %1816 = vrot.lane.b32.xlu1 %v6284_v62, %s5717_s2  ;;  %v937_v62 = vld [vmem:[#allocation2 + $0x309] sm:$0xff] }
 0x1e6   :  { %v1803_v16 = vpop.permute.xlu0 %1802 }
 0x1e7   :  { %v1039_v38 = vpop.permute.xlu1 %1038 }
 0x1e8   :  { %1214 = vst.msk [vmem:[#allocation3 + $0x88] sm:$0xff] %vm1196_vm4, %v1039_v38  ;;  %1056 = vrot.lane.b32.xlu0 %v902_v13, %s5716_s1  ;;  %v1320_v38 = vld [vmem:[#allocation2 + $0x2f2] sm:$0xff] }
 0x1e9   :  { %1062 = vrot.lane.b32.xlu1 %v905_v17, %s5716_s1 }
 0x1ea   :  { %v1033_v19 = vpop.permute.xlu0 %1032 }
 0x1eb   :  { %1211 = vst.msk [vmem:[#allocation3 + $0x70] sm:$0xff] %vm1196_vm4, %v1033_v19  ;;  %v1103_v15 = vpop.permute.xlu1 %1102  ;;  %v907_v19 = vld [vmem:[#allocation2 + $0x171] sm:$0xff] }
 0x1ec   :  { %1246 = vst.msk [vmem:[#allocation3 + $0x188] sm:$0xff] %vm1196_vm4, %v1103_v15  ;;  %1120 = vrot.lane.b32.xlu0 %v934_v47, %s5716_s1  ;;  %v1291_v47 = vld [vmem:[#allocation2 + $0x16a] sm:$0xff] }
 0x1ed   :  { %1126 = vrot.lane.b32.xlu1 %v937_v62, %s5716_s1 }
 0x1ee   :  { %v1097_v45 = vpop.permute.xlu0 %1096 }
 0x1ef   :  { %1243 = vst.msk [vmem:[#allocation3 + $0x170] sm:$0xff] %vm1196_vm4, %v1097_v45  ;;  %v1424_v26 = vpop.permute.xlu1 %1423  ;;  %v1323_v45 = vld [vmem:[#allocation2 + $0x31a] sm:$0xff] }
 0x1f0   :  { %1599 = vst.msk [vmem:[#allocation3 + $0x88] sm:$0xff] %vm1581_vm5, %v1424_v26  ;;  %1445 = vrot.lane.b32.xlu0 %v1289_v27, %s5714_s12  ;;  %v939_v26 = vld [vmem:[#allocation2 + $0x321] sm:$0xff] }
 0x1f1   :  { %1447 = vrot.lane.b32.xlu1 %v1290_v33, %s5714_s12 }
 0x1f2   :  { %v1799_v48 = vpop.permute.xlu0 %1798 }
 0x1f3   :  { %1979 = vst.msk [vmem:[#allocation3 + $0x60] sm:$0xff] %vm1966_vm6, %v1799_v48  ;;  %v1488_v40 = vpop.permute.xlu1 %1487  ;;  %v1292_v48 = vld [vmem:[#allocation2 + $0x172] sm:$0xff] }
 0x1f4   :  { %1631 = vst.msk [vmem:[#allocation3 + $0x188] sm:$0xff] %vm1581_vm5, %v1488_v40  ;;  %1509 = vrot.lane.b32.xlu0 %v1321_v61, %s5714_s12 }
 0x1f5   :  { %1511 = vrot.lane.b32.xlu1 %v1322_v41, %s5714_s12  ;;  %v1324_v41 = vld [vmem:[#allocation2 + $0x322] sm:$0xff] }
 0x1f6   :  { %v1422_v42 = vpop.permute.xlu0 %1421 }
 0x1f7   :  { %1598 = vst.msk [vmem:[#allocation3 + $0x80] sm:$0xff] %vm1581_vm5, %v1422_v42  ;;  %v1805_v57 = vpop.permute.xlu1 %1804 }
 0x1f8   :  { %1441 = vrot.lane.b32.xlu0 %v1287_v46, %s5714_s12 }
 0x1f9   :  { %1058 = vrot.lane.b32.xlu1 %v903_v50, %s5716_s1 }
 0x1fa   :  { %v1486_v49 = vpop.permute.xlu0 %1485 }
 0x1fb   :  { %1630 = vst.msk [vmem:[#allocation3 + $0x180] sm:$0xff] %vm1581_vm5, %v1486_v49  ;;  %v1035_v5 = vpop.permute.xlu1 %1034 }
 0x1fc   :  { %1212 = vst.msk [vmem:[#allocation3 + $0x78] sm:$0xff] %vm1196_vm4, %v1035_v5  ;;  %1505 = vrot.lane.b32.xlu0 %v1319_v28, %s5714_s12  ;;  %v1678_v5 = vld [vmem:[#allocation2 + $0x1c8] sm:$0xff]  ;;  %v1680_v28 = vld [vmem:[#allocation2 + $0x1e0] sm:$0xff] }
 0x1fd   :  { %1122 = vrot.lane.b32.xlu1 %v935_v43, %s5716_s1 }
 0x1fe   :  { %v1418_v8 = vpop.permute.xlu0 %1417 }
 0x1ff   :  { %1596 = vst.msk [vmem:[#allocation3 + $0x70] sm:$0xff] %vm1581_vm5, %v1418_v8  ;;  %v1099_v37 = vpop.permute.xlu1 %1098 }
 0x200   :  { %1981 = vst.msk [vmem:[#allocation3 + $0x70] sm:$0xff] %vm1966_vm6, %v1803_v16  ;;  %1064 = vrot.lane.b32.xlu0 %v906_v56, %s5716_s1 }
 0x201   :  { %1244 = vst.msk [vmem:[#allocation3 + $0x178] sm:$0xff] %vm1196_vm4, %v1099_v37  ;;  %1443 = vrot.lane.b32.xlu1 %v1288_v10, %s5714_s12  ;;  %v1681_v10 = vld [vmem:[#allocation2 + $0x1e8] sm:$0xff] }
 0x202   :  { %v1482_v12 = vpop.permute.xlu0 %1481 }
 0x203   :  { %1628 = vst.msk [vmem:[#allocation3 + $0x170] sm:$0xff] %vm1581_vm5, %v1482_v12  ;;  %v1420_v13 = vpop.permute.xlu1 %1419 }
 0x204   :  { %1597 = vst.msk [vmem:[#allocation3 + $0x78] sm:$0xff] %vm1581_vm5, %v1420_v13  ;;  %1128 = vrot.lane.b32.xlu0 %v938_v11, %s5716_s1 }
 0x205   :  { %1982 = vst.msk [vmem:[#allocation3 + $0x78] sm:$0xff] %vm1966_vm6, %v1805_v57  ;;  %1507 = vrot.lane.b32.xlu1 %v1320_v38, %s5714_s12 }
 0x206   :  { %v1045_v16 = vpop.permute.xlu0 %1044 }
 0x207   :  { %1217 = vst.msk [vmem:[#allocation3 + $0xa0] sm:$0xff] %vm1196_vm4, %v1045_v16  ;;  %v1484_v17 = vpop.permute.xlu1 %1483 }
 0x208   :  { %1629 = vst.msk [vmem:[#allocation3 + $0x178] sm:$0xff] %vm1581_vm5, %v1484_v17  ;;  %1449 = vrot.lane.b32.xlu0 %v1291_v47, %s5714_s12  ;;  %v2033_v47 = vld [vmem:[#allocation2 + $0x31] sm:$0xff] }
 0x209   :  { %1066 = vrot.lane.b32.xlu1 %v907_v19, %s5716_s1 }
 0x20a   :  { %v1109_v15 = vpop.permute.xlu0 %1108 }
 0x20b   :  { %1249 = vst.msk [vmem:[#allocation3 + $0x1a0] sm:$0xff] %vm1196_vm4, %v1109_v15  ;;  %v1801_v62 = vpop.permute.xlu1 %1800 }
 0x20c   :  { %1980 = vst.msk [vmem:[#allocation3 + $0x68] sm:$0xff] %vm1966_vm6, %v1801_v62  ;;  %1513 = vrot.lane.b32.xlu0 %v1323_v45, %s5714_s12  ;;  %v2416_v62 = vld [vmem:[#allocation2 + $0x1a] sm:$0xff] }
 0x20d   :  { %1130 = vrot.lane.b32.xlu1 %v939_v26, %s5716_s1 }
 0x20e   :  { %v1811_v27 = vpop.permute.xlu0 %1810 }
 0x20f   :  { %v1047_v33 = vpop.permute.xlu1 %1046 }
 0x210   :  { %1218 = vst.msk [vmem:[#allocation3 + $0xa8] sm:$0xff] %vm1196_vm4, %v1047_v33  ;;  %1818 = vrot.lane.b32.xlu0 %v6286_v63, %s5717_s2  ;;  %v2034_v33 = vld [vmem:[#allocation2 + $0x39] sm:$0xff] }
 0x211   :  { %1451 = vrot.lane.b32.xlu1 %v1292_v48, %s5714_s12 }
 0x212   :  { %v1041_v40 = vpop.permute.xlu0 %1040 }
 0x213   :  { %1215 = vst.msk [vmem:[#allocation3 + $0x90] sm:$0xff] %vm1196_vm4, %v1041_v40  ;;  %v1111_v61 = vpop.permute.xlu1 %1110 }
 0x214   :  { %1250 = vst.msk [vmem:[#allocation3 + $0x1a8] sm:$0xff] %vm1196_vm4, %v1111_v61  ;;  %1822 = vrot.lane.b32.xlu0 %v6351_v20, %s5717_s2  ;;  %v2802_v61 = vld [vmem:[#allocation2 + $0x30] sm:$0xff] }
 0x215   :  { %1515 = vrot.lane.b32.xlu1 %v1324_v41, %s5714_s12  ;;  %v2417_v41 = vld [vmem:[#allocation2 + $0x22] sm:$0xff] }
 0x216   :  { %v1105_v42 = vpop.permute.xlu0 %1104 }
 0x217   :  { %1247 = vst.msk [vmem:[#allocation3 + $0x190] sm:$0xff] %vm1196_vm4, %v1105_v42  ;;  %v1432_v57 = vpop.permute.xlu1 %1431 }
 0x218   :  { %1603 = vst.msk [vmem:[#allocation3 + $0xa8] sm:$0xff] %vm1581_vm5, %v1432_v57  ;;  %1826 = vrot.lane.b32.xlu0 %v6354_v22, %s5717_s2  ;;  %v1676_v22 = vld [vmem:[#allocation2 + $0x180] sm:$0xff] }
 0x219   :  { %1820 = vrot.lane.b32.xlu1 %v6288_v44, %s5717_s2 }
 0x21a   :  { %v1807_v63 = vpop.permute.xlu0 %1806 }
 0x21b   :  { %1983 = vst.msk [vmem:[#allocation3 + $0x80] sm:$0xff] %vm1966_vm6, %v1807_v63  ;;  %v1496_v46 = vpop.permute.xlu1 %1495  ;;  %v2804_v63 = vld [vmem:[#allocation2 + $0x48] sm:$0xff] }
 0x21c   :  { %1635 = vst.msk [vmem:[#allocation3 + $0x1a8] sm:$0xff] %vm1581_vm5, %v1496_v46  ;;  %1830 = vrot.lane.b32.xlu0 %v6438_v25, %s5717_s2  ;;  %v2419_v46 = vld [vmem:[#allocation2 + $0x3a] sm:$0xff] }
 0x21d   :  { %1824 = vrot.lane.b32.xlu1 %v6356_v23, %s5717_s2 }
 0x21e   :  { %v1430_v20 = vpop.permute.xlu0 %1429 }
 0x21f   :  { %1602 = vst.msk [vmem:[#allocation3 + $0xa0] sm:$0xff] %vm1581_vm5, %v1430_v20  ;;  %v1813_v50 = vpop.permute.xlu1 %1812 }
 0x220   :  { %1834 = vrot.lane.b32.xlu0 %v1676_v22, %s5717_s2  ;;  %v2803_v22 = vld [vmem:[#allocation2 + $0x38] sm:$0xff] }
 0x221   :  { %1828 = vrot.lane.b32.xlu1 %v6358_v0, %s5717_s2  ;;  %v1677_v0 = vld [vmem:[#allocation2 + $0x188] sm:$0xff] }
 0x222   :  { %v1494_v44 = vpop.permute.xlu0 %1493 }
 0x223   :  { %1634 = vst.msk [vmem:[#allocation3 + $0x1a0] sm:$0xff] %vm1581_vm5, %v1494_v44  ;;  %v1043_v49 = vpop.permute.xlu1 %1042 }
 0x224   :  { %1216 = vst.msk [vmem:[#allocation3 + $0x98] sm:$0xff] %vm1196_vm4, %v1043_v49  ;;  %1838 = vrot.lane.b32.xlu0 %v1678_v5, %s5717_s2  ;;  %v3189_v5 = vld [vmem:[#allocation2 + $0x49] sm:$0xff] }
 0x225   :  { %1832 = vrot.lane.b32.xlu1 %v6460_v54, %s5717_s2  ;;  %v1679_v54 = vld [vmem:[#allocation2 + $0x1d0] sm:$0xff] }
 0x226   :  { %v1426_v23 = vpop.permute.xlu0 %1425 }
 0x227   :  { %1600 = vst.msk [vmem:[#allocation3 + $0x90] sm:$0xff] %vm1581_vm5, %v1426_v23  ;;  %v1107_v25 = vpop.permute.xlu1 %1106  ;;  %v2805_v23 = vld [vmem:[#allocation2 + $0x50] sm:$0xff] }
 0x228   :  { %1985 = vst.msk [vmem:[#allocation3 + $0x90] sm:$0xff] %vm1966_vm6, %v1811_v27  ;;  %1842 = vrot.lane.b32.xlu0 %v1680_v28, %s5717_s2  ;;  %v2418_v27 = vld [vmem:[#allocation2 + $0x32] sm:$0xff] }
 0x229   :  { %1248 = vst.msk [vmem:[#allocation3 + $0x198] sm:$0xff] %vm1196_vm4, %v1107_v25  ;;  %1836 = vrot.lane.b32.xlu1 %v1677_v0, %s5717_s2  ;;  %v5658_v25 = vld [vmem:[%s7722_s3] sm:$0xff]  }
 0x22a   :  { %v1490_v43 = vpop.permute.xlu0 %1489  ;;  %5505 = vmatprep.subr.bf16.mxu1 %v5658_v25 }
 0x22b   :  { %1632 = vst.msk [vmem:[#allocation3 + $0x190] sm:$0xff] %vm1581_vm5, %v1490_v43  ;;  %v1428_v56 = vpop.permute.xlu1 %1427  ;;  %5506 = vmatpush3.bf16.msra.mxu1 %v5658_v25  ;;  %v5659_v43 = vld [vmem:[%s7722_s3 + $0x8] sm:$0xff]  }
 0x22c   :  { %1601 = vst.msk [vmem:[#allocation3 + $0x98] sm:$0xff] %vm1581_vm5, %v1428_v56  ;;  %1846 = vrot.lane.b32.xlu0 %v6125_v59, %s5717_s2  ;;  %5507 = vmatprep.subr.bf16.mxu1 %v5659_v43 }
 0x22d   :  { %1986 = vst.msk [vmem:[#allocation3 + $0x98] sm:$0xff] %vm1966_vm6, %v1813_v50  ;;  %1840 = vrot.lane.b32.xlu1 %v1679_v54, %s5717_s2 }
 0x22e   :  { %v1053_v8 = vpop.permute.xlu0 %1052 }
 0x22f   :  { %1221 = vst.msk [vmem:[#allocation3 + $0xc0] sm:$0xff] %vm1196_vm4, %v1053_v8  ;;  %v1492_v37 = vpop.permute.xlu1 %1491  ;;  %v3574_v8 = vld [vmem:[#allocation2 + $0x4a] sm:$0xff]  ;;  %5508 = vmatpush3.bf16.msra.mxu1 %v5659_v43 }
 0x230   :  { %1633 = vst.msk [vmem:[#allocation3 + $0x198] sm:$0xff] %vm1581_vm5, %v1492_v37  ;;  %1850 = vrot.lane.b32.xlu0 %v6083_v35, %s5717_s2  ;;  %v3190_v37 = vld [vmem:[#allocation2 + $0x51] sm:$0xff] }
 0x231   :  { %1844 = vrot.lane.b32.xlu1 %v1681_v10, %s5717_s2  ;;  %v5660_v10 = vld [vmem:[%s7722_s3 + $0x10] ss:$0 sps:$4 sm:$0x33]  }
 0x232   :  { %v1117_v11 = vpop.permute.xlu0 %1116  ;;  %5643 = vmatprep.subr.msk.bf16.mxu1 %vm4177_vm7, %v5660_v10  ;;  %v2813_v43 = vld [vmem:[#allocation2 + $0xb0] sm:$0xff] }
 0x233   :  { %1253 = vst.msk [vmem:[#allocation3 + $0x1c0] sm:$0xff] %vm1196_vm4, %v1117_v11  ;;  %v1809_v59 = vpop.permute.xlu1 %1808 }
 0x234   :  { %1984 = vst.msk [vmem:[#allocation3 + $0x88] sm:$0xff] %vm1966_vm6, %v1809_v59  ;;  %1854 = vrot.lane.b32.xlu0 %v6173_v29, %s5717_s2 }
 0x235   :  { %1848 = vrot.lane.b32.xlu1 %v6130_v1, %s5717_s2 }
 0x236   :  { %v1049_v12 = vpop.permute.xlu0 %1048 }
 0x237   :  { %1219 = vst.msk [vmem:[#allocation3 + $0xb0] sm:$0xff] %vm1196_vm4, %v1049_v12  ;;  %v1055_v13 = vpop.permute.xlu1 %1054  ;;  %v4179_v12 = vsel %vm4177_vm7, %v5660_v10, 0  ;;  %v3582_v10 = vld [vmem:[#allocation2 + $0xaa] sm:$0xff] }
 0x238   :  { %1222 = vst.msk [vmem:[#allocation3 + $0xc8] sm:$0xff] %vm1196_vm4, %v1055_v13  ;;  %1858 = vrot.lane.b32.xlu0 %v6132_v2, %s5717_s2  ;;  %5510 = vmatpush3.bf16.msra.mxu1 %v4179_v12 }
 0x239   :  { %1852 = vrot.lane.b32.xlu1 %v6085_v36, %s5717_s2 }
 0x23a   :  { %v1113_v35 = vpop.permute.xlu0 %1112 }
 0x23b   :  { %1251 = vst.msk [vmem:[#allocation3 + $0x1b0] sm:$0xff] %vm1196_vm4, %v1113_v35  ;;  %v1119_v38 = vpop.permute.xlu1 %1118 }
 0x23c   :  { %1254 = vst.msk [vmem:[#allocation3 + $0x1c8] sm:$0xff] %vm1196_vm4, %v1119_v38  ;;  %1862 = vrot.lane.b32.xlu0 %v6193_v34, %s5717_s2  ;;  %v2037_v38 = vld [vmem:[#allocation2 + $0x61] sm:$0xff] }
 0x23d   :  { %1856 = vrot.lane.b32.xlu1 %v6178_v30, %s5717_s2 }
 0x23e   :  { %v1815_v1 = vpop.permute.xlu0 %1814 }
 0x23f   :  { %1987 = vst.msk [vmem:[#allocation3 + $0xa0] sm:$0xff] %vm1966_vm6, %v1815_v1  ;;  %v1440_v29 = vpop.permute.xlu1 %1439  ;;  %v3575_v1 = vld [vmem:[#allocation2 + $0x52] sm:$0xff] }
 0x240   :  { %1607 = vst.msk [vmem:[#allocation3 + $0xc8] sm:$0xff] %vm1581_vm5, %v1440_v29  ;;  %1866 = vrot.lane.b32.xlu0 %v6180_v31, %s5717_s2 }
 0x241   :  { %1860 = vrot.lane.b32.xlu1 %v6134_v3, %s5717_s2 }
 0x242   :  { %v1438_v36 = vpop.permute.xlu0 %1437 }
 0x243   :  { %1606 = vst.msk [vmem:[#allocation3 + $0xc0] sm:$0xff] %vm1581_vm5, %v1438_v36  ;;  %v1504_v2 = vpop.permute.xlu1 %1503 }
 0x244   :  { %1639 = vst.msk [vmem:[#allocation3 + $0x1c8] sm:$0xff] %vm1581_vm5, %v1504_v2  ;;  %1870 = vrot.lane.b32.xlu0 %v6233_v55, %s5717_s2 }
 0x245   :  { %1864 = vrot.lane.b32.xlu1 %v6195_v39, %s5717_s2 }
 0x246   :  { %v1502_v30 = vpop.permute.xlu0 %1501 }
 0x247   :  { %1638 = vst.msk [vmem:[#allocation3 + $0x1c0] sm:$0xff] %vm1581_vm5, %v1502_v30  ;;  %v1051_v34 = vpop.permute.xlu1 %1050 }
 0x248   :  { %1220 = vst.msk [vmem:[#allocation3 + $0xb8] sm:$0xff] %vm1196_vm4, %v1051_v34  ;;  %1874 = vrot.lane.b32.xlu0 %v6227_v52, %s5717_s2  ;;  %v2422_v34 = vld [vmem:[#allocation2 + $0x62] sm:$0xff] }
 0x249   :  { %1868 = vrot.lane.b32.xlu1 %v6182_v32, %s5717_s2 }
 0x24a   :  { %v1434_v3 = vpop.permute.xlu0 %1433 }
 0x24b   :  { %1604 = vst.msk [vmem:[#allocation3 + $0xb0] sm:$0xff] %vm1581_vm5, %v1434_v3  ;;  %v1115_v31 = vpop.permute.xlu1 %1114  ;;  %v2038_v3 = vld [vmem:[#allocation2 + $0x69] sm:$0xff] }
 0x24c   :  { %1252 = vst.msk [vmem:[#allocation3 + $0x1b8] sm:$0xff] %vm1196_vm4, %v1115_v31  ;;  %1878 = vrot.lane.b32.xlu0 %v6326_v60, %s5717_s2 }
 0x24d   :  { %1872 = vrot.lane.b32.xlu1 %v6257_v21, %s5717_s2 }
 0x24e   :  { %v1498_v39 = vpop.permute.xlu0 %1497 }
 0x24f   :  { %1636 = vst.msk [vmem:[#allocation3 + $0x1b0] sm:$0xff] %vm1581_vm5, %v1498_v39  ;;  %v1436_v55 = vpop.permute.xlu1 %1435 }
 0x250   :  { %1605 = vst.msk [vmem:[#allocation3 + $0xb8] sm:$0xff] %vm1581_vm5, %v1436_v55  ;;  %1882 = vrot.lane.b32.xlu0 %v6324_v58, %s5717_s2  ;;  %v2806_v55 = vld [vmem:[#allocation2 + $0x60] sm:$0xff] }
 0x251   :  { %1876 = vrot.lane.b32.xlu1 %v6231_v53, %s5717_s2 }
 0x252   :  { %v1061_v32 = vpop.permute.xlu0 %1060 }
 0x253   :  { %1225 = vst.msk [vmem:[#allocation3 + $0xe0] sm:$0xff] %vm1196_vm4, %v1061_v32  ;;  %v1500_v52 = vpop.permute.xlu1 %1499 }
 0x254   :  { %1637 = vst.msk [vmem:[#allocation3 + $0x1b8] sm:$0xff] %vm1581_vm5, %v1500_v52  ;;  %1886 = vrot.lane.b32.xlu0 %v6411_v9, %s5717_s2 }
 0x255   :  { %1880 = vrot.lane.b32.xlu1 %v6337_v7, %s5717_s2 }
 0x256   :  { %v1125_v21 = vpop.permute.xlu0 %1124 }
 0x257   :  { %1257 = vst.msk [vmem:[#allocation3 + $0x1e0] sm:$0xff] %vm1196_vm4, %v1125_v21  ;;  %v1817_v60 = vpop.permute.xlu1 %1816  ;;  %v2808_v21 = vld [vmem:[#allocation2 + $0x78] sm:$0xff] }
 0x258   :  { %1988 = vst.msk [vmem:[#allocation3 + $0xa8] sm:$0xff] %vm1966_vm6, %v1817_v60  ;;  %1890 = vrot.lane.b32.xlu0 %v6413_v51, %s5717_s2  ;;  %v1708_v51 = vld [vmem:[#allocation2 + $0x330] sm:$0xff] }
 0x259   :  { %1884 = vrot.lane.b32.xlu1 %v6328_v6, %s5717_s2  ;;  %v2423_v60 = vld [vmem:[#allocation2 + $0x6a] sm:$0xff] }
 0x25a   :  { %v1057_v53 = vpop.permute.xlu0 %1056 }
 0x25b   :  { %1223 = vst.msk [vmem:[#allocation3 + $0xd0] sm:$0xff] %vm1196_vm4, %v1057_v53  ;;  %v1063_v58 = vpop.permute.xlu1 %1062 }
 0x25c   :  { %1226 = vst.msk [vmem:[#allocation3 + $0xe8] sm:$0xff] %vm1196_vm4, %v1063_v58  ;;  %1894 = vrot.lane.b32.xlu0 %v6470_v18, %s5717_s2  ;;  %v2031_v18 = vld [vmem:[#allocation2 + $0x19] sm:$0xff] }
 0x25d   :  { %1888 = vrot.lane.b32.xlu1 %v6417_v4, %s5717_s2 }
 0x25e   :  { %v1121_v7 = vpop.permute.xlu0 %1120 }
 0x25f   :  { %1255 = vst.msk [vmem:[#allocation3 + $0x1d0] sm:$0xff] %vm1196_vm4, %v1121_v7  ;;  %v1127_v9 = vpop.permute.xlu1 %1126  ;;  %v2807_v7 = vld [vmem:[#allocation2 + $0x68] sm:$0xff] }
 0x260   :  { %1258 = vst.msk [vmem:[#allocation3 + $0x1e8] sm:$0xff] %vm1196_vm4, %v1127_v9  ;;  %1898 = vrot.lane.b32.xlu0 %v1708_v51, %s5717_s2 }
 0x261   :  { %1892 = vrot.lane.b32.xlu1 %v6421_v24, %s5717_s2  ;;  %v1709_v24 = vld [vmem:[#allocation2 + $0x338] sm:$0xff] }
 0x262   :  { %v1446_v6 = vpop.permute.xlu0 %1445 }
 0x263   :  { %1610 = vst.msk [vmem:[#allocation3 + $0xe0] sm:$0xff] %vm1581_vm5, %v1446_v6  ;;  %v1448_v16 = vpop.permute.xlu1 %1447  ;;  %v3193_v6 = vld [vmem:[#allocation2 + $0x79] sm:$0xff] }
 0x264   :  { %1611 = vst.msk [vmem:[#allocation3 + $0xe8] sm:$0xff] %vm1581_vm5, %v1448_v16  ;;  %2159 = vrot.lane.b32.xlu0 %v2031_v18, %s5718_s18  ;;  %v2809_v16 = vld [vmem:[#allocation2 + $0x80] sm:$0xff] }
 0x265   :  { %1896 = vrot.lane.b32.xlu1 %v6479_v14, %s5717_s2  ;;  %v2032_v14 = vld [vmem:[#allocation2 + $0x21] sm:$0xff] }
 0x266   :  { %v1510_v4 = vpop.permute.xlu0 %1509 }
 0x267   :  { %1642 = vst.msk [vmem:[#allocation3 + $0x1e0] sm:$0xff] %vm1581_vm5, %v1510_v4  ;;  %v1512_v17 = vpop.permute.xlu1 %1511 }
 0x268   :  { %1643 = vst.msk [vmem:[#allocation3 + $0x1e8] sm:$0xff] %vm1581_vm5, %v1512_v17  ;;  %2163 = vrot.lane.b32.xlu0 %v2033_v47, %s5718_s18 }
 0x269   :  { %1900 = vrot.lane.b32.xlu1 %v1709_v24, %s5717_s2  ;;  %v3578_v24 = vld [vmem:[#allocation2 + $0x7a] sm:$0xff] }
 0x26a   :  { %v1442_v19 = vpop.permute.xlu0 %1441 }
 0x26b   :  { %1608 = vst.msk [vmem:[#allocation3 + $0xd0] sm:$0xff] %vm1581_vm5, %v1442_v19  ;;  %v1059_v15 = vpop.permute.xlu1 %1058  ;;  %v3194_v19 = vld [vmem:[#allocation2 + $0x81] sm:$0xff] }
 0x26c   :  { %1224 = vst.msk [vmem:[#allocation3 + $0xd8] sm:$0xff] %vm1196_vm4, %v1059_v15  ;;  %2544 = vrot.lane.b32.xlu0 %v2416_v62, %s5719_s19 }
 0x26d   :  { %2161 = vrot.lane.b32.xlu1 %v2032_v14, %s5718_s18 }
 0x26e   :  { %v1506_v45 = vpop.permute.xlu0 %1505 }
 0x26f   :  { %1640 = vst.msk [vmem:[#allocation3 + $0x1d0] sm:$0xff] %vm1581_vm5, %v1506_v45  ;;  %v1123_v26 = vpop.permute.xlu1 %1122 }
 0x270   :  { %1256 = vst.msk [vmem:[#allocation3 + $0x1d8] sm:$0xff] %vm1196_vm4, %v1123_v26  ;;  %2548 = vrot.lane.b32.xlu0 %v2418_v27, %s5719_s19  ;;  %v2041_v26 = vld [vmem:[#allocation2 + $0x91] sm:$0xff] }
 0x271   :  { %2165 = vrot.lane.b32.xlu1 %v2034_v33, %s5718_s18 }
 0x272   :  { %v1065_v48 = vpop.permute.xlu0 %1064 }
 0x273   :  { %1227 = vst.msk [vmem:[#allocation3 + $0xf0] sm:$0xff] %vm1196_vm4, %v1065_v48  ;;  %v1444_v40 = vpop.permute.xlu1 %1443 }
 0x274   :  { %1609 = vst.msk [vmem:[#allocation3 + $0xd8] sm:$0xff] %vm1581_vm5, %v1444_v40  ;;  %2930 = vrot.lane.b32.xlu0 %v2802_v61, %s5720_s20 }
 0x275   :  { %2546 = vrot.lane.b32.xlu1 %v2417_v41, %s5719_s19  ;;  %v2426_v41 = vld [vmem:[#allocation2 + $0x92] sm:$0xff] }
 0x276   :  { %v1129_v42 = vpop.permute.xlu0 %1128 }
 0x277   :  { %1259 = vst.msk [vmem:[#allocation3 + $0x1f0] sm:$0xff] %vm1196_vm4, %v1129_v42  ;;  %v1508_v57 = vpop.permute.xlu1 %1507  ;;  %v2042_v42 = vld [vmem:[#allocation2 + $0x99] sm:$0xff] }
 0x278   :  { %1641 = vst.msk [vmem:[#allocation3 + $0x1d8] sm:$0xff] %vm1581_vm5, %v1508_v57  ;;  %2934 = vrot.lane.b32.xlu0 %v2804_v63, %s5720_s20 }
 0x279   :  { %2550 = vrot.lane.b32.xlu1 %v2419_v46, %s5719_s19 }
 0x27a   :  { %v1450_v20 = vpop.permute.xlu0 %1449 }
 0x27b   :  { %1612 = vst.msk [vmem:[#allocation3 + $0xf0] sm:$0xff] %vm1581_vm5, %v1450_v20  ;;  %v1067_v50 = vpop.permute.xlu1 %1066 }
 0x27c   :  { %1228 = vst.msk [vmem:[#allocation3 + $0xf8] sm:$0xff] %vm1196_vm4, %v1067_v50  ;;  %3315 = vrot.lane.b32.xlu0 %v2033_v47, %s5721_s21 }
 0x27d   :  { %2932 = vrot.lane.b32.xlu1 %v2803_v22, %s5720_s20  ;;  %v2812_v22 = vld [vmem:[#allocation2 + $0xa8] sm:$0xff] }
 0x27e   :  { %v1514_v44 = vpop.permute.xlu0 %1513 }
 0x27f   :  { %1644 = vst.msk [vmem:[#allocation3 + $0x1f0] sm:$0xff] %vm1581_vm5, %v1514_v44  ;;  %v1131_v49 = vpop.permute.xlu1 %1130  ;;  %v2427_v44 = vld [vmem:[#allocation2 + $0x9a] sm:$0xff] }
 0x280   :  { %1260 = vst.msk [vmem:[#allocation3 + $0x1f8] sm:$0xff] %vm1196_vm4, %v1131_v49  ;;  %3319 = vrot.lane.b32.xlu0 %v3189_v5, %s5721_s21 }
 0x281   :  { %2936 = vrot.lane.b32.xlu1 %v2805_v23, %s5720_s20  ;;  %v2811_v23 = vld [vmem:[#allocation2 + $0x98] sm:$0xff] }
 0x282   :  { %v1819_v28 = vpop.permute.xlu0 %1818 }
 0x283   :  { %1989 = vst.msk [vmem:[#allocation3 + $0xb0] sm:$0xff] %vm1966_vm6, %v1819_v28  ;;  %v1452_v0 = vpop.permute.xlu1 %1451 }
 0x284   :  { %1613 = vst.msk [vmem:[#allocation3 + $0xf8] sm:$0xff] %vm1581_vm5, %v1452_v0  ;;  %3700 = vrot.lane.b32.xlu0 %v2418_v27, %s5722_s24  ;;  %v3579_v27 = vld [vmem:[#allocation2 + $0x82] sm:$0xff] }
 0x285   :  { %3317 = vrot.lane.b32.xlu1 %v2034_v33, %s5721_s21  ;;  %v3197_v0 = vld [vmem:[#allocation2 + $0xa9] sm:$0xff] }
 0x286   :  { %v1823_v56 = vpop.permute.xlu0 %1822 }
 0x287   :  { %1991 = vst.msk [vmem:[#allocation3 + $0xc0] sm:$0xff] %vm1966_vm6, %v1823_v56  ;;  %v1516_v54 = vpop.permute.xlu1 %1515 }
 0x288   :  { %1645 = vst.msk [vmem:[#allocation3 + $0x1f8] sm:$0xff] %vm1581_vm5, %v1516_v54  ;;  %3704 = vrot.lane.b32.xlu0 %v3574_v8, %s5722_s24 }
 0x289   :  { %3321 = vrot.lane.b32.xlu1 %v3190_v37, %s5721_s21 }
 0x28a   :  { %v1827_v11 = vpop.permute.xlu0 %1826 }
 0x28b   :  { %1993 = vst.msk [vmem:[#allocation3 + $0xd0] sm:$0xff] %vm1966_vm6, %v1827_v11  ;;  %v1821_v59 = vpop.permute.xlu1 %1820  ;;  %v3198_v11 = vld [vmem:[#allocation2 + $0xb1] sm:$0xff] }
 0x28c   :  { %1990 = vst.msk [vmem:[#allocation3 + $0xb8] sm:$0xff] %vm1966_vm6, %v1821_v59  ;;  %2167 = vrot.lane.b32.xlu0 %v3189_v5, %s5718_s18 }
 0x28d   :  { %3702 = vrot.lane.b32.xlu1 %v2419_v46, %s5722_s24  ;;  %v2810_v46 = vld [vmem:[#allocation2 + $0x90] sm:$0xff] }
 0x28e   :  { %v1831_v13 = vpop.permute.xlu0 %1830 }
 0x28f   :  { %1995 = vst.msk [vmem:[#allocation3 + $0xe0] sm:$0xff] %vm1966_vm6, %v1831_v13  ;;  %v1825_v35 = vpop.permute.xlu1 %1824 }
 0x290   :  { %1992 = vst.msk [vmem:[#allocation3 + $0xc8] sm:$0xff] %vm1966_vm6, %v1825_v35  ;;  %2171 = vrot.lane.b32.xlu0 %v2037_v38, %s5718_s18 }
 0x291   :  { %3706 = vrot.lane.b32.xlu1 %v3575_v1, %s5722_s24 }
 0x292   :  { %v1835_v29 = vpop.permute.xlu0 %1834 }
 0x293   :  { %1997 = vst.msk [vmem:[#allocation3 + $0xf0] sm:$0xff] %vm1966_vm6, %v1835_v29  ;;  %v1829_v36 = vpop.permute.xlu1 %1828 }
 0x294   :  { %1994 = vst.msk [vmem:[#allocation3 + $0xd8] sm:$0xff] %vm1966_vm6, %v1829_v36  ;;  %2552 = vrot.lane.b32.xlu0 %v3574_v8, %s5719_s19 }
 0x295   :  { %2169 = vrot.lane.b32.xlu1 %v3190_v37, %s5718_s18 }
 0x296   :  { %v1839_v2 = vpop.permute.xlu0 %1838 }
 0x297   :  { %1999 = vst.msk [vmem:[#allocation3 + $0x100] sm:$0xff] %vm1966_vm6, %v1839_v2  ;;  %v1833_v30 = vpop.permute.xlu1 %1832 }
 0x298   :  { %1996 = vst.msk [vmem:[#allocation3 + $0xe8] sm:$0xff] %vm1966_vm6, %v1833_v30  ;;  %2556 = vrot.lane.b32.xlu0 %v2422_v34, %s5719_s19 }
 0x299   :  { %2173 = vrot.lane.b32.xlu1 %v2038_v3, %s5718_s18 }
 0x29a   :  { %v1843_v31 = vpop.permute.xlu0 %1842 }
 0x29b   :  { %2001 = vst.msk [vmem:[#allocation3 + $0x110] sm:$0xff] %vm1966_vm6, %v1843_v31  ;;  %v1837_v39 = vpop.permute.xlu1 %1836 }
 0x29c   :  { %1998 = vst.msk [vmem:[#allocation3 + $0xf8] sm:$0xff] %vm1966_vm6, %v1837_v39  ;;  %2938 = vrot.lane.b32.xlu0 %v2806_v55, %s5720_s20  ;;  %v2814_v55 = vld [vmem:[#allocation2 + $0xc0] sm:$0xff] }
 0x29d   :  { %2554 = vrot.lane.b32.xlu1 %v3575_v1, %s5719_s19  ;;  %v3583_v1 = vld [vmem:[#allocation2 + $0xb2] sm:$0xff] }
 0x29e   :  { %v1847_v32 = vpop.permute.xlu0 %1846 }
 0x29f   :  { %2003 = vst.msk [vmem:[#allocation3 + $0x120] sm:$0xff] %vm1966_vm6, %v1847_v32  ;;  %v1841_v52 = vpop.permute.xlu1 %1840 }
 0x2a0   :  { %2000 = vst.msk [vmem:[#allocation3 + $0x108] sm:$0xff] %vm1966_vm6, %v1841_v52  ;;  %2942 = vrot.lane.b32.xlu0 %v2808_v21, %s5720_s20  ;;  %v2816_v21 = vld [vmem:[#allocation2 + $0xd8] sm:$0xff] }
 0x2a1   :  { %2558 = vrot.lane.b32.xlu1 %v2423_v60, %s5719_s19 }
 0x2a2   :  { %v1851_v53 = vpop.permute.xlu0 %1850 }
 0x2a3   :  { %2005 = vst.msk [vmem:[#allocation3 + $0x130] sm:$0xff] %vm1966_vm6, %v1851_v53  ;;  %v1845_v58 = vpop.permute.xlu1 %1844 }
 0x2a4   :  { %2002 = vst.msk [vmem:[#allocation3 + $0x118] sm:$0xff] %vm1966_vm6, %v1845_v58  ;;  %3323 = vrot.lane.b32.xlu0 %v2037_v38, %s5721_s21  ;;  %v2045_v38 = vld [vmem:[#allocation2 + $0xc1] sm:$0xff] }
 0x2a5   :  { %2940 = vrot.lane.b32.xlu1 %v2807_v7, %s5720_s20  ;;  %v2815_v7 = vld [vmem:[#allocation2 + $0xc8] sm:$0xff] }
 0x2a6   :  { %v1855_v9 = vpop.permute.xlu0 %1854 }
 0x2a7   :  { %2007 = vst.msk [vmem:[#allocation3 + $0x140] sm:$0xff] %vm1966_vm6, %v1855_v9  ;;  %v1849_v51 = vpop.permute.xlu1 %1848 }
 0x2a8   :  { %2004 = vst.msk [vmem:[#allocation3 + $0x128] sm:$0xff] %vm1966_vm6, %v1849_v51  ;;  %3327 = vrot.lane.b32.xlu0 %v3193_v6, %s5721_s21 }
 0x2a9   :  { %2944 = vrot.lane.b32.xlu1 %v2809_v16, %s5720_s20  ;;  %v2817_v16 = vld [vmem:[#allocation2 + $0xe0] sm:$0xff] }
 0x2aa   :  { %v1859_v18 = vpop.permute.xlu0 %1858 }
 0x2ab   :  { %2009 = vst.msk [vmem:[#allocation3 + $0x150] sm:$0xff] %vm1966_vm6, %v1859_v18  ;;  %v1853_v4 = vpop.permute.xlu1 %1852 }
 0x2ac   :  { %2006 = vst.msk [vmem:[#allocation3 + $0x138] sm:$0xff] %vm1966_vm6, %v1853_v4  ;;  %3708 = vrot.lane.b32.xlu0 %v2422_v34, %s5722_s24  ;;  %v2430_v34 = vld [vmem:[#allocation2 + $0xc2] sm:$0xff] }
 0x2ad   :  { %3325 = vrot.lane.b32.xlu1 %v2038_v3, %s5721_s21  ;;  %v2046_v3 = vld [vmem:[#allocation2 + $0xc9] sm:$0xff] }
 0x2ae   :  { %v1863_v17 = vpop.permute.xlu0 %1862 }
 0x2af   :  { %2011 = vst.msk [vmem:[#allocation3 + $0x160] sm:$0xff] %vm1966_vm6, %v1863_v17  ;;  %v1857_v47 = vpop.permute.xlu1 %1856 }
 0x2b0   :  { %2008 = vst.msk [vmem:[#allocation3 + $0x148] sm:$0xff] %vm1966_vm6, %v1857_v47  ;;  %3712 = vrot.lane.b32.xlu0 %v3578_v24, %s5722_s24 }
 0x2b1   :  { %3329 = vrot.lane.b32.xlu1 %v3194_v19, %s5721_s21 }
 0x2b2   :  { %v1867_v15 = vpop.permute.xlu0 %1866 }
 0x2b3   :  { %2013 = vst.msk [vmem:[#allocation3 + $0x170] sm:$0xff] %vm1966_vm6, %v1867_v15  ;;  %v1861_v62 = vpop.permute.xlu1 %1860 }
 0x2b4   :  { %2010 = vst.msk [vmem:[#allocation3 + $0x158] sm:$0xff] %vm1966_vm6, %v1861_v62  ;;  %2175 = vrot.lane.b32.xlu0 %v3193_v6, %s5718_s18  ;;  %v3201_v6 = vld [vmem:[#allocation2 + $0xd9] sm:$0xff] }
 0x2b5   :  { %3710 = vrot.lane.b32.xlu1 %v2423_v60, %s5722_s24  ;;  %v2431_v60 = vld [vmem:[#allocation2 + $0xca] sm:$0xff] }
 0x2b6   :  { %v1871_v14 = vpop.permute.xlu0 %1870 }
 0x2b7   :  { %2015 = vst.msk [vmem:[#allocation3 + $0x180] sm:$0xff] %vm1966_vm6, %v1871_v14  ;;  %v1865_v45 = vpop.permute.xlu1 %1864 }
 0x2b8   :  { %2012 = vst.msk [vmem:[#allocation3 + $0x168] sm:$0xff] %vm1966_vm6, %v1865_v45  ;;  %2179 = vrot.lane.b32.xlu0 %v2041_v26, %s5718_s18 }
 0x2b9   :  { %3714 = vrot.lane.b32.xlu1 %v3579_v27, %s5722_s24 }
 0x2ba   :  { %v1875_v33 = vpop.permute.xlu0 %1874 }
 0x2bb   :  { %2017 = vst.msk [vmem:[#allocation3 + $0x190] sm:$0xff] %vm1966_vm6, %v1875_v33  ;;  %v1869_v48 = vpop.permute.xlu1 %1868 }
 0x2bc   :  { %2014 = vst.msk [vmem:[#allocation3 + $0x178] sm:$0xff] %vm1966_vm6, %v1869_v48  ;;  %2560 = vrot.lane.b32.xlu0 %v3578_v24, %s5719_s19  ;;  %v3586_v24 = vld [vmem:[#allocation2 + $0xda] sm:$0xff]  ;;  %v3587_v48 = vld [vmem:[#allocation2 + $0xe2] sm:$0xff] }
 0x2bd   :  { %2177 = vrot.lane.b32.xlu1 %v3194_v19, %s5718_s18  ;;  %v3202_v19 = vld [vmem:[#allocation2 + $0xe1] sm:$0xff] }
 0x2be   :  { %v1879_v40 = vpop.permute.xlu0 %1878 }
 0x2bf   :  { %2019 = vst.msk [vmem:[#allocation3 + $0x1a0] sm:$0xff] %vm1966_vm6, %v1879_v40  ;;  %v1873_v61 = vpop.permute.xlu1 %1872 }
 0x2c0   :  { %2016 = vst.msk [vmem:[#allocation3 + $0x188] sm:$0xff] %vm1966_vm6, %v1873_v61  ;;  %2564 = vrot.lane.b32.xlu0 %v2426_v41, %s5719_s19 }
 0x2c1   :  { %2181 = vrot.lane.b32.xlu1 %v2042_v42, %s5718_s18 }
 0x2c2   :  { %v1883_v57 = vpop.permute.xlu0 %1882 }
 0x2c3   :  { %2021 = vst.msk [vmem:[#allocation3 + $0x1b0] sm:$0xff] %vm1966_vm6, %v1883_v57  ;;  %v1877_v63 = vpop.permute.xlu1 %1876 }
 0x2c4   :  { %2018 = vst.msk [vmem:[#allocation3 + $0x198] sm:$0xff] %vm1966_vm6, %v1877_v63  ;;  %2946 = vrot.lane.b32.xlu0 %v2810_v46, %s5720_s20 }
 0x2c5   :  { %2562 = vrot.lane.b32.xlu1 %v3579_v27, %s5719_s19 }
 0x2c6   :  { %v1887_v20 = vpop.permute.xlu0 %1886 }
 0x2c7   :  { %2023 = vst.msk [vmem:[#allocation3 + $0x1c0] sm:$0xff] %vm1966_vm6, %v1887_v20  ;;  %v1881_v50 = vpop.permute.xlu1 %1880 }
 0x2c8   :  { %2020 = vst.msk [vmem:[#allocation3 + $0x1a8] sm:$0xff] %vm1966_vm6, %v1881_v50  ;;  %2950 = vrot.lane.b32.xlu0 %v2812_v22, %s5720_s20  ;;  %v2434_v50 = vld [vmem:[#allocation2 + $0xf2] sm:$0xff] }
 0x2c9   :  { %2566 = vrot.lane.b32.xlu1 %v2427_v44, %s5719_s19  ;;  %v2050_v22 = vld [vmem:[#allocation2 + $0xf9] sm:$0xff] }
 0x2ca   :  { %v1891_v49 = vpop.permute.xlu0 %1890 }
 0x2cb   :  { %2025 = vst.msk [vmem:[#allocation3 + $0x1d0] sm:$0xff] %vm1966_vm6, %v1891_v49  ;;  %v1885_v5 = vpop.permute.xlu1 %1884 }
 0x2cc   :  { %2022 = vst.msk [vmem:[#allocation3 + $0x1b8] sm:$0xff] %vm1966_vm6, %v1885_v5  ;;  %3331 = vrot.lane.b32.xlu0 %v2041_v26, %s5721_s21  ;;  %v2049_v26 = vld [vmem:[#allocation2 + $0xf1] sm:$0xff] }
 0x2cd   :  { %2948 = vrot.lane.b32.xlu1 %v2811_v23, %s5720_s20  ;;  %v2818_v5 = vld [vmem:[#allocation2 + $0xf0] sm:$0xff] }
 0x2ce   :  { %v1895_v25 = vpop.permute.xlu0 %1894 }
 0x2cf   :  { %2027 = vst.msk [vmem:[#allocation3 + $0x1e0] sm:$0xff] %vm1966_vm6, %v1895_v25  ;;  %v1889_v28 = vpop.permute.xlu1 %1888 }
 0x2d0   :  { %2024 = vst.msk [vmem:[#allocation3 + $0x1c8] sm:$0xff] %vm1966_vm6, %v1889_v28  ;;  %3335 = vrot.lane.b32.xlu0 %v3197_v0, %s5721_s21  ;;  %v2820_v28 = vld [vmem:[#allocation2 + $0x108] sm:$0xff] }
 0x2d1   :  { %2952 = vrot.lane.b32.xlu1 %v2813_v43, %s5720_s20 }
 0x2d2   :  { %v1899_v56 = vpop.permute.xlu0 %1898 }
 0x2d3   :  { %2029 = vst.msk [vmem:[#allocation3 + $0x1f0] sm:$0xff] %vm1966_vm6, %v1899_v56  ;;  %v1893_v54 = vpop.permute.xlu1 %1892 }
 0x2d4   :  { %2026 = vst.msk [vmem:[#allocation3 + $0x1d8] sm:$0xff] %vm1966_vm6, %v1893_v54  ;;  %3716 = vrot.lane.b32.xlu0 %v2426_v41, %s5722_s24  ;;  %v2819_v54 = vld [vmem:[#allocation2 + $0xf8] sm:$0xff] }
 0x2d5   :  { %3333 = vrot.lane.b32.xlu1 %v2042_v42, %s5721_s21 }
 0x2d6   :  { %v2160_v8 = vpop.permute.xlu0 %2159 }
 0x2d7   :  { %2352 = vst.msk [vmem:[#allocation3] sm:$0xff] %vm2351_vm8, %v2160_v8  ;;  %v1897_v37 = vpop.permute.xlu1 %1896 }
 0x2d8   :  { %2028 = vst.msk [vmem:[#allocation3 + $0x1e8] sm:$0xff] %vm1966_vm6, %v1897_v37  ;;  %3720 = vrot.lane.b32.xlu0 %v3582_v10, %s5722_s24 }
 0x2d9   :  { %3337 = vrot.lane.b32.xlu1 %v3198_v11, %s5721_s21 }
 0x2da   :  { %v2164_v59 = vpop.permute.xlu0 %2163 }
 0x2db   :  { %2354 = vst.msk [vmem:[#allocation3 + $0x10] sm:$0xff] %vm2351_vm8, %v2164_v59  ;;  %v1901_v12 = vpop.permute.xlu1 %1900 }
 0x2dc   :  { %2030 = vst.msk [vmem:[#allocation3 + $0x1f8] sm:$0xff] %vm1966_vm6, %v1901_v12  ;;  %2183 = vrot.lane.b32.xlu0 %v3197_v0, %s5718_s18  ;;  %v2435_v0 = vld [vmem:[#allocation2 + $0xfa] sm:$0xff] }
 0x2dd   :  { %3718 = vrot.lane.b32.xlu1 %v2427_v44, %s5722_s24 }
 0x2de   :  { %v2545_v13 = vpop.permute.xlu0 %2544 }
 0x2df   :  { %2737 = vst.msk [vmem:[#allocation3] sm:$0xff] %vm2736_vm9, %v2545_v13  ;;  %v2162_v35 = vpop.permute.xlu1 %2161 }
 0x2e0   :  { %2353 = vst.msk [vmem:[#allocation3 + $0x8] sm:$0xff] %vm2351_vm8, %v2162_v35  ;;  %2187 = vrot.lane.b32.xlu0 %v2045_v38, %s5718_s18 }
 0x2e1   :  { %3722 = vrot.lane.b32.xlu1 %v3583_v1, %s5722_s24 }
 0x2e2   :  { %v2549_v29 = vpop.permute.xlu0 %2548 }
 0x2e3   :  { %2739 = vst.msk [vmem:[#allocation3 + $0x10] sm:$0xff] %vm2736_vm9, %v2549_v29  ;;  %v2166_v36 = vpop.permute.xlu1 %2165 }
 0x2e4   :  { %2355 = vst.msk [vmem:[#allocation3 + $0x18] sm:$0xff] %vm2351_vm8, %v2166_v36  ;;  %2568 = vrot.lane.b32.xlu0 %v3582_v10, %s5719_s19  ;;  %v3205_v10 = vld [vmem:[#allocation2 + $0x109] sm:$0xff] }
 0x2e5   :  { %2185 = vrot.lane.b32.xlu1 %v3198_v11, %s5718_s18  ;;  %v2821_v11 = vld [vmem:[#allocation2 + $0x110] sm:$0xff] }
 0x2e6   :  { %v2931_v2 = vpop.permute.xlu0 %2930 }
 0x2e7   :  { %3123 = vst.msk [vmem:[#allocation3] sm:$0xff] %vm3122_vm10, %v2931_v2  ;;  %v2547_v30 = vpop.permute.xlu1 %2546 }
 0x2e8   :  { %2738 = vst.msk [vmem:[#allocation3 + $0x8] sm:$0xff] %vm2736_vm9, %v2547_v30  ;;  %2572 = vrot.lane.b32.xlu0 %v2430_v34, %s5719_s19 }
 0x2e9   :  { %2189 = vrot.lane.b32.xlu1 %v2046_v3, %s5718_s18 }
 0x2ea   :  { %v2935_v31 = vpop.permute.xlu0 %2934 }
 0x2eb   :  { %3125 = vst.msk [vmem:[#allocation3 + $0x10] sm:$0xff] %vm3122_vm10, %v2935_v31  ;;  %v2551_v39 = vpop.permute.xlu1 %2550 }
 0x2ec   :  { %2740 = vst.msk [vmem:[#allocation3 + $0x18] sm:$0xff] %vm2736_vm9, %v2551_v39  ;;  %2954 = vrot.lane.b32.xlu0 %v2814_v55, %s5720_s20  ;;  %v3591_v39 = vld [vmem:[#allocation2 + $0x112] sm:$0xff] }
 0x2ed   :  { %2570 = vrot.lane.b32.xlu1 %v3583_v1, %s5719_s19  ;;  %v3206_v1 = vld [vmem:[#allocation2 + $0x111] sm:$0xff] }
 0x2ee   :  { %v3316_v32 = vpop.permute.xlu0 %3315 }
 0x2ef   :  { %3508 = vst.msk [vmem:[#allocation3] sm:$0xff] %vm3507_vm11, %v3316_v32  ;;  %v2933_v52 = vpop.permute.xlu1 %2932 }
 0x2f0   :  { %3124 = vst.msk [vmem:[#allocation3 + $0x8] sm:$0xff] %vm3122_vm10, %v2933_v52  ;;  %2958 = vrot.lane.b32.xlu0 %v2816_v21, %s5720_s20 }
 0x2f1   :  { %2574 = vrot.lane.b32.xlu1 %v2431_v60, %s5719_s19 }
 0x2f2   :  { %v3320_v53 = vpop.permute.xlu0 %3319 }
 0x2f3   :  { %3510 = vst.msk [vmem:[#allocation3 + $0x10] sm:$0xff] %vm3507_vm11, %v3320_v53  ;;  %v2937_v58 = vpop.permute.xlu1 %2936 }
 0x2f4   :  { %3126 = vst.msk [vmem:[#allocation3 + $0x18] sm:$0xff] %vm3122_vm10, %v2937_v58  ;;  %3339 = vrot.lane.b32.xlu0 %v2045_v38, %s5721_s21  ;;  %v3590_v38 = vld [vmem:[#allocation2 + $0x10a] sm:$0xff] }
 0x2f5   :  { %2956 = vrot.lane.b32.xlu1 %v2815_v7, %s5720_s20 }
 0x2f6   :  { %v3701_v9 = vpop.permute.xlu0 %3700 }
 0x2f7   :  { %3893 = vst.msk [vmem:[#allocation3] sm:$0xff] %vm3892_vm12, %v3701_v9  ;;  %v3318_v51 = vpop.permute.xlu1 %3317  ;;  %v2438_v9 = vld [vmem:[#allocation2 + $0x122] sm:$0xff] }
 0x2f8   :  { %3509 = vst.msk [vmem:[#allocation3 + $0x8] sm:$0xff] %vm3507_vm11, %v3318_v51  ;;  %3343 = vrot.lane.b32.xlu0 %v3201_v6, %s5721_s21  ;;  %v2054_v51 = vld [vmem:[#allocation2 + $0x129] sm:$0xff] }
 0x2f9   :  { %2960 = vrot.lane.b32.xlu1 %v2817_v16, %s5720_s20 }
 0x2fa   :  { %v3705_v18 = vpop.permute.xlu0 %3704 }
 0x2fb   :  { %3895 = vst.msk [vmem:[#allocation3 + $0x10] sm:$0xff] %vm3892_vm12, %v3705_v18  ;;  %v3322_v4 = vpop.permute.xlu1 %3321  ;;  %v2822_v18 = vld [vmem:[#allocation2 + $0x120] sm:$0xff] }
 0x2fc   :  { %3511 = vst.msk [vmem:[#allocation3 + $0x18] sm:$0xff] %vm3507_vm11, %v3322_v4  ;;  %3724 = vrot.lane.b32.xlu0 %v2430_v34, %s5722_s24  ;;  %v2053_v34 = vld [vmem:[#allocation2 + $0x121] sm:$0xff] }
 0x2fd   :  { %3341 = vrot.lane.b32.xlu1 %v2046_v3, %s5721_s21 }
 0x2fe   :  { %v2168_v17 = vpop.permute.xlu0 %2167  ;;  %v3957_v27 = vld [vmem:[#allocation3] sm:$0xff] }
 0x2ff   :  { %2356 = vst.msk [vmem:[#allocation3 + $0x20] sm:$0xff] %vm2351_vm8, %v2168_v17  ;;  %v3703_v47 = vpop.permute.xlu1 %3702 }
 0x300   :  { %3894 = vst.msk [vmem:[#allocation3 + $0x8] sm:$0xff] %vm3892_vm12, %v3703_v47  ;;  %3728 = vrot.lane.b32.xlu0 %v3586_v24, %s5722_s24  ;;  %v2824_v47 = vld [vmem:[#allocation2 + $0x138] sm:$0xff] }
 0x301   :  { %3345 = vrot.lane.b32.xlu1 %v3202_v19, %s5721_s21 }
 0x302   :  { %v2172_v15 = vpop.permute.xlu0 %2171  ;;  %v3959_v42 = vld [vmem:[#allocation3 + $0x10] sm:$0xff] }
 0x303   :  { %2358 = vst.msk [vmem:[#allocation3 + $0x30] sm:$0xff] %vm2351_vm8, %v2172_v15  ;;  %v3707_v62 = vpop.permute.xlu1 %3706 }
 0x304   :  { %3896 = vst.msk [vmem:[#allocation3 + $0x18] sm:$0xff] %vm3892_vm12, %v3707_v62  ;;  %2191 = vrot.lane.b32.xlu0 %v3201_v6, %s5718_s18  ;;  %v2823_v62 = vld [vmem:[#allocation2 + $0x128] sm:$0xff] }
 0x305   :  { %3726 = vrot.lane.b32.xlu1 %v2431_v60, %s5722_s24 }
 0x306   :  { %v2553_v14 = vpop.permute.xlu0 %2552 }
 0x307   :  { %2741 = vst.msk [vmem:[#allocation3 + $0x20] sm:$0xff] %vm2736_vm9, %v2553_v14  ;;  %v2170_v45 = vpop.permute.xlu1 %2169  ;;  %v3958_v33 = vld [vmem:[#allocation3 + $0x8] sm:$0xff] }
 0x308   :  { %2357 = vst.msk [vmem:[#allocation3 + $0x28] sm:$0xff] %vm2351_vm8, %v2170_v45  ;;  %2195 = vrot.lane.b32.xlu0 %v2049_v26, %s5718_s18  ;;  %v4021_v40 = vpack.c.bf16 %v3958_v33, %v3957_v27  ;;  %v2825_v27 = vld [vmem:[#allocation2 + $0x140] sm:$0xff] }
 0x309   :  { %3730 = vrot.lane.b32.xlu1 %v3587_v48, %s5722_s24 }
 0x30a   :  { %v2557_v61 = vpop.permute.xlu0 %2556  ;;  %5511 = vmatprep.mubr.msk.bf16.mxu1 %vm4080_vm13, %v4021_v40 }
 0x30b   :  { %2743 = vst.msk [vmem:[#allocation3 + $0x30] sm:$0xff] %vm2736_vm9, %v2557_v61  ;;  %v2174_v41 = vpop.permute.xlu1 %2173  ;;  %v3960_v57 = vld [vmem:[#allocation3 + $0x18] sm:$0xff] }
 0x30c   :  { %2359 = vst.msk [vmem:[#allocation3 + $0x38] sm:$0xff] %vm2351_vm8, %v2174_v41  ;;  %2576 = vrot.lane.b32.xlu0 %v3586_v24, %s5719_s19  ;;  %v4022_v63 = vpack.c.bf16 %v3960_v57, %v3959_v42  ;;  %v2439_v24 = vld [vmem:[#allocation2 + $0x12a] sm:$0xff]  ;;  %v3594_v41 = vld [vmem:[#allocation2 + $0x13a] sm:$0xff] }
 0x30d   :  { %2193 = vrot.lane.b32.xlu1 %v3202_v19, %s5718_s18  ;;  %v3210_v42 = vld [vmem:[#allocation2 + $0x141] sm:$0xff] }
 0x30e   :  { %v2939_v46 = vpop.permute.xlu0 %2938  ;;  %5512 = vmatmul.mubr.msk.bf16.vlgmr.msra.gmra.mrb[32].mxu1 %vm4080_vm13, %v4022_v63 }
 0x30f   :  { %3127 = vst.msk [vmem:[#allocation3 + $0x20] sm:$0xff] %vm3122_vm10, %v2939_v46  ;;  %v2555_v20 = vpop.permute.xlu1 %2554 }
 0x310   :  { %2742 = vst.msk [vmem:[#allocation3 + $0x28] sm:$0xff] %vm2736_vm9, %v2555_v20  ;;  %2580 = vrot.lane.b32.xlu0 %v2434_v50, %s5719_s19 }
 0x311   :  { %2197 = vrot.lane.b32.xlu1 %v2050_v22, %s5718_s18 }
 0x312   :  { %v2943_v44 = vpop.permute.xlu0 %2942 }
 0x313   :  { %3129 = vst.msk [vmem:[#allocation3 + $0x30] sm:$0xff] %vm3122_vm10, %v2943_v44  ;;  %v2559_v49 = vpop.permute.xlu1 %2558 }
 0x314   :  { %2744 = vst.msk [vmem:[#allocation3 + $0x38] sm:$0xff] %vm2736_vm9, %v2559_v49  ;;  %2962 = vrot.lane.b32.xlu0 %v2818_v5, %s5720_s20  ;;  %v3595_v49 = vld [vmem:[#allocation2 + $0x142] sm:$0xff] }
 0x315   :  { %2578 = vrot.lane.b32.xlu1 %v3587_v48, %s5719_s19 }
 0x316   :  { %v3324_v23 = vpop.permute.xlu0 %3323 }
 0x317   :  { %3512 = vst.msk [vmem:[#allocation3 + $0x20] sm:$0xff] %vm3507_vm11, %v3324_v23  ;;  %v2941_v25 = vpop.permute.xlu1 %2940 }
 0x318   :  { %3128 = vst.msk [vmem:[#allocation3 + $0x28] sm:$0xff] %vm3122_vm10, %v2941_v25  ;;  %2966 = vrot.lane.b32.xlu0 %v2820_v28, %s5720_s20 }
 0x319   :  { %2582 = vrot.lane.b32.xlu1 %v2435_v0, %s5719_s19 }
 0x31a   :  { %v3328_v43 = vpop.permute.xlu0 %3327 }
 0x31b   :  { %3514 = vst.msk [vmem:[#allocation3 + $0x30] sm:$0xff] %vm3507_vm11, %v3328_v43  ;;  %v2945_v56 = vpop.permute.xlu1 %2944 }
 0x31c   :  { %3130 = vst.msk [vmem:[#allocation3 + $0x38] sm:$0xff] %vm3122_vm10, %v2945_v56  ;;  %3347 = vrot.lane.b32.xlu0 %v2049_v26, %s5721_s21  ;;  %v3209_v26 = vld [vmem:[#allocation2 + $0x139] sm:$0xff] }
 0x31d   :  { %2964 = vrot.lane.b32.xlu1 %v2819_v54, %s5720_s20 }
 0x31e   :  { %v3709_v8 = vpop.permute.xlu0 %3708 }
 0x31f   :  { %3897 = vst.msk [vmem:[#allocation3 + $0x20] sm:$0xff] %vm3892_vm12, %v3709_v8  ;;  %v3326_v37 = vpop.permute.xlu1 %3325  ;;  %v2442_v8 = vld [vmem:[#allocation2 + $0x152] sm:$0xff] }
 0x320   :  { %3513 = vst.msk [vmem:[#allocation3 + $0x28] sm:$0xff] %vm3507_vm11, %v3326_v37  ;;  %3351 = vrot.lane.b32.xlu0 %v3205_v10, %s5721_s21  ;;  %v2058_v37 = vld [vmem:[#allocation2 + $0x159] sm:$0xff] }
 0x321   :  { %2968 = vrot.lane.b32.xlu1 %v2821_v11, %s5720_s20 }
 0x322   :  { %v3713_v59 = vpop.permute.xlu0 %3712 }
 0x323   :  { %3899 = vst.msk [vmem:[#allocation3 + $0x30] sm:$0xff] %vm3892_vm12, %v3713_v59  ;;  %v3330_v12 = vpop.permute.xlu1 %3329  ;;  %v2826_v59 = vld [vmem:[#allocation2 + $0x150] sm:$0xff] }
 0x324   :  { %3515 = vst.msk [vmem:[#allocation3 + $0x38] sm:$0xff] %vm3507_vm11, %v3330_v12  ;;  %3732 = vrot.lane.b32.xlu0 %v2434_v50, %s5722_s24  ;;  %v2057_v50 = vld [vmem:[#allocation2 + $0x151] sm:$0xff] }
 0x325   :  { %3349 = vrot.lane.b32.xlu1 %v2050_v22, %s5721_s21 }
 0x326   :  { %v2176_v13 = vpop.permute.xlu0 %2175  ;;  %v3961_v3 = vld [vmem:[#allocation3 + $0x20] sm:$0xff] }
 0x327   :  { %2360 = vst.msk [vmem:[#allocation3 + $0x40] sm:$0xff] %vm2351_vm8, %v2176_v13  ;;  %v3711_v35 = vpop.permute.xlu1 %3710 }
 0x328   :  { %3898 = vst.msk [vmem:[#allocation3 + $0x28] sm:$0xff] %vm3892_vm12, %v3711_v35  ;;  %3736 = vrot.lane.b32.xlu0 %v3590_v38, %s5722_s24  ;;  %v2828_v35 = vld [vmem:[#allocation2 + $0x168] sm:$0xff] }
 0x329   :  { %3353 = vrot.lane.b32.xlu1 %v3206_v1, %s5721_s21 }
 0x32a   :  { %v2180_v29 = vpop.permute.xlu0 %2179  ;;  %v3963_v21 = vld [vmem:[#allocation3 + $0x30] sm:$0xff] }
 0x32b   :  { %2362 = vst.msk [vmem:[#allocation3 + $0x50] sm:$0xff] %vm2351_vm8, %v2180_v29  ;;  %v3715_v36 = vpop.permute.xlu1 %3714 }
 0x32c   :  { %3900 = vst.msk [vmem:[#allocation3 + $0x38] sm:$0xff] %vm3892_vm12, %v3715_v36  ;;  %2199 = vrot.lane.b32.xlu0 %v3205_v10, %s5718_s18 }
 0x32d   :  { %3734 = vrot.lane.b32.xlu1 %v2435_v0, %s5722_s24 }
 0x32e   :  { %v2561_v2 = vpop.permute.xlu0 %2560 }
 0x32f   :  { %2745 = vst.msk [vmem:[#allocation3 + $0x40] sm:$0xff] %vm2736_vm9, %v2561_v2  ;;  %v2178_v30 = vpop.permute.xlu1 %2177  ;;  %v3962_v31 = vld [vmem:[#allocation3 + $0x28] sm:$0xff] }
 0x330   :  { %2361 = vst.msk [vmem:[#allocation3 + $0x48] sm:$0xff] %vm2351_vm8, %v2178_v30  ;;  %2203 = vrot.lane.b32.xlu0 %v2053_v34, %s5718_s18  ;;  %v4023_v55 = vpack.c.bf16 %v3962_v31, %v3961_v3  ;;  %v2827_v30 = vld [vmem:[#allocation2 + $0x158] sm:$0xff]  ;;  %v3213_v31 = vld [vmem:[#allocation2 + $0x169] sm:$0xff] }
 0x331   :  { %3738 = vrot.lane.b32.xlu1 %v3591_v39, %s5722_s24 }
 0x332   :  { %v2565_v32 = vpop.permute.xlu0 %2564  ;;  %5515 = vmatprep.mubr.msk.bf16.mxu1 %vm4080_vm13, %v4023_v55 }
 0x333   :  { %2747 = vst.msk [vmem:[#allocation3 + $0x50] sm:$0xff] %vm2736_vm9, %v2565_v32  ;;  %v2182_v52 = vpop.permute.xlu1 %2181  ;;  %v3964_v60 = vld [vmem:[#allocation3 + $0x38] sm:$0xff] }
 0x334   :  { %2363 = vst.msk [vmem:[#allocation3 + $0x58] sm:$0xff] %vm2351_vm8, %v2182_v52  ;;  %2584 = vrot.lane.b32.xlu0 %v3590_v38, %s5719_s19  ;;  %v4024_v53 = vpack.c.bf16 %v3964_v60, %v3963_v21  ;;  %v2443_v38 = vld [vmem:[#allocation2 + $0x15a] sm:$0xff]  ;;  %v3598_v60 = vld [vmem:[#allocation2 + $0x16a] sm:$0xff] }
 0x335   :  { %2201 = vrot.lane.b32.xlu1 %v3206_v1, %s5718_s18  ;;  %v4566_v1 = vld [vmem:[%s7724_s5] sm:$0x3] }
 0x336   :  { %v2947_v58 = vpop.permute.xlu0 %2946  ;;  %5516 = vmatmul.mubr.msk.bf16.gmra.mrb[36].mxu1 %vm4080_vm13, %v4024_v53  ;;  %5644 = vmatprep.subr.msk.bf16.mxu0 %vm4177_vm7, %v4566_v1  ;;  %v4735_v36 = vsel %vm4177_vm7, %v4566_v1, 0  ;;  %v3214_v53 = vld [vmem:[#allocation2 + $0x171] sm:$0xff] }
 0x337   :  { %3131 = vst.msk [vmem:[#allocation3 + $0x40] sm:$0xff] %vm3122_vm10, %v2947_v58  ;;  %v2563_v7 = vpop.permute.xlu1 %2562  ;;  %5576 = vmatpush3.bf16.msra.mxu0 %v4735_v36 }
 0x338   :  { %2746 = vst.msk [vmem:[#allocation3 + $0x48] sm:$0xff] %vm2736_vm9, %v2563_v7  ;;  %2588 = vrot.lane.b32.xlu0 %v2438_v9, %s5719_s19 }
 0x339   :  { %2205 = vrot.lane.b32.xlu1 %v2054_v51, %s5718_s18 }
 0x33a   :  { %v2951_v6 = vpop.permute.xlu0 %2950 }
 0x33b   :  { %3133 = vst.msk [vmem:[#allocation3 + $0x50] sm:$0xff] %vm3122_vm10, %v2951_v6  ;;  %v2567_v16 = vpop.permute.xlu1 %2566  ;;  %v2061_v6 = vld [vmem:[#allocation2 + $0x181] sm:$0xff] }
 0x33c   :  { %2748 = vst.msk [vmem:[#allocation3 + $0x58] sm:$0xff] %vm2736_vm9, %v2567_v16  ;;  %2970 = vrot.lane.b32.xlu0 %v2822_v18, %s5720_s20 }
 0x33d   :  { %2586 = vrot.lane.b32.xlu1 %v3591_v39, %s5719_s19  ;;  %v2829_v39 = vld [vmem:[#allocation2 + $0x170] sm:$0xff] }
 0x33e   :  { %v3332_v4 = vpop.permute.xlu0 %3331 }
 0x33f   :  { %3516 = vst.msk [vmem:[#allocation3 + $0x40] sm:$0xff] %vm3507_vm11, %v3332_v4  ;;  %v2949_v17 = vpop.permute.xlu1 %2948  ;;  %v3599_v4 = vld [vmem:[#allocation2 + $0x172] sm:$0xff] }
 0x340   :  { %3132 = vst.msk [vmem:[#allocation3 + $0x48] sm:$0xff] %vm3122_vm10, %v2949_v17  ;;  %2974 = vrot.lane.b32.xlu0 %v2824_v47, %s5720_s20 }
 0x341   :  { %2590 = vrot.lane.b32.xlu1 %v2439_v24, %s5719_s19 }
 0x342   :  { %v3336_v19 = vpop.permute.xlu0 %3335 }
 0x343   :  { %3518 = vst.msk [vmem:[#allocation3 + $0x50] sm:$0xff] %vm3507_vm11, %v3336_v19  ;;  %v2953_v15 = vpop.permute.xlu1 %2952 }
 0x344   :  { %3134 = vst.msk [vmem:[#allocation3 + $0x58] sm:$0xff] %vm3122_vm10, %v2953_v15  ;;  %3355 = vrot.lane.b32.xlu0 %v2053_v34, %s5721_s21 }
 0x345   :  { %2972 = vrot.lane.b32.xlu1 %v2823_v62, %s5720_s20 }
 0x346   :  { %v3717_v14 = vpop.permute.xlu0 %3716 }
 0x347   :  { %3901 = vst.msk [vmem:[#allocation3 + $0x40] sm:$0xff] %vm3892_vm12, %v3717_v14  ;;  %v3334_v45 = vpop.permute.xlu1 %3333 }
 0x348   :  { %3517 = vst.msk [vmem:[#allocation3 + $0x48] sm:$0xff] %vm3507_vm11, %v3334_v45  ;;  %3359 = vrot.lane.b32.xlu0 %v3209_v26, %s5721_s21 }
 0x349   :  { %2976 = vrot.lane.b32.xlu1 %v2825_v27, %s5720_s20  ;;  %v2062_v27 = vld [vmem:[#allocation2 + $0x189] sm:$0xff] }
 0x34a   :  { %v3721_v33 = vpop.permute.xlu0 %3720 }
 0x34b   :  { %3903 = vst.msk [vmem:[#allocation3 + $0x50] sm:$0xff] %vm3892_vm12, %v3721_v33  ;;  %v3338_v48 = vpop.permute.xlu1 %3337 }
 0x34c   :  { %3519 = vst.msk [vmem:[#allocation3 + $0x58] sm:$0xff] %vm3507_vm11, %v3338_v48  ;;  %3740 = vrot.lane.b32.xlu0 %v2438_v9, %s5722_s24 }
 0x34d   :  { %3357 = vrot.lane.b32.xlu1 %v2054_v51, %s5721_s21 }
 0x34e   :  { %v2184_v40 = vpop.permute.xlu0 %2183  ;;  %v3965_v22 = vld [vmem:[#allocation3 + $0x40] sm:$0xff] }
 0x34f   :  { %2364 = vst.msk [vmem:[#allocation3 + $0x60] sm:$0xff] %vm2351_vm8, %v2184_v40  ;;  %v3719_v61 = vpop.permute.xlu1 %3718  ;;  %v2830_v40 = vld [vmem:[#allocation2 + $0x180] sm:$0xff] }
 0x350   :  { %3902 = vst.msk [vmem:[#allocation3 + $0x48] sm:$0xff] %vm3892_vm12, %v3719_v61  ;;  %3744 = vrot.lane.b32.xlu0 %v3594_v41, %s5722_s24  ;;  %v2832_v61 = vld [vmem:[#allocation2 + $0x198] sm:$0xff] }
 0x351   :  { %3361 = vrot.lane.b32.xlu1 %v3210_v42, %s5721_s21 }
 0x352   :  { %v2188_v57 = vpop.permute.xlu0 %2187  ;;  %v3967_v28 = vld [vmem:[#allocation3 + $0x50] sm:$0xff] }
 0x353   :  { %2366 = vst.msk [vmem:[#allocation3 + $0x70] sm:$0xff] %vm2351_vm8, %v2188_v57  ;;  %v3723_v63 = vpop.permute.xlu1 %3722  ;;  %v2447_v57 = vld [vmem:[#allocation2 + $0x18a] sm:$0xff] }
 0x354   :  { %3904 = vst.msk [vmem:[#allocation3 + $0x58] sm:$0xff] %vm3892_vm12, %v3723_v63  ;;  %2207 = vrot.lane.b32.xlu0 %v3209_v26, %s5718_s18  ;;  %v2446_v26 = vld [vmem:[#allocation2 + $0x182] sm:$0xff] }
 0x355   :  { %3742 = vrot.lane.b32.xlu1 %v2439_v24, %s5722_s24 }
 0x356   :  { %v2569_v46 = vpop.permute.xlu0 %2568 }
 0x357   :  { %2749 = vst.msk [vmem:[#allocation3 + $0x60] sm:$0xff] %vm2736_vm9, %v2569_v46  ;;  %v2186_v20 = vpop.permute.xlu1 %2185  ;;  %v3966_v44 = vld [vmem:[#allocation3 + $0x48] sm:$0xff] }
 0x358   :  { %2365 = vst.msk [vmem:[#allocation3 + $0x68] sm:$0xff] %vm2351_vm8, %v2186_v20  ;;  %2211 = vrot.lane.b32.xlu0 %v2057_v50, %s5718_s18  ;;  %v4025_v5 = vpack.c.bf16 %v3966_v44, %v3965_v22  ;;  %v2831_v20 = vld [vmem:[#allocation2 + $0x188] sm:$0xff]  ;;  %v2833_v44 = vld [vmem:[#allocation2 + $0x1a0] sm:$0xff] }
 0x359   :  { %3746 = vrot.lane.b32.xlu1 %v3595_v49, %s5722_s24 }
 0x35a   :  { %v2573_v23 = vpop.permute.xlu0 %2572  ;;  %5519 = vmatprep.mubr.msk.bf16.mxu1 %vm4080_vm13, %v4025_v5 }
 0x35b   :  { %2751 = vst.msk [vmem:[#allocation3 + $0x70] sm:$0xff] %vm2736_vm9, %v2573_v23  ;;  %v2190_v25 = vpop.permute.xlu1 %2189  ;;  %v3968_v0 = vld [vmem:[#allocation3 + $0x58] sm:$0xff] }
 0x35c   :  { %2367 = vst.msk [vmem:[#allocation3 + $0x78] sm:$0xff] %vm2351_vm8, %v2190_v25  ;;  %2592 = vrot.lane.b32.xlu0 %v3594_v41, %s5719_s19  ;;  %v4026_v43 = vpack.c.bf16 %v3968_v0, %v3967_v28  ;;  %v3602_v25 = vld [vmem:[#allocation2 + $0x19a] sm:$0xff] }
 0x35d   :  { %2209 = vrot.lane.b32.xlu1 %v3210_v42, %s5718_s18  ;;  %v3218_v0 = vld [vmem:[#allocation2 + $0x1a1] sm:$0xff] }
 0x35e   :  { %v2955_v56 = vpop.permute.xlu0 %2954  ;;  %5520 = vmatmul.mubr.msk.bf16.gmra.mrb[40].mxu1 %vm4080_vm13, %v4026_v43 }
 0x35f   :  { %3135 = vst.msk [vmem:[#allocation3 + $0x60] sm:$0xff] %vm3122_vm10, %v2955_v56  ;;  %v2571_v54 = vpop.permute.xlu1 %2570 }
 0x360   :  { %2750 = vst.msk [vmem:[#allocation3 + $0x68] sm:$0xff] %vm2736_vm9, %v2571_v54  ;;  %2596 = vrot.lane.b32.xlu0 %v2442_v8, %s5719_s19 }
 0x361   :  { %2213 = vrot.lane.b32.xlu1 %v2058_v37, %s5718_s18 }
 0x362   :  { %v2959_v10 = vpop.permute.xlu0 %2958 }
 0x363   :  { %3137 = vst.msk [vmem:[#allocation3 + $0x70] sm:$0xff] %vm3122_vm10, %v2959_v10  ;;  %v2575_v11 = vpop.permute.xlu1 %2574  ;;  %v3603_v10 = vld [vmem:[#allocation2 + $0x1a2] sm:$0xff] }
 0x364   :  { %2752 = vst.msk [vmem:[#allocation3 + $0x78] sm:$0xff] %vm2736_vm9, %v2575_v11  ;;  %2978 = vrot.lane.b32.xlu0 %v2826_v59, %s5720_s20  ;;  %v2065_v59 = vld [vmem:[#allocation2 + $0x1e1] sm:$0xff] }
 0x365   :  { %2594 = vrot.lane.b32.xlu1 %v3595_v49, %s5719_s19 }
 0x366   :  { %v3340_v12 = vpop.permute.xlu0 %3339 }
 0x367   :  { %3520 = vst.msk [vmem:[#allocation3 + $0x60] sm:$0xff] %vm3507_vm11, %v3340_v12  ;;  %v2957_v13 = vpop.permute.xlu1 %2956 }
 0x368   :  { %3136 = vst.msk [vmem:[#allocation3 + $0x68] sm:$0xff] %vm3122_vm10, %v2957_v13  ;;  %2982 = vrot.lane.b32.xlu0 %v2828_v35, %s5720_s20 }
 0x369   :  { %2598 = vrot.lane.b32.xlu1 %v2443_v38, %s5719_s19 }
 0x36a   :  { %v3344_v29 = vpop.permute.xlu0 %3343 }
 0x36b   :  { %3522 = vst.msk [vmem:[#allocation3 + $0x70] sm:$0xff] %vm3507_vm11, %v3344_v29  ;;  %v2961_v2 = vpop.permute.xlu1 %2960  ;;  %v2448_v29 = vld [vmem:[#allocation2 + $0x1ca] sm:$0xff] }
 0x36c   :  { %3138 = vst.msk [vmem:[#allocation3 + $0x78] sm:$0xff] %vm3122_vm10, %v2961_v2  ;;  %3363 = vrot.lane.b32.xlu0 %v2057_v50, %s5721_s21  ;;  %v3217_v50 = vld [vmem:[#allocation2 + $0x199] sm:$0xff] }
 0x36d   :  { %2980 = vrot.lane.b32.xlu1 %v2827_v30, %s5720_s20  ;;  %v2064_v30 = vld [vmem:[#allocation2 + $0x1d1] sm:$0xff] }
 0x36e   :  { %v3725_v34 = vpop.permute.xlu0 %3724 }
 0x36f   :  { %3905 = vst.msk [vmem:[#allocation3 + $0x60] sm:$0xff] %vm3892_vm12, %v3725_v34  ;;  %v3342_v3 = vpop.permute.xlu1 %3341 }
 0x370   :  { %3521 = vst.msk [vmem:[#allocation3 + $0x68] sm:$0xff] %vm3507_vm11, %v3342_v3  ;;  %3367 = vrot.lane.b32.xlu0 %v3213_v31, %s5721_s21 }
 0x371   :  { %2984 = vrot.lane.b32.xlu1 %v2829_v39, %s5720_s20  ;;  %v2450_v39 = vld [vmem:[#allocation2 + $0x1e2] sm:$0xff] }
 0x372   :  { %v3729_v55 = vpop.permute.xlu0 %3728 }
 0x373   :  { %3907 = vst.msk [vmem:[#allocation3 + $0x70] sm:$0xff] %vm3892_vm12, %v3729_v55  ;;  %v3346_v32 = vpop.permute.xlu1 %3345  ;;  %v2066_v55 = vld [vmem:[#allocation2 + $0x1e9] sm:$0xff] }
 0x374   :  { %3523 = vst.msk [vmem:[#allocation3 + $0x78] sm:$0xff] %vm3507_vm11, %v3346_v32  ;;  %3748 = vrot.lane.b32.xlu0 %v2442_v8, %s5722_s24  ;;  %v2063_v8 = vld [vmem:[#allocation2 + $0x1c9] sm:$0xff] }
 0x375   :  { %3365 = vrot.lane.b32.xlu1 %v2058_v37, %s5721_s21 }
 0x376   :  { %v2192_v52 = vpop.permute.xlu0 %2191  ;;  %v3969_v16 = vld [vmem:[#allocation3 + $0x60] sm:$0xff] }
 0x377   :  { %2368 = vst.msk [vmem:[#allocation3 + $0x80] sm:$0xff] %vm2351_vm8, %v2192_v52  ;;  %v3727_v21 = vpop.permute.xlu1 %3726 }
 0x378   :  { %3906 = vst.msk [vmem:[#allocation3 + $0x68] sm:$0xff] %vm3892_vm12, %v3727_v21  ;;  %3752 = vrot.lane.b32.xlu0 %v3598_v60, %s5722_s24  ;;  %v2834_v21 = vld [vmem:[#allocation2 + $0x1e0] sm:$0xff] }
 0x379   :  { %3369 = vrot.lane.b32.xlu1 %v3214_v53, %s5721_s21 }
 0x37a   :  { %v2196_v58 = vpop.permute.xlu0 %2195  ;;  %v3971_v19 = vld [vmem:[#allocation3 + $0x70] sm:$0xff] }
 0x37b   :  { %2370 = vst.msk [vmem:[#allocation3 + $0x90] sm:$0xff] %vm2351_vm8, %v2196_v58  ;;  %v3731_v7 = vpop.permute.xlu1 %3730 }
 0x37c   :  { %3908 = vst.msk [vmem:[#allocation3 + $0x78] sm:$0xff] %vm3892_vm12, %v3731_v7  ;;  %2215 = vrot.lane.b32.xlu0 %v3213_v31, %s5718_s18  ;;  %v2836_v7 = vld [vmem:[#allocation2 + $0x1f8] sm:$0xff] }
 0x37d   :  { %3750 = vrot.lane.b32.xlu1 %v2443_v38, %s5722_s24 }
 0x37e   :  { %v2577_v9 = vpop.permute.xlu0 %2576 }
 0x37f   :  { %2753 = vst.msk [vmem:[#allocation3 + $0x80] sm:$0xff] %vm2736_vm9, %v2577_v9  ;;  %v2194_v51 = vpop.permute.xlu1 %2193  ;;  %v3970_v18 = vld [vmem:[#allocation3 + $0x68] sm:$0xff] }
 0x380   :  { %2369 = vst.msk [vmem:[#allocation3 + $0x88] sm:$0xff] %vm2351_vm8, %v2194_v51  ;;  %2219 = vrot.lane.b32.xlu0 %v2061_v6, %s5718_s18  ;;  %v4027_v17 = vpack.c.bf16 %v3970_v18, %v3969_v16  ;;  %v2451_v9 = vld [vmem:[#allocation2 + $0x1ea] sm:$0xff] }
 0x381   :  { %3754 = vrot.lane.b32.xlu1 %v3599_v4, %s5722_s24  ;;  %v2835_v16 = vld [vmem:[#allocation2 + $0x1e8] sm:$0xff] }
 0x382   :  { %v2581_v47 = vpop.permute.xlu0 %2580  ;;  %5523 = vmatprep.mubr.msk.bf16.mxu1 %vm4080_vm13, %v4027_v17  ;;  %v3221_v17 = vld [vmem:[#allocation2 + $0x1f9] sm:$0xff] }
 0x383   :  { %2755 = vst.msk [vmem:[#allocation3 + $0x90] sm:$0xff] %vm2736_vm9, %v2581_v47  ;;  %v2198_v24 = vpop.permute.xlu1 %2197  ;;  %v3972_v15 = vld [vmem:[#allocation3 + $0x78] sm:$0xff]  ;;  %v2837_v47 = vld [vmem:[#allocation2 + $0x200] sm:$0xff] }
 0x384   :  { %2371 = vst.msk [vmem:[#allocation3 + $0x98] sm:$0xff] %vm2351_vm8, %v2198_v24  ;;  %2600 = vrot.lane.b32.xlu0 %v3598_v60, %s5719_s19  ;;  %v4028_v62 = vpack.c.bf16 %v3972_v15, %v3971_v19  ;;  %v2449_v60 = vld [vmem:[#allocation2 + $0x1d2] sm:$0xff] }
 0x385   :  { %2217 = vrot.lane.b32.xlu1 %v3214_v53, %s5718_s18 }
 0x386   :  { %v2963_v14 = vpop.permute.xlu0 %2962  ;;  %5524 = vmatmul.mubr.msk.bf16.gmra.mrb[44].mxu1 %vm4080_vm13, %v4028_v62 }
 0x387   :  { %3139 = vst.msk [vmem:[#allocation3 + $0x80] sm:$0xff] %vm3122_vm10, %v2963_v14  ;;  %v2579_v45 = vpop.permute.xlu1 %2578  ;;  %v3606_v14 = vld [vmem:[#allocation2 + $0x1fa] sm:$0xff] }
 0x388   :  { %2754 = vst.msk [vmem:[#allocation3 + $0x88] sm:$0xff] %vm2736_vm9, %v2579_v45  ;;  %2604 = vrot.lane.b32.xlu0 %v2446_v26, %s5719_s19  ;;  %v3222_v45 = vld [vmem:[#allocation2 + $0x201] sm:$0xff] }
 0x389   :  { %2221 = vrot.lane.b32.xlu1 %v2062_v27, %s5718_s18 }
 0x38a   :  { %v2967_v33 = vpop.permute.xlu0 %2966 }
 0x38b   :  { %3141 = vst.msk [vmem:[#allocation3 + $0x90] sm:$0xff] %vm3122_vm10, %v2967_v33  ;;  %v2583_v48 = vpop.permute.xlu1 %2582 }
 0x38c   :  { %2756 = vst.msk [vmem:[#allocation3 + $0x98] sm:$0xff] %vm2736_vm9, %v2583_v48  ;;  %2986 = vrot.lane.b32.xlu0 %v2830_v40, %s5720_s20  ;;  %v2069_v40 = vld [vmem:[#allocation2 + $0x211] sm:$0xff] }
 0x38d   :  { %2602 = vrot.lane.b32.xlu1 %v3599_v4, %s5719_s19 }
 0x38e   :  { %v3348_v41 = vpop.permute.xlu0 %3347 }
 0x38f   :  { %3524 = vst.msk [vmem:[#allocation3 + $0x80] sm:$0xff] %vm3507_vm11, %v3348_v41  ;;  %v2965_v42 = vpop.permute.xlu1 %2964 }
 0x390   :  { %3140 = vst.msk [vmem:[#allocation3 + $0x88] sm:$0xff] %vm3122_vm10, %v2965_v42  ;;  %2990 = vrot.lane.b32.xlu0 %v2832_v61, %s5720_s20  ;;  %v3607_v42 = vld [vmem:[#allocation2 + $0x202] sm:$0xff] }
 0x391   :  { %2606 = vrot.lane.b32.xlu1 %v2447_v57, %s5719_s19 }
 0x392   :  { %v3352_v63 = vpop.permute.xlu0 %3351 }
 0x393   :  { %3526 = vst.msk [vmem:[#allocation3 + $0x90] sm:$0xff] %vm3507_vm11, %v3352_v63  ;;  %v2969_v46 = vpop.permute.xlu1 %2968 }
 0x394   :  { %3142 = vst.msk [vmem:[#allocation3 + $0x98] sm:$0xff] %vm3122_vm10, %v2969_v46  ;;  %3371 = vrot.lane.b32.xlu0 %v2061_v6, %s5721_s21 }
 0x395   :  { %2988 = vrot.lane.b32.xlu1 %v2831_v20, %s5720_s20 }
 0x396   :  { %v3733_v22 = vpop.permute.xlu0 %3732 }
 0x397   :  { %3909 = vst.msk [vmem:[#allocation3 + $0x80] sm:$0xff] %vm3892_vm12, %v3733_v22  ;;  %v3350_v49 = vpop.permute.xlu1 %3349 }
 0x398   :  { %3525 = vst.msk [vmem:[#allocation3 + $0x88] sm:$0xff] %vm3507_vm11, %v3350_v49  ;;  %3375 = vrot.lane.b32.xlu0 %v3217_v50, %s5721_s21 }
 0x399   :  { %2992 = vrot.lane.b32.xlu1 %v2833_v44, %s5720_s20 }
 0x39a   :  { %v3737_v5 = vpop.permute.xlu0 %3736 }
 0x39b   :  { %3911 = vst.msk [vmem:[#allocation3 + $0x90] sm:$0xff] %vm3892_vm12, %v3737_v5  ;;  %v3354_v23 = vpop.permute.xlu1 %3353  ;;  %v2454_v5 = vld [vmem:[#allocation2 + $0x212] sm:$0xff] }
 0x39c   :  { %3527 = vst.msk [vmem:[#allocation3 + $0x98] sm:$0xff] %vm3507_vm11, %v3354_v23  ;;  %3756 = vrot.lane.b32.xlu0 %v2446_v26, %s5722_s24  ;;  %v2070_v23 = vld [vmem:[#allocation2 + $0x219] sm:$0xff] }
 0x39d   :  { %3373 = vrot.lane.b32.xlu1 %v2062_v27, %s5721_s21 }
 0x39e   :  { %v2200_v28 = vpop.permute.xlu0 %2199  ;;  %v3973_v12 = vld [vmem:[#allocation3 + $0x80] sm:$0xff] }
 0x39f   :  { %2372 = vst.msk [vmem:[#allocation3 + $0xa0] sm:$0xff] %vm2351_vm8, %v2200_v28  ;;  %v3735_v43 = vpop.permute.xlu1 %3734 }
 0x3a0   :  { %3910 = vst.msk [vmem:[#allocation3 + $0x88] sm:$0xff] %vm3892_vm12, %v3735_v43  ;;  %3760 = vrot.lane.b32.xlu0 %v3602_v25, %s5722_s24 }
 0x3a1   :  { %3377 = vrot.lane.b32.xlu1 %v3218_v0, %s5721_s21  ;;  %v2838_v0 = vld [vmem:[#allocation2 + $0x210] sm:$0xff] }
 0x3a2   :  { %v2204_v56 = vpop.permute.xlu0 %2203  ;;  %v3975_v36 = vld [vmem:[#allocation3 + $0x90] sm:$0xff] }
 0x3a3   :  { %2374 = vst.msk [vmem:[#allocation3 + $0xb0] sm:$0xff] %vm2351_vm8, %v2204_v56  ;;  %v3739_v54 = vpop.permute.xlu1 %3738 }
 0x3a4   :  { %3912 = vst.msk [vmem:[#allocation3 + $0x98] sm:$0xff] %vm3892_vm12, %v3739_v54  ;;  %2223 = vrot.lane.b32.xlu0 %v2063_v8, %s5718_s18  ;;  %v2840_v54 = vld [vmem:[#allocation2 + $0x228] sm:$0xff]  ;;  %v7119_v8 = vld [vmem:[%s7723_s4] ss:$0 sm:$0xff] }
 0x3a5   :  { %3758 = vrot.lane.b32.xlu1 %v2447_v57, %s5722_s24 }
 0x3a6   :  { %v2585_v37 = vpop.permute.xlu0 %2584 }
 0x3a7   :  { %2757 = vst.msk [vmem:[#allocation3 + $0xa0] sm:$0xff] %vm2736_vm9, %v2585_v37  ;;  %v2202_v11 = vpop.permute.xlu1 %2201  ;;  %v3974_v13 = vld [vmem:[#allocation3 + $0x88] sm:$0xff]  ;;  %v2455_v37 = vld [vmem:[#allocation2 + $0x21a] sm:$0xff] }
 0x3a8   :  { %2373 = vst.msk [vmem:[#allocation3 + $0xa8] sm:$0xff] %vm2351_vm8, %v2202_v11  ;;  %2227 = vrot.lane.b32.xlu0 %v2065_v59, %s5718_s18  ;;  %v4029_v35 = vpack.c.bf16 %v3974_v13, %v3973_v12 }
 0x3a9   :  { %3762 = vrot.lane.b32.xlu1 %v3603_v10, %s5722_s24 }
 0x3aa   :  { %v2589_v38 = vpop.permute.xlu0 %2588  ;;  %5527 = vmatprep.mubr.msk.bf16.mxu1 %vm4080_vm13, %v4029_v35 }
 0x3ab   :  { %2759 = vst.msk [vmem:[#allocation3 + $0xb0] sm:$0xff] %vm2736_vm9, %v2589_v38  ;;  %v2206_v1 = vpop.permute.xlu1 %2205  ;;  %v3976_v2 = vld [vmem:[#allocation3 + $0x98] sm:$0xff] }
 0x3ac   :  { %2375 = vst.msk [vmem:[#allocation3 + $0xb8] sm:$0xff] %vm2351_vm8, %v2206_v1  ;;  %2608 = vrot.lane.b32.xlu0 %v2448_v29, %s5719_s19  ;;  %v4030_v34 = vpack.c.bf16 %v3976_v2, %v3975_v36  ;;  %v2839_v36 = vld [vmem:[#allocation2 + $0x218] sm:$0xff] }
 0x3ad   :  { %2225 = vrot.lane.b32.xlu1 %v2064_v30, %s5718_s18 }
 0x3ae   :  { %v2971_v3 = vpop.permute.xlu0 %2970  ;;  %5528 = vmatmul.mubr.msk.bf16.gmra.mrb[48].mxu1 %vm4080_vm13, %v4030_v34 }
 0x3af   :  { %3143 = vst.msk [vmem:[#allocation3 + $0xa0] sm:$0xff] %vm3122_vm10, %v2971_v3  ;;  %v2587_v31 = vpop.permute.xlu1 %2586 }
 0x3b0   :  { %2758 = vst.msk [vmem:[#allocation3 + $0xa8] sm:$0xff] %vm2736_vm9, %v2587_v31  ;;  %2612 = vrot.lane.b32.xlu0 %v2450_v39, %s5719_s19 }
 0x3b1   :  { %2229 = vrot.lane.b32.xlu1 %v2066_v55, %s5718_s18 }
 0x3b2   :  { %v2975_v32 = vpop.permute.xlu0 %2974 }
 0x3b3   :  { %3145 = vst.msk [vmem:[#allocation3 + $0xb0] sm:$0xff] %vm3122_vm10, %v2975_v32  ;;  %v2591_v52 = vpop.permute.xlu1 %2590  ;;  %v3225_v32 = vld [vmem:[#allocation2 + $0x229] sm:$0xff] }
 0x3b4   :  { %2760 = vst.msk [vmem:[#allocation3 + $0xb8] sm:$0xff] %vm2736_vm9, %v2591_v52  ;;  %2994 = vrot.lane.b32.xlu0 %v2834_v21, %s5720_s20  ;;  %v2841_v21 = vld [vmem:[#allocation2 + $0x230] sm:$0xff] }
 0x3b5   :  { %2610 = vrot.lane.b32.xlu1 %v2449_v60, %s5719_s19 }
 0x3b6   :  { %v3356_v53 = vpop.permute.xlu0 %3355 }
 0x3b7   :  { %3528 = vst.msk [vmem:[#allocation3 + $0xa0] sm:$0xff] %vm3507_vm11, %v3356_v53  ;;  %v2973_v58 = vpop.permute.xlu1 %2972 }
 0x3b8   :  { %3144 = vst.msk [vmem:[#allocation3 + $0xa8] sm:$0xff] %vm3122_vm10, %v2973_v58  ;;  %2998 = vrot.lane.b32.xlu0 %v2836_v7, %s5720_s20 }
 0x3b9   :  { %2614 = vrot.lane.b32.xlu1 %v2451_v9, %s5719_s19 }
 0x3ba   :  { %v3360_v51 = vpop.permute.xlu0 %3359 }
 0x3bb   :  { %3530 = vst.msk [vmem:[#allocation3 + $0xb0] sm:$0xff] %vm3507_vm11, %v3360_v51  ;;  %v2977_v6 = vpop.permute.xlu1 %2976  ;;  %v3610_v51 = vld [vmem:[#allocation2 + $0x22a] sm:$0xff] }
 0x3bc   :  { %3146 = vst.msk [vmem:[#allocation3 + $0xb8] sm:$0xff] %vm3122_vm10, %v2977_v6  ;;  %3379 = vrot.lane.b32.xlu0 %v2065_v59, %s5721_s21  ;;  %v3226_v6 = vld [vmem:[#allocation2 + $0x231] sm:$0xff] }
 0x3bd   :  { %2996 = vrot.lane.b32.xlu1 %v2835_v16, %s5720_s20 }
 0x3be   :  { %v3741_v18 = vpop.permute.xlu0 %3740 }
 0x3bf   :  { %3913 = vst.msk [vmem:[#allocation3 + $0xa0] sm:$0xff] %vm3892_vm12, %v3741_v18  ;;  %v3358_v4 = vpop.permute.xlu1 %3357 }
 0x3c0   :  { %3529 = vst.msk [vmem:[#allocation3 + $0xa8] sm:$0xff] %vm3507_vm11, %v3358_v4  ;;  %3383 = vrot.lane.b32.xlu0 %v3221_v17, %s5721_s21 }
 0x3c1   :  { %3000 = vrot.lane.b32.xlu1 %v2837_v47, %s5720_s20  ;;  %v2073_v47 = vld [vmem:[#allocation2 + $0x241] sm:$0xff] }
 0x3c2   :  { %v3745_v24 = vpop.permute.xlu0 %3744 }
 0x3c3   :  { %3915 = vst.msk [vmem:[#allocation3 + $0xb0] sm:$0xff] %vm3892_vm12, %v3745_v24  ;;  %v3362_v19 = vpop.permute.xlu1 %3361 }
 0x3c4   :  { %3531 = vst.msk [vmem:[#allocation3 + $0xb8] sm:$0xff] %vm3507_vm11, %v3362_v19  ;;  %3764 = vrot.lane.b32.xlu0 %v2450_v39, %s5722_s24 }
 0x3c5   :  { %3381 = vrot.lane.b32.xlu1 %v2066_v55, %s5721_s21 }
 0x3c6   :  { %v2208_v15 = vpop.permute.xlu0 %2207  ;;  %v3977_v61 = vld [vmem:[#allocation3 + $0xa0] sm:$0xff] }
 0x3c7   :  { %2376 = vst.msk [vmem:[#allocation3 + $0xc0] sm:$0xff] %vm2351_vm8, %v2208_v15  ;;  %v3743_v62 = vpop.permute.xlu1 %3742  ;;  %v3611_v15 = vld [vmem:[#allocation2 + $0x232] sm:$0xff] }
 0x3c8   :  { %3914 = vst.msk [vmem:[#allocation3 + $0xa8] sm:$0xff] %vm3892_vm12, %v3743_v62  ;;  %3768 = vrot.lane.b32.xlu0 %v3606_v14, %s5722_s24 }
 0x3c9   :  { %3385 = vrot.lane.b32.xlu1 %v3222_v45, %s5721_s21 }
 0x3ca   :  { %v2212_v26 = vpop.permute.xlu0 %2211  ;;  %v3979_v20 = vld [vmem:[#allocation3 + $0xb0] sm:$0xff] }
 0x3cb   :  { %2378 = vst.msk [vmem:[#allocation3 + $0xd0] sm:$0xff] %vm2351_vm8, %v2212_v26  ;;  %v3747_v27 = vpop.permute.xlu1 %3746 }
 0x3cc   :  { %3916 = vst.msk [vmem:[#allocation3 + $0xb8] sm:$0xff] %vm3892_vm12, %v3747_v27  ;;  %2231 = vrot.lane.b32.xlu0 %v3221_v17, %s5718_s18 }
 0x3cd   :  { %3766 = vrot.lane.b32.xlu1 %v2451_v9, %s5722_s24 }
 0x3ce   :  { %v2593_v33 = vpop.permute.xlu0 %2592 }
 0x3cf   :  { %2761 = vst.msk [vmem:[#allocation3 + $0xc0] sm:$0xff] %vm2736_vm9, %v2593_v33  ;;  %v2210_v48 = vpop.permute.xlu1 %2209  ;;  %v3978_v41 = vld [vmem:[#allocation3 + $0xa8] sm:$0xff] }
 0x3d0   :  { %2377 = vst.msk [vmem:[#allocation3 + $0xc8] sm:$0xff] %vm2351_vm8, %v2210_v48  ;;  %2235 = vrot.lane.b32.xlu0 %v2069_v40, %s5718_s18  ;;  %v4031_v57 = vpack.c.bf16 %v3978_v41, %v3977_v61  ;;  %v2458_v61 = vld [vmem:[#allocation2 + $0x242] sm:$0xff] }
 0x3d1   :  { %3770 = vrot.lane.b32.xlu1 %v3607_v42, %s5722_s24  ;;  %v2074_v41 = vld [vmem:[#allocation2 + $0x249] sm:$0xff] }
 0x3d2   :  { %v2597_v63 = vpop.permute.xlu0 %2596  ;;  %5531 = vmatprep.mubr.msk.bf16.mxu1 %vm4080_vm13, %v4031_v57 }
 0x3d3   :  { %2763 = vst.msk [vmem:[#allocation3 + $0xd0] sm:$0xff] %vm2736_vm9, %v2597_v63  ;;  %v2214_v46 = vpop.permute.xlu1 %2213  ;;  %v3980_v50 = vld [vmem:[#allocation3 + $0xb8] sm:$0xff]  ;;  %v2842_v63 = vld [vmem:[#allocation2 + $0x240] sm:$0xff] }
 0x3d4   :  { %2379 = vst.msk [vmem:[#allocation3 + $0xd8] sm:$0xff] %vm2351_vm8, %v2214_v46  ;;  %2616 = vrot.lane.b32.xlu0 %v3606_v14, %s5719_s19  ;;  %v4032_v22 = vpack.c.bf16 %v3980_v50, %v3979_v20  ;;  %v2844_v50 = vld [vmem:[#allocation2 + $0x258] sm:$0xff] }
 0x3d5   :  { %2233 = vrot.lane.b32.xlu1 %v3222_v45, %s5718_s18 }
 0x3d6   :  { %v2979_v44 = vpop.permute.xlu0 %2978  ;;  %5532 = vmatmul.mubr.msk.bf16.gmra.mrb[52].mxu1 %vm4080_vm13, %v4032_v22  ;;  %v2459_v22 = vld [vmem:[#allocation2 + $0x24a] sm:$0xff] }
 0x3d7   :  { %3147 = vst.msk [vmem:[#allocation3 + $0xc0] sm:$0xff] %vm3122_vm10, %v2979_v44  ;;  %v2595_v49 = vpop.permute.xlu1 %2594 }
 0x3d8   :  { %2762 = vst.msk [vmem:[#allocation3 + $0xc8] sm:$0xff] %vm2736_vm9, %v2595_v49  ;;  %2620 = vrot.lane.b32.xlu0 %v2454_v5, %s5719_s19 }
 0x3d9   :  { %2237 = vrot.lane.b32.xlu1 %v2070_v23, %s5718_s18 }
 0x3da   :  { %v2983_v25 = vpop.permute.xlu0 %2982 }
 0x3db   :  { %3149 = vst.msk [vmem:[#allocation3 + $0xd0] sm:$0xff] %vm3122_vm10, %v2983_v25  ;;  %v2599_v28 = vpop.permute.xlu1 %2598 }
 0x3dc   :  { %2764 = vst.msk [vmem:[#allocation3 + $0xd8] sm:$0xff] %vm2736_vm9, %v2599_v28  ;;  %3002 = vrot.lane.b32.xlu0 %v2838_v0, %s5720_s20 }
 0x3dd   :  { %2618 = vrot.lane.b32.xlu1 %v3607_v42, %s5719_s19 }
 0x3de   :  { %v3364_v43 = vpop.permute.xlu0 %3363 }
 0x3df   :  { %3532 = vst.msk [vmem:[#allocation3 + $0xc0] sm:$0xff] %vm3507_vm11, %v3364_v43  ;;  %v2981_v56 = vpop.permute.xlu1 %2980 }
 0x3e0   :  { %3148 = vst.msk [vmem:[#allocation3 + $0xc8] sm:$0xff] %vm3122_vm10, %v2981_v56  ;;  %3006 = vrot.lane.b32.xlu0 %v2840_v54, %s5720_s20  ;;  %v2843_v54 = vld [vmem:[#allocation2 + $0x248] sm:$0xff] }
 0x3e1   :  { %2622 = vrot.lane.b32.xlu1 %v2455_v37, %s5719_s19  ;;  %v5513_v10 = vpop.f32.mrb[32].mxu1 }
 0x3e2   :  { %v4224_v11 = vadd.f32 %v5513_v10, %v7119_v8  ;;  %v3368_v59 = vpop.permute.xlu0 %3367  ;;  %v4215_v12 = vpop.f32.mrb[33].mxu1 }
 0x3e3   :  { %3534 = vst.msk [vmem:[#allocation3 + $0xd0] sm:$0xff] %vm3507_vm11, %v3368_v59  ;;  %v4216_v13 = vadd.f32 %v7119_v8, %v4215_v12  ;;  %v2985_v35 = vpop.permute.xlu1 %2984  ;;  %v5514_v38 = vpop.f32.mrb[34].mxu1 }
 0x3e4   :  { %3150 = vst.msk [vmem:[#allocation3 + $0xd8] sm:$0xff] %vm3122_vm10, %v2985_v35  ;;  %v4227_v1 = vadd.f32 %v5514_v38, %v7119_v8  ;;  %3387 = vrot.lane.b32.xlu0 %v2069_v40, %s5721_s21  ;;  %v4218_v29 = vpop.f32.mrb[35].mxu1  ;;  %v4472_v30 = vmax.f32 %v4224_v11, 0.0  ;;  %v3229_v38 = vld [vmem:[#allocation2 + $0x259] sm:$0xff] }
 0x3e5   :  { %v4219_v2 = vadd.f32 %v7119_v8, %v4218_v29  ;;  %3004 = vrot.lane.b32.xlu1 %v2839_v36, %s5720_s20  ;;  %v4470_v31 = vmax.f32 %v4216_v13, 0.0  ;;  %v2845_v29 = vld [vmem:[#allocation2 + $0x260] sm:$0xff] }
 0x3e6   :  { %v4473_v34 = vmax.f32 %v4227_v1, 0.0  ;;  %v3749_v3 = vpop.permute.xlu0 %3748 }
 0x3e7   :  { %v4471_v39 = vmax.f32 %v4219_v2, 0.0  ;;  %3917 = vst.msk [vmem:[#allocation3 + $0xc0] sm:$0xff] %vm3892_vm12, %v3749_v3  ;;  %v3366_v55 = vpop.permute.xlu1 %3365 }
 0x3e8   :  { %v4535_v52 = vpack.c.bf16 %v4473_v34, %v4472_v30  ;;  %3533 = vst.msk [vmem:[#allocation3 + $0xc8] sm:$0xff] %vm3507_vm11, %v3366_v55  ;;  %3391 = vrot.lane.b32.xlu0 %v3225_v32, %s5721_s21 }
 0x3e9   :  { %v4534_v60 = vpack.c.bf16 %v4471_v39, %v4470_v31  ;;  %3008 = vrot.lane.b32.xlu1 %v2841_v21, %s5720_s20  ;;  %v3614_v31 = vld [vmem:[#allocation2 + $0x25a] sm:$0xff] }
 0x3ea   :  { %v3753_v53 = vpop.permute.xlu0 %3752  ;;  %v3230_v39 = vld [vmem:[#allocation2 + $0x261] sm:$0xff] }
 0x3eb   :  { %3919 = vst.msk [vmem:[#allocation3 + $0xd0] sm:$0xff] %vm3892_vm12, %v3753_v53  ;;  %v3370_v58 = vpop.permute.xlu1 %3369  ;;  %5577 = vmatprep.mubr.msk.bf16.mxu0 %vm604_vm0, %v4534_v60  ;;  %v2077_v60 = vld [vmem:[#allocation2 + $0x271] sm:$0xff] }
 0x3ec   :  { %3535 = vst.msk [vmem:[#allocation3 + $0xd8] sm:$0xff] %vm3507_vm11, %v3370_v58  ;;  %3772 = vrot.lane.b32.xlu0 %v2454_v5, %s5722_s24  ;;  %5578 = vmatmul.mubr.msk.bf16.vlgmr.msra.gmra.mrb[32].mxu0 %vm604_vm0, %v4535_v52 }
 0x3ed   :  { %3389 = vrot.lane.b32.xlu1 %v2070_v23, %s5721_s21 }
 0x3ee   :  { %v2216_v7 = vpop.permute.xlu0 %2215  ;;  %v3981_v24 = vld [vmem:[#allocation3 + $0xc0] sm:$0xff] }
 0x3ef   :  { %2380 = vst.msk [vmem:[#allocation3 + $0xe0] sm:$0xff] %vm2351_vm8, %v2216_v7  ;;  %v3751_v9 = vpop.permute.xlu1 %3750  ;;  %v3615_v7 = vld [vmem:[#allocation2 + $0x262] sm:$0xff] }
 0x3f0   :  { %3918 = vst.msk [vmem:[#allocation3 + $0xc8] sm:$0xff] %vm3892_vm12, %v3751_v9  ;;  %3776 = vrot.lane.b32.xlu0 %v3610_v51, %s5722_s24 }
 0x3f1   :  { %3393 = vrot.lane.b32.xlu1 %v3226_v6, %s5721_s21 }
 0x3f2   :  { %v2220_v16 = vpop.permute.xlu0 %2219  ;;  %v3983_v26 = vld [vmem:[#allocation3 + $0xd0] sm:$0xff] }
 0x3f3   :  { %2382 = vst.msk [vmem:[#allocation3 + $0xf0] sm:$0xff] %vm2351_vm8, %v2220_v16  ;;  %v3755_v18 = vpop.permute.xlu1 %3754 }
 0x3f4   :  { %3920 = vst.msk [vmem:[#allocation3 + $0xd8] sm:$0xff] %vm3892_vm12, %v3755_v18  ;;  %2239 = vrot.lane.b32.xlu0 %v3225_v32, %s5718_s18 }
 0x3f5   :  { %3774 = vrot.lane.b32.xlu1 %v2455_v37, %s5722_s24 }
 0x3f6   :  { %v2601_v4 = vpop.permute.xlu0 %2600 }
 0x3f7   :  { %2765 = vst.msk [vmem:[#allocation3 + $0xe0] sm:$0xff] %vm2736_vm9, %v2601_v4  ;;  %v2218_v17 = vpop.permute.xlu1 %2217  ;;  %v3982_v19 = vld [vmem:[#allocation3 + $0xc8] sm:$0xff] }
 0x3f8   :  { %2381 = vst.msk [vmem:[#allocation3 + $0xe8] sm:$0xff] %vm2351_vm8, %v2218_v17  ;;  %2243 = vrot.lane.b32.xlu0 %v2073_v47, %s5718_s18  ;;  %v4033_v62 = vpack.c.bf16 %v3982_v19, %v3981_v24  ;;  %v2462_v24 = vld [vmem:[#allocation2 + $0x272] sm:$0xff] }
 0x3f9   :  { %3778 = vrot.lane.b32.xlu1 %v3611_v15, %s5722_s24  ;;  %v2078_v19 = vld [vmem:[#allocation2 + $0x279] sm:$0xff] }
 0x3fa   :  { %v2605_v14 = vpop.permute.xlu0 %2604  ;;  %5535 = vmatprep.mubr.msk.bf16.mxu1 %vm4080_vm13, %v4033_v62 }
 0x3fb   :  { %2767 = vst.msk [vmem:[#allocation3 + $0xf0] sm:$0xff] %vm2736_vm9, %v2605_v14  ;;  %v2222_v45 = vpop.permute.xlu1 %2221  ;;  %v3984_v27 = vld [vmem:[#allocation3 + $0xd8] sm:$0xff]  ;;  %v2846_v14 = vld [vmem:[#allocation2 + $0x270] sm:$0xff] }
 0x3fc   :  { %2383 = vst.msk [vmem:[#allocation3 + $0xf8] sm:$0xff] %vm2351_vm8, %v2222_v45  ;;  %2624 = vrot.lane.b32.xlu0 %v3610_v51, %s5719_s19  ;;  %v4034_v33 = vpack.c.bf16 %v3984_v27, %v3983_v26  ;;  %v2848_v27 = vld [vmem:[#allocation2 + $0x288] sm:$0xff] }
 0x3fd   :  { %2241 = vrot.lane.b32.xlu1 %v3226_v6, %s5718_s18 }
 0x3fe   :  { %v2987_v48 = vpop.permute.xlu0 %2986  ;;  %5536 = vmatmul.mubr.msk.bf16.gmra.mrb[56].mxu1 %vm4080_vm13, %v4034_v33  ;;  %v2463_v33 = vld [vmem:[#allocation2 + $0x27a] sm:$0xff] }
 0x3ff   :  { %3151 = vst.msk [vmem:[#allocation3 + $0xe0] sm:$0xff] %vm3122_vm10, %v2987_v48  ;;  %v2603_v40 = vpop.permute.xlu1 %2602 }
 0x400   :  { %2766 = vst.msk [vmem:[#allocation3 + $0xe8] sm:$0xff] %vm2736_vm9, %v2603_v40  ;;  %2628 = vrot.lane.b32.xlu0 %v2458_v61, %s5719_s19 }
 0x401   :  { %2245 = vrot.lane.b32.xlu1 %v2074_v41, %s5718_s18 }
 0x402   :  { %v2991_v42 = vpop.permute.xlu0 %2990 }
 0x403   :  { %3153 = vst.msk [vmem:[#allocation3 + $0xf0] sm:$0xff] %vm3122_vm10, %v2991_v42  ;;  %v2607_v57 = vpop.permute.xlu1 %2606 }
 0x404   :  { %2768 = vst.msk [vmem:[#allocation3 + $0xf8] sm:$0xff] %vm2736_vm9, %v2607_v57  ;;  %3010 = vrot.lane.b32.xlu0 %v2842_v63, %s5720_s20 }
 0x405   :  { %2626 = vrot.lane.b32.xlu1 %v3611_v15, %s5719_s19 }
 0x406   :  { %v3372_v46 = vpop.permute.xlu0 %3371 }
 0x407   :  { %3536 = vst.msk [vmem:[#allocation3 + $0xe0] sm:$0xff] %vm3507_vm11, %v3372_v46  ;;  %v2989_v20 = vpop.permute.xlu1 %2988 }
 0x408   :  { %3152 = vst.msk [vmem:[#allocation3 + $0xe8] sm:$0xff] %vm3122_vm10, %v2989_v20  ;;  %3014 = vrot.lane.b32.xlu0 %v2844_v50, %s5720_s20  ;;  %v2847_v50 = vld [vmem:[#allocation2 + $0x278] sm:$0xff] }
 0x409   :  { %2630 = vrot.lane.b32.xlu1 %v2459_v22, %s5719_s19  ;;  %v5517_v44 = vpop.f32.mrb[36].mxu1 }
 0x40a   :  { %v4240_v49 = vadd.f32 %v5517_v44, %v7119_v8  ;;  %v3376_v5 = vpop.permute.xlu0 %3375  ;;  %v4231_v23 = vpop.f32.mrb[37].mxu1 }
 0x40b   :  { %3538 = vst.msk [vmem:[#allocation3 + $0xf0] sm:$0xff] %vm3507_vm11, %v3376_v5  ;;  %v4232_v25 = vadd.f32 %v7119_v8, %v4231_v23  ;;  %v2993_v28 = vpop.permute.xlu1 %2992  ;;  %v5518_v0 = vpop.f32.mrb[38].mxu1 }
 0x40c   :  { %3154 = vst.msk [vmem:[#allocation3 + $0xf8] sm:$0xff] %vm3122_vm10, %v2993_v28  ;;  %v4243_v43 = vadd.f32 %v5518_v0, %v7119_v8  ;;  %3395 = vrot.lane.b32.xlu0 %v2073_v47, %s5721_s21  ;;  %v4234_v56 = vpop.f32.mrb[39].mxu1  ;;  %v4476_v10 = vmax.f32 %v4240_v49, 0.0  ;;  %v3233_v0 = vld [vmem:[#allocation2 + $0x289] sm:$0xff] }
 0x40d   :  { %v4235_v37 = vadd.f32 %v7119_v8, %v4234_v56  ;;  %3012 = vrot.lane.b32.xlu1 %v2843_v54, %s5720_s20  ;;  %v4474_v12 = vmax.f32 %v4232_v25, 0.0  ;;  %v2849_v56 = vld [vmem:[#allocation2 + $0x290] sm:$0xff] }
 0x40e   :  { %v4477_v11 = vmax.f32 %v4243_v43, 0.0  ;;  %v3757_v59 = vpop.permute.xlu0 %3756 }
 0x40f   :  { %v4475_v13 = vmax.f32 %v4235_v37, 0.0  ;;  %3921 = vst.msk [vmem:[#allocation3 + $0xe0] sm:$0xff] %vm3892_vm12, %v3757_v59  ;;  %v3374_v35 = vpop.permute.xlu1 %3373 }
 0x410   :  { %v4537_v1 = vpack.c.bf16 %v4477_v11, %v4476_v10  ;;  %3537 = vst.msk [vmem:[#allocation3 + $0xe8] sm:$0xff] %vm3507_vm11, %v3374_v35  ;;  %3399 = vrot.lane.b32.xlu0 %v3229_v38, %s5721_s21 }
 0x411   :  { %v4536_v36 = vpack.c.bf16 %v4475_v13, %v4474_v12  ;;  %3016 = vrot.lane.b32.xlu1 %v2845_v29, %s5720_s20  ;;  %v3618_v12 = vld [vmem:[#allocation2 + $0x28a] sm:$0xff] }
 0x412   :  { %v3761_v2 = vpop.permute.xlu0 %3760  ;;  %v3234_v13 = vld [vmem:[#allocation2 + $0x291] sm:$0xff] }
 0x413   :  { %3923 = vst.msk [vmem:[#allocation3 + $0xf0] sm:$0xff] %vm3892_vm12, %v3761_v2  ;;  %v3378_v30 = vpop.permute.xlu1 %3377  ;;  %5581 = vmatprep.mubr.msk.bf16.mxu0 %vm604_vm0, %v4536_v36  ;;  %v2081_v36 = vld [vmem:[#allocation2 + $0x2a1] sm:$0xff] }
 0x414   :  { %3539 = vst.msk [vmem:[#allocation3 + $0xf8] sm:$0xff] %vm3507_vm11, %v3378_v30  ;;  %3780 = vrot.lane.b32.xlu0 %v2458_v61, %s5722_s24  ;;  %5582 = vmatmul.mubr.msk.bf16.gmra.mrb[36].mxu0 %vm604_vm0, %v4537_v1 }
 0x415   :  { %3397 = vrot.lane.b32.xlu1 %v2074_v41, %s5721_s21 }
 0x416   :  { %v2224_v34 = vpop.permute.xlu0 %2223  ;;  %v3985_v53 = vld [vmem:[#allocation3 + $0xe0] sm:$0xff] }
 0x417   :  { %2384 = vst.msk [vmem:[#allocation3 + $0x100] sm:$0xff] %vm2351_vm8, %v2224_v34  ;;  %v3759_v3 = vpop.permute.xlu1 %3758  ;;  %v3619_v34 = vld [vmem:[#allocation2 + $0x292] sm:$0xff] }
 0x418   :  { %3922 = vst.msk [vmem:[#allocation3 + $0xe8] sm:$0xff] %vm3892_vm12, %v3759_v3  ;;  %3784 = vrot.lane.b32.xlu0 %v3614_v31, %s5722_s24 }
 0x419   :  { %3401 = vrot.lane.b32.xlu1 %v3230_v39, %s5721_s21 }
 0x41a   :  { %v2228_v55 = vpop.permute.xlu0 %2227  ;;  %v3987_v51 = vld [vmem:[#allocation3 + $0xf0] sm:$0xff] }
 0x41b   :  { %2386 = vst.msk [vmem:[#allocation3 + $0x110] sm:$0xff] %vm2351_vm8, %v2228_v55  ;;  %v3763_v32 = vpop.permute.xlu1 %3762 }
 0x41c   :  { %3924 = vst.msk [vmem:[#allocation3 + $0xf8] sm:$0xff] %vm3892_vm12, %v3763_v32  ;;  %2247 = vrot.lane.b32.xlu0 %v3229_v38, %s5718_s18 }
 0x41d   :  { %3782 = vrot.lane.b32.xlu1 %v2459_v22, %s5722_s24 }
 0x41e   :  { %v2609_v52 = vpop.permute.xlu0 %2608 }
 0x41f   :  { %2769 = vst.msk [vmem:[#allocation3 + $0x100] sm:$0xff] %vm2736_vm9, %v2609_v52  ;;  %v2226_v21 = vpop.permute.xlu1 %2225  ;;  %v3986_v58 = vld [vmem:[#allocation3 + $0xe8] sm:$0xff] }
 0x420   :  { %2385 = vst.msk [vmem:[#allocation3 + $0x108] sm:$0xff] %vm2351_vm8, %v2226_v21  ;;  %2251 = vrot.lane.b32.xlu0 %v2077_v60, %s5718_s18  ;;  %v4035_v9 = vpack.c.bf16 %v3986_v58, %v3985_v53  ;;  %v2466_v53 = vld [vmem:[#allocation2 + $0x2a2] sm:$0xff] }
 0x421   :  { %3786 = vrot.lane.b32.xlu1 %v3615_v7, %s5722_s24  ;;  %v2082_v58 = vld [vmem:[#allocation2 + $0x2a9] sm:$0xff] }
 0x422   :  { %v2613_v6 = vpop.permute.xlu0 %2612  ;;  %5539 = vmatprep.mubr.msk.bf16.mxu1 %vm4080_vm13, %v4035_v9 }
 0x423   :  { %2771 = vst.msk [vmem:[#allocation3 + $0x110] sm:$0xff] %vm2736_vm9, %v2613_v6  ;;  %v2230_v16 = vpop.permute.xlu1 %2229  ;;  %v3988_v18 = vld [vmem:[#allocation3 + $0xf8] sm:$0xff] }
 0x424   :  { %2387 = vst.msk [vmem:[#allocation3 + $0x118] sm:$0xff] %vm2351_vm8, %v2230_v16  ;;  %2632 = vrot.lane.b32.xlu0 %v3614_v31, %s5719_s19  ;;  %v4036_v4 = vpack.c.bf16 %v3988_v18, %v3987_v51  ;;  %v2850_v51 = vld [vmem:[#allocation2 + $0x2a0] sm:$0xff]  ;;  %v2852_v18 = vld [vmem:[#allocation2 + $0x2b8] sm:$0xff] }
 0x425   :  { %2249 = vrot.lane.b32.xlu1 %v3230_v39, %s5718_s18 }
 0x426   :  { %v2995_v17 = vpop.permute.xlu0 %2994  ;;  %5540 = vmatmul.mubr.msk.bf16.gmra.mrb[60].mxu1 %vm4080_vm13, %v4036_v4  ;;  %v2467_v4 = vld [vmem:[#allocation2 + $0x2aa] sm:$0xff] }
 0x427   :  { %3155 = vst.msk [vmem:[#allocation3 + $0x100] sm:$0xff] %vm3122_vm10, %v2995_v17  ;;  %v2611_v47 = vpop.permute.xlu1 %2610 }
 0x428   :  { %2770 = vst.msk [vmem:[#allocation3 + $0x108] sm:$0xff] %vm2736_vm9, %v2611_v47  ;;  %2636 = vrot.lane.b32.xlu0 %v2462_v24, %s5719_s19 }
 0x429   :  { %2253 = vrot.lane.b32.xlu1 %v2078_v19, %s5718_s18 }
 0x42a   :  { %v2999_v15 = vpop.permute.xlu0 %2998 }
 0x42b   :  { %3157 = vst.msk [vmem:[#allocation3 + $0x110] sm:$0xff] %vm3122_vm10, %v2999_v15  ;;  %v2615_v62 = vpop.permute.xlu1 %2614 }
 0x42c   :  { %2772 = vst.msk [vmem:[#allocation3 + $0x118] sm:$0xff] %vm2736_vm9, %v2615_v62  ;;  %3018 = vrot.lane.b32.xlu0 %v2846_v14, %s5720_s20 }
 0x42d   :  { %2634 = vrot.lane.b32.xlu1 %v3615_v7, %s5719_s19 }
 0x42e   :  { %v3380_v45 = vpop.permute.xlu0 %3379 }
 0x42f   :  { %3540 = vst.msk [vmem:[#allocation3 + $0x100] sm:$0xff] %vm3507_vm11, %v3380_v45  ;;  %v2997_v26 = vpop.permute.xlu1 %2996 }
 0x430   :  { %3156 = vst.msk [vmem:[#allocation3 + $0x108] sm:$0xff] %vm3122_vm10, %v2997_v26  ;;  %3022 = vrot.lane.b32.xlu0 %v2848_v27, %s5720_s20  ;;  %v2851_v27 = vld [vmem:[#allocation2 + $0x2a8] sm:$0xff] }
 0x431   :  { %2638 = vrot.lane.b32.xlu1 %v2463_v33, %s5719_s19  ;;  %v5521_v48 = vpop.f32.mrb[40].mxu1 }
 0x432   :  { %v4256_v40 = vadd.f32 %v5521_v48, %v7119_v8  ;;  %v3384_v61 = vpop.permute.xlu0 %3383  ;;  %v4247_v41 = vpop.f32.mrb[41].mxu1 }
 0x433   :  { %3542 = vst.msk [vmem:[#allocation3 + $0x110] sm:$0xff] %vm3507_vm11, %v3384_v61  ;;  %v4248_v42 = vadd.f32 %v7119_v8, %v4247_v41  ;;  %v3001_v57 = vpop.permute.xlu1 %3000  ;;  %v5522_v63 = vpop.f32.mrb[42].mxu1 }
 0x434   :  { %3158 = vst.msk [vmem:[#allocation3 + $0x118] sm:$0xff] %vm3122_vm10, %v3001_v57  ;;  %v4259_v46 = vadd.f32 %v5522_v63, %v7119_v8  ;;  %3403 = vrot.lane.b32.xlu0 %v2077_v60, %s5721_s21  ;;  %v4250_v20 = vpop.f32.mrb[43].mxu1  ;;  %v4480_v44 = vmax.f32 %v4256_v40, 0.0  ;;  %v3237_v63 = vld [vmem:[#allocation2 + $0x2b9] sm:$0xff] }
 0x435   :  { %v4251_v22 = vadd.f32 %v7119_v8, %v4250_v20  ;;  %3020 = vrot.lane.b32.xlu1 %v2847_v50, %s5720_s20  ;;  %v4478_v23 = vmax.f32 %v4248_v42, 0.0  ;;  %v2853_v20 = vld [vmem:[#allocation2 + $0x2c0] sm:$0xff] }
 0x436   :  { %v4481_v49 = vmax.f32 %v4259_v46, 0.0  ;;  %v3765_v5 = vpop.permute.xlu0 %3764 }
 0x437   :  { %v4479_v25 = vmax.f32 %v4251_v22, 0.0  ;;  %3925 = vst.msk [vmem:[#allocation3 + $0x100] sm:$0xff] %vm3892_vm12, %v3765_v5  ;;  %v3382_v28 = vpop.permute.xlu1 %3381 }
 0x438   :  { %v4539_v43 = vpack.c.bf16 %v4481_v49, %v4480_v44  ;;  %3541 = vst.msk [vmem:[#allocation3 + $0x108] sm:$0xff] %vm3507_vm11, %v3382_v28  ;;  %3407 = vrot.lane.b32.xlu0 %v3233_v0, %s5721_s21 }
 0x439   :  { %v4538_v54 = vpack.c.bf16 %v4479_v25, %v4478_v23  ;;  %3024 = vrot.lane.b32.xlu1 %v2849_v56, %s5720_s20  ;;  %v3622_v23 = vld [vmem:[#allocation2 + $0x2ba] sm:$0xff] }
 0x43a   :  { %v3769_v37 = vpop.permute.xlu0 %3768  ;;  %v3238_v25 = vld [vmem:[#allocation2 + $0x2c1] sm:$0xff] }
 0x43b   :  { %3927 = vst.msk [vmem:[#allocation3 + $0x110] sm:$0xff] %vm3892_vm12, %v3769_v37  ;;  %v3386_v10 = vpop.permute.xlu1 %3385  ;;  %5585 = vmatprep.mubr.msk.bf16.mxu0 %vm604_vm0, %v4538_v54  ;;  %v2085_v54 = vld [vmem:[#allocation2 + $0x2d1] sm:$0xff] }
 0x43c   :  { %3543 = vst.msk [vmem:[#allocation3 + $0x118] sm:$0xff] %vm3507_vm11, %v3386_v10  ;;  %3788 = vrot.lane.b32.xlu0 %v2462_v24, %s5722_s24  ;;  %5586 = vmatmul.mubr.msk.bf16.gmra.mrb[40].mxu0 %vm604_vm0, %v4539_v43 }
 0x43d   :  { %3405 = vrot.lane.b32.xlu1 %v2078_v19, %s5721_s21 }
 0x43e   :  { %v2232_v11 = vpop.permute.xlu0 %2231  ;;  %v3989_v2 = vld [vmem:[#allocation3 + $0x100] sm:$0xff] }
 0x43f   :  { %2388 = vst.msk [vmem:[#allocation3 + $0x120] sm:$0xff] %vm2351_vm8, %v2232_v11  ;;  %v3767_v59 = vpop.permute.xlu1 %3766  ;;  %v3623_v11 = vld [vmem:[#allocation2 + $0x2c2] sm:$0xff] }
 0x440   :  { %3926 = vst.msk [vmem:[#allocation3 + $0x108] sm:$0xff] %vm3892_vm12, %v3767_v59  ;;  %3792 = vrot.lane.b32.xlu0 %v3618_v12, %s5722_s24 }
 0x441   :  { %3409 = vrot.lane.b32.xlu1 %v3234_v13, %s5721_s21 }
 0x442   :  { %v2236_v35 = vpop.permute.xlu0 %2235  ;;  %v3991_v55 = vld [vmem:[#allocation3 + $0x110] sm:$0xff] }
 0x443   :  { %2390 = vst.msk [vmem:[#allocation3 + $0x130] sm:$0xff] %vm2351_vm8, %v2236_v35  ;;  %v3771_v38 = vpop.permute.xlu1 %3770 }
 0x444   :  { %3928 = vst.msk [vmem:[#allocation3 + $0x118] sm:$0xff] %vm3892_vm12, %v3771_v38  ;;  %2255 = vrot.lane.b32.xlu0 %v3233_v0, %s5718_s18 }
 0x445   :  { %3790 = vrot.lane.b32.xlu1 %v2463_v33, %s5722_s24 }
 0x446   :  { %v2617_v1 = vpop.permute.xlu0 %2616 }
 0x447   :  { %2773 = vst.msk [vmem:[#allocation3 + $0x120] sm:$0xff] %vm2736_vm9, %v2617_v1  ;;  %v2234_v29 = vpop.permute.xlu1 %2233  ;;  %v3990_v30 = vld [vmem:[#allocation3 + $0x108] sm:$0xff] }
 0x448   :  { %2389 = vst.msk [vmem:[#allocation3 + $0x128] sm:$0xff] %vm2351_vm8, %v2234_v29  ;;  %2259 = vrot.lane.b32.xlu0 %v2081_v36, %s5718_s18  ;;  %v4037_v3 = vpack.c.bf16 %v3990_v30, %v3989_v2  ;;  %v2470_v2 = vld [vmem:[#allocation2 + $0x2d2] sm:$0xff] }
 0x449   :  { %3794 = vrot.lane.b32.xlu1 %v3619_v34, %s5722_s24  ;;  %v2086_v30 = vld [vmem:[#allocation2 + $0x2d9] sm:$0xff] }
 0x44a   :  { %v2621_v31 = vpop.permute.xlu0 %2620  ;;  %5543 = vmatprep.mubr.msk.bf16.mxu1 %vm4080_vm13, %v4037_v3 }
 0x44b   :  { %2775 = vst.msk [vmem:[#allocation3 + $0x130] sm:$0xff] %vm2736_vm9, %v2621_v31  ;;  %v2238_v39 = vpop.permute.xlu1 %2237  ;;  %v3992_v32 = vld [vmem:[#allocation3 + $0x118] sm:$0xff]  ;;  %v2854_v31 = vld [vmem:[#allocation2 + $0x2d0] sm:$0xff] }
 0x44c   :  { %2391 = vst.msk [vmem:[#allocation3 + $0x138] sm:$0xff] %vm2351_vm8, %v2238_v39  ;;  %2640 = vrot.lane.b32.xlu0 %v3618_v12, %s5719_s19  ;;  %v4038_v52 = vpack.c.bf16 %v3992_v32, %v3991_v55  ;;  %v2856_v32 = vld [vmem:[#allocation2 + $0x2e8] sm:$0xff] }
 0x44d   :  { %2257 = vrot.lane.b32.xlu1 %v3234_v13, %s5718_s18 }
 0x44e   :  { %v3003_v21 = vpop.permute.xlu0 %3002  ;;  %5544 = vmatmul.mubr.msk.bf16.gmra.mrb[64].mxu1 %vm4080_vm13, %v4038_v52  ;;  %v2471_v52 = vld [vmem:[#allocation2 + $0x2da] sm:$0xff] }
 0x44f   :  { %3159 = vst.msk [vmem:[#allocation3 + $0x120] sm:$0xff] %vm3122_vm10, %v3003_v21  ;;  %v2619_v60 = vpop.permute.xlu1 %2618 }
 0x450   :  { %2774 = vst.msk [vmem:[#allocation3 + $0x128] sm:$0xff] %vm2736_vm9, %v2619_v60  ;;  %2644 = vrot.lane.b32.xlu0 %v2466_v53, %s5719_s19 }
 0x451   :  { %2261 = vrot.lane.b32.xlu1 %v2082_v58, %s5718_s18 }
 0x452   :  { %v3007_v7 = vpop.permute.xlu0 %3006 }
 0x453   :  { %3161 = vst.msk [vmem:[#allocation3 + $0x130] sm:$0xff] %vm3122_vm10, %v3007_v7  ;;  %v2623_v9 = vpop.permute.xlu1 %2622 }
 0x454   :  { %2776 = vst.msk [vmem:[#allocation3 + $0x138] sm:$0xff] %vm2736_vm9, %v2623_v9  ;;  %3026 = vrot.lane.b32.xlu0 %v2850_v51, %s5720_s20 }
 0x455   :  { %2642 = vrot.lane.b32.xlu1 %v3619_v34, %s5719_s19 }
 0x456   :  { %v3388_v6 = vpop.permute.xlu0 %3387 }
 0x457   :  { %3544 = vst.msk [vmem:[#allocation3 + $0x120] sm:$0xff] %vm3507_vm11, %v3388_v6  ;;  %v3005_v16 = vpop.permute.xlu1 %3004 }
 0x458   :  { %3160 = vst.msk [vmem:[#allocation3 + $0x128] sm:$0xff] %vm3122_vm10, %v3005_v16  ;;  %3030 = vrot.lane.b32.xlu0 %v2852_v18, %s5720_s20  ;;  %v2855_v18 = vld [vmem:[#allocation2 + $0x2d8] sm:$0xff] }
 0x459   :  { %2646 = vrot.lane.b32.xlu1 %v2467_v4, %s5719_s19  ;;  %v5525_v17 = vpop.f32.mrb[44].mxu1 }
 0x45a   :  { %v4272_v47 = vadd.f32 %v5525_v17, %v7119_v8  ;;  %v3392_v24 = vpop.permute.xlu0 %3391  ;;  %v4263_v19 = vpop.f32.mrb[45].mxu1 }
 0x45b   :  { %3546 = vst.msk [vmem:[#allocation3 + $0x130] sm:$0xff] %vm3507_vm11, %v3392_v24  ;;  %v4264_v15 = vadd.f32 %v7119_v8, %v4263_v19  ;;  %v3009_v62 = vpop.permute.xlu1 %3008  ;;  %v5526_v14 = vpop.f32.mrb[46].mxu1 }
 0x45c   :  { %3162 = vst.msk [vmem:[#allocation3 + $0x138] sm:$0xff] %vm3122_vm10, %v3009_v62  ;;  %v4275_v45 = vadd.f32 %v5526_v14, %v7119_v8  ;;  %3411 = vrot.lane.b32.xlu0 %v2081_v36, %s5721_s21  ;;  %v4266_v26 = vpop.f32.mrb[47].mxu1  ;;  %v4484_v48 = vmax.f32 %v4272_v47, 0.0  ;;  %v3241_v14 = vld [vmem:[#allocation2 + $0x2e9] sm:$0xff] }
 0x45d   :  { %v4267_v33 = vadd.f32 %v7119_v8, %v4266_v26  ;;  %3028 = vrot.lane.b32.xlu1 %v2851_v27, %s5720_s20  ;;  %v4482_v41 = vmax.f32 %v4264_v15, 0.0  ;;  %v2857_v26 = vld [vmem:[#allocation2 + $0x2f0] sm:$0xff] }
 0x45e   :  { %v4485_v40 = vmax.f32 %v4275_v45, 0.0  ;;  %v3773_v61 = vpop.permute.xlu0 %3772 }
 0x45f   :  { %v4483_v42 = vmax.f32 %v4267_v33, 0.0  ;;  %3929 = vst.msk [vmem:[#allocation3 + $0x120] sm:$0xff] %vm3892_vm12, %v3773_v61  ;;  %v3390_v57 = vpop.permute.xlu1 %3389 }
 0x460   :  { %v4541_v46 = vpack.c.bf16 %v4485_v40, %v4484_v48  ;;  %3545 = vst.msk [vmem:[#allocation3 + $0x128] sm:$0xff] %vm3507_vm11, %v3390_v57  ;;  %3415 = vrot.lane.b32.xlu0 %v3237_v63, %s5721_s21 }
 0x461   :  { %v4540_v50 = vpack.c.bf16 %v4483_v42, %v4482_v41  ;;  %3032 = vrot.lane.b32.xlu1 %v2853_v20, %s5720_s20  ;;  %v3626_v41 = vld [vmem:[#allocation2 + $0x2ea] sm:$0xff] }
 0x462   :  { %v3777_v22 = vpop.permute.xlu0 %3776  ;;  %v3242_v42 = vld [vmem:[#allocation2 + $0x2f1] sm:$0xff] }
 0x463   :  { %3931 = vst.msk [vmem:[#allocation3 + $0x130] sm:$0xff] %vm3892_vm12, %v3777_v22  ;;  %v3394_v44 = vpop.permute.xlu1 %3393  ;;  %5589 = vmatprep.mubr.msk.bf16.mxu0 %vm604_vm0, %v4540_v50  ;;  %v2089_v50 = vld [vmem:[#allocation2 + $0x301] sm:$0xff] }
 0x464   :  { %3547 = vst.msk [vmem:[#allocation3 + $0x138] sm:$0xff] %vm3507_vm11, %v3394_v44  ;;  %3796 = vrot.lane.b32.xlu0 %v2466_v53, %s5722_s24  ;;  %5590 = vmatmul.mubr.msk.bf16.gmra.mrb[44].mxu0 %vm604_vm0, %v4541_v46 }
 0x465   :  { %3413 = vrot.lane.b32.xlu1 %v2082_v58, %s5721_s21 }
 0x466   :  { %v2240_v49 = vpop.permute.xlu0 %2239  ;;  %v3993_v37 = vld [vmem:[#allocation3 + $0x120] sm:$0xff] }
 0x467   :  { %2392 = vst.msk [vmem:[#allocation3 + $0x140] sm:$0xff] %vm2351_vm8, %v2240_v49  ;;  %v3775_v5 = vpop.permute.xlu1 %3774  ;;  %v3627_v49 = vld [vmem:[#allocation2 + $0x2f2] sm:$0xff] }
 0x468   :  { %3930 = vst.msk [vmem:[#allocation3 + $0x128] sm:$0xff] %vm3892_vm12, %v3775_v5  ;;  %3800 = vrot.lane.b32.xlu0 %v3622_v23, %s5722_s24 }
 0x469   :  { %3417 = vrot.lane.b32.xlu1 %v3238_v25, %s5721_s21 }
 0x46a   :  { %v2244_v28 = vpop.permute.xlu0 %2243  ;;  %v3995_v35 = vld [vmem:[#allocation3 + $0x130] sm:$0xff] }
 0x46b   :  { %2394 = vst.msk [vmem:[#allocation3 + $0x150] sm:$0xff] %vm2351_vm8, %v2244_v28  ;;  %v3779_v0 = vpop.permute.xlu1 %3778 }
 0x46c   :  { %3932 = vst.msk [vmem:[#allocation3 + $0x138] sm:$0xff] %vm3892_vm12, %v3779_v0  ;;  %2263 = vrot.lane.b32.xlu0 %v3237_v63, %s5718_s18 }
 0x46d   :  { %3798 = vrot.lane.b32.xlu1 %v2467_v4, %s5722_s24 }
 0x46e   :  { %v2625_v43 = vpop.permute.xlu0 %2624 }
 0x46f   :  { %2777 = vst.msk [vmem:[#allocation3 + $0x140] sm:$0xff] %vm2736_vm9, %v2625_v43  ;;  %v2242_v56 = vpop.permute.xlu1 %2241  ;;  %v3994_v10 = vld [vmem:[#allocation3 + $0x128] sm:$0xff] }
 0x470   :  { %2393 = vst.msk [vmem:[#allocation3 + $0x148] sm:$0xff] %vm2351_vm8, %v2242_v56  ;;  %2267 = vrot.lane.b32.xlu0 %v2085_v54, %s5718_s18  ;;  %v4039_v59 = vpack.c.bf16 %v3994_v10, %v3993_v37  ;;  %v2474_v37 = vld [vmem:[#allocation2 + $0x302] sm:$0xff] }
 0x471   :  { %3802 = vrot.lane.b32.xlu1 %v3623_v11, %s5722_s24  ;;  %v2090_v10 = vld [vmem:[#allocation2 + $0x309] sm:$0xff] }
 0x472   :  { %v2629_v12 = vpop.permute.xlu0 %2628  ;;  %5547 = vmatprep.mubr.msk.bf16.mxu1 %vm4080_vm13, %v4039_v59 }
 0x473   :  { %2779 = vst.msk [vmem:[#allocation3 + $0x150] sm:$0xff] %vm2736_vm9, %v2629_v12  ;;  %v2246_v13 = vpop.permute.xlu1 %2245  ;;  %v3996_v38 = vld [vmem:[#allocation3 + $0x138] sm:$0xff]  ;;  %v2858_v12 = vld [vmem:[#allocation2 + $0x300] sm:$0xff] }
 0x474   :  { %2395 = vst.msk [vmem:[#allocation3 + $0x158] sm:$0xff] %vm2351_vm8, %v2246_v13  ;;  %2648 = vrot.lane.b32.xlu0 %v3622_v23, %s5719_s19  ;;  %v4040_v1 = vpack.c.bf16 %v3996_v38, %v3995_v35  ;;  %v2860_v38 = vld [vmem:[#allocation2 + $0x318] sm:$0xff] }
 0x475   :  { %2265 = vrot.lane.b32.xlu1 %v3238_v25, %s5718_s18 }
 0x476   :  { %v3011_v29 = vpop.permute.xlu0 %3010  ;;  %5548 = vmatmul.mubr.msk.bf16.gmra.mrb[68].mxu1 %vm4080_vm13, %v4040_v1  ;;  %v2475_v1 = vld [vmem:[#allocation2 + $0x30a] sm:$0xff] }
 0x477   :  { %3163 = vst.msk [vmem:[#allocation3 + $0x140] sm:$0xff] %vm3122_vm10, %v3011_v29  ;;  %v2627_v36 = vpop.permute.xlu1 %2626 }
 0x478   :  { %2778 = vst.msk [vmem:[#allocation3 + $0x148] sm:$0xff] %vm2736_vm9, %v2627_v36  ;;  %2652 = vrot.lane.b32.xlu0 %v2470_v2, %s5719_s19 }
 0x479   :  { %2269 = vrot.lane.b32.xlu1 %v2086_v30, %s5718_s18 }
 0x47a   :  { %v3015_v34 = vpop.permute.xlu0 %3014 }
 0x47b   :  { %3165 = vst.msk [vmem:[#allocation3 + $0x150] sm:$0xff] %vm3122_vm10, %v3015_v34  ;;  %v2631_v3 = vpop.permute.xlu1 %2630 }
 0x47c   :  { %2780 = vst.msk [vmem:[#allocation3 + $0x158] sm:$0xff] %vm2736_vm9, %v2631_v3  ;;  %3034 = vrot.lane.b32.xlu0 %v2854_v31, %s5720_s20 }
 0x47d   :  { %2650 = vrot.lane.b32.xlu1 %v3623_v11, %s5719_s19 }
 0x47e   :  { %v3396_v39 = vpop.permute.xlu0 %3395 }
 0x47f   :  { %3548 = vst.msk [vmem:[#allocation3 + $0x140] sm:$0xff] %vm3507_vm11, %v3396_v39  ;;  %v3013_v55 = vpop.permute.xlu1 %3012 }
 0x480   :  { %3164 = vst.msk [vmem:[#allocation3 + $0x148] sm:$0xff] %vm3122_vm10, %v3013_v55  ;;  %3038 = vrot.lane.b32.xlu0 %v2856_v32, %s5720_s20  ;;  %v2859_v32 = vld [vmem:[#allocation2 + $0x308] sm:$0xff] }
 0x481   :  { %2654 = vrot.lane.b32.xlu1 %v2471_v52, %s5719_s19  ;;  %v5529_v21 = vpop.f32.mrb[48].mxu1 }
 0x482   :  { %v4288_v60 = vadd.f32 %v5529_v21, %v7119_v8  ;;  %v3400_v53 = vpop.permute.xlu0 %3399  ;;  %v4279_v58 = vpop.f32.mrb[49].mxu1 }
 0x483   :  { %3550 = vst.msk [vmem:[#allocation3 + $0x150] sm:$0xff] %vm3507_vm11, %v3400_v53  ;;  %v4280_v7 = vadd.f32 %v7119_v8, %v4279_v58  ;;  %v3017_v9 = vpop.permute.xlu1 %3016  ;;  %v5530_v51 = vpop.f32.mrb[50].mxu1 }
 0x484   :  { %3166 = vst.msk [vmem:[#allocation3 + $0x158] sm:$0xff] %vm3122_vm10, %v3017_v9  ;;  %v4291_v6 = vadd.f32 %v5530_v51, %v7119_v8  ;;  %3419 = vrot.lane.b32.xlu0 %v2085_v54, %s5721_s21  ;;  %v4282_v16 = vpop.f32.mrb[51].mxu1  ;;  %v4488_v17 = vmax.f32 %v4288_v60, 0.0  ;;  %v3245_v51 = vld [vmem:[#allocation2 + $0x319] sm:$0xff] }
 0x485   :  { %v4283_v4 = vadd.f32 %v7119_v8, %v4282_v16  ;;  %3036 = vrot.lane.b32.xlu1 %v2855_v18, %s5720_s20  ;;  %v4486_v19 = vmax.f32 %v4280_v7, 0.0  ;;  %v2861_v16 = vld [vmem:[#allocation2 + $0x320] sm:$0xff] }
 0x486   :  { %v4489_v47 = vmax.f32 %v4291_v6, 0.0  ;;  %v3781_v24 = vpop.permute.xlu0 %3780 }
 0x487   :  { %v4487_v15 = vmax.f32 %v4283_v4, 0.0  ;;  %3933 = vst.msk [vmem:[#allocation3 + $0x140] sm:$0xff] %vm3892_vm12, %v3781_v24  ;;  %v3398_v62 = vpop.permute.xlu1 %3397  ;;  %v3630_v24 = vld [vmem:[#allocation2 + $0x31a] sm:$0xff] }
 0x488   :  { %v4543_v45 = vpack.c.bf16 %v4489_v47, %v4488_v17  ;;  %3549 = vst.msk [vmem:[#allocation3 + $0x148] sm:$0xff] %vm3507_vm11, %v3398_v62  ;;  %3423 = vrot.lane.b32.xlu0 %v3241_v14, %s5721_s21 }
 0x489   :  { %v4542_v27 = vpack.c.bf16 %v4487_v15, %v4486_v19  ;;  %3040 = vrot.lane.b32.xlu1 %v2857_v26, %s5720_s20  ;;  %v3246_v19 = vld [vmem:[#allocation2 + $0x321] sm:$0xff]  ;;  %v7395_v26 = vld [vmem:[#allocation2 + $0x331] sm:$0xff] }
 0x48a   :  { %v3785_v33 = vpop.permute.xlu0 %3784 }
 0x48b   :  { %3935 = vst.msk [vmem:[#allocation3 + $0x150] sm:$0xff] %vm3892_vm12, %v3785_v33  ;;  %v3402_v48 = vpop.permute.xlu1 %3401  ;;  %5593 = vmatprep.mubr.msk.bf16.mxu0 %vm604_vm0, %v4542_v27  ;;  %v4569_v33 = vld [vmem:[#allocation4 + $0x10] sm:$0xff] }
 0x48c   :  { %3551 = vst.msk [vmem:[#allocation3 + $0x158] sm:$0xff] %vm3507_vm11, %v3402_v48  ;;  %3804 = vrot.lane.b32.xlu0 %v2470_v2, %s5722_s24  ;;  %5594 = vmatmul.mubr.msk.bf16.gmra.mrb[48].mxu0 %vm604_vm0, %v4543_v45 }
 0x48d   :  { %3421 = vrot.lane.b32.xlu1 %v2086_v30, %s5721_s21 }
 0x48e   :  { %v2248_v40 = vpop.permute.xlu0 %2247  ;;  %v3997_v22 = vld [vmem:[#allocation3 + $0x140] sm:$0xff] }
 0x48f   :  { %2396 = vst.msk [vmem:[#allocation3 + $0x160] sm:$0xff] %vm2351_vm8, %v2248_v40  ;;  %v3783_v61 = vpop.permute.xlu1 %3782 }
 0x490   :  { %3934 = vst.msk [vmem:[#allocation3 + $0x148] sm:$0xff] %vm3892_vm12, %v3783_v61  ;;  %3808 = vrot.lane.b32.xlu0 %v3626_v41, %s5722_s24 }
 0x491   :  { %3425 = vrot.lane.b32.xlu1 %v3242_v42, %s5721_s21 }
 0x492   :  { %v2252_v57 = vpop.permute.xlu0 %2251  ;;  %v3999_v28 = vld [vmem:[#allocation3 + $0x150] sm:$0xff] }
 0x493   :  { %2398 = vst.msk [vmem:[#allocation3 + $0x170] sm:$0xff] %vm2351_vm8, %v2252_v57  ;;  %v3787_v63 = vpop.permute.xlu1 %3786 }
 0x494   :  { %3936 = vst.msk [vmem:[#allocation3 + $0x158] sm:$0xff] %vm3892_vm12, %v3787_v63  ;;  %2271 = vrot.lane.b32.xlu0 %v3241_v14, %s5718_s18  ;;  %v7393_v14 = vld [vmem:[%s7725_s6] ss:$0 sm:$0xff]  ;;  %v3631_v63 = vld [vmem:[#allocation2 + $0x322] sm:$0xff] }
 0x495   :  { %3806 = vrot.lane.b32.xlu1 %v2471_v52, %s5722_s24 }
 0x496   :  { %v2633_v46 = vpop.permute.xlu0 %2632 }
 0x497   :  { %2781 = vst.msk [vmem:[#allocation3 + $0x160] sm:$0xff] %vm2736_vm9, %v2633_v46  ;;  %v2250_v20 = vpop.permute.xlu1 %2249  ;;  %v3998_v44 = vld [vmem:[#allocation3 + $0x148] sm:$0xff] }
 0x498   :  { %2397 = vst.msk [vmem:[#allocation3 + $0x168] sm:$0xff] %vm2351_vm8, %v2250_v20  ;;  %2275 = vrot.lane.b32.xlu0 %v2089_v50, %s5718_s18  ;;  %v4041_v5 = vpack.c.bf16 %v3998_v44, %v3997_v22 }
 0x499   :  { %3810 = vrot.lane.b32.xlu1 %v3627_v49, %s5722_s24 }
 0x49a   :  { %v2637_v23 = vpop.permute.xlu0 %2636  ;;  %5551 = vmatprep.mubr.msk.bf16.mxu1 %vm4080_vm13, %v4041_v5 }
 0x49b   :  { %2783 = vst.msk [vmem:[#allocation3 + $0x170] sm:$0xff] %vm2736_vm9, %v2637_v23  ;;  %v2254_v25 = vpop.permute.xlu1 %2253  ;;  %v4000_v0 = vld [vmem:[#allocation3 + $0x158] sm:$0xff]  ;;  %v4568_v23 = vld [vmem:[#allocation4 + $0x8] sm:$0xff] }
 0x49c   :  { %2399 = vst.msk [vmem:[#allocation3 + $0x178] sm:$0xff] %vm2351_vm8, %v2254_v25  ;;  %2656 = vrot.lane.b32.xlu0 %v3626_v41, %s5719_s19  ;;  %v4042_v43 = vpack.c.bf16 %v4000_v0, %v3999_v28 }
 0x49d   :  { %2273 = vrot.lane.b32.xlu1 %v3242_v42, %s5718_s18  ;;  %v4567_v42 = vld [vmem:[#allocation4] sm:$0xff] }
 0x49e   :  { %v3019_v56 = vpop.permute.xlu0 %3018  ;;  %5552 = vmatmul.mubr.msk.bf16.gmra.mrb[72].mxu1 %vm4080_vm13, %v4042_v43 }
 0x49f   :  { %3167 = vst.msk [vmem:[#allocation3 + $0x160] sm:$0xff] %vm3122_vm10, %v3019_v56  ;;  %v2635_v54 = vpop.permute.xlu1 %2634 }
 0x4a0   :  { %2782 = vst.msk [vmem:[#allocation3 + $0x168] sm:$0xff] %vm2736_vm9, %v2635_v54  ;;  %2660 = vrot.lane.b32.xlu0 %v2474_v37, %s5719_s19 }
 0x4a1   :  { %2277 = vrot.lane.b32.xlu1 %v2090_v10, %s5718_s18 }
 0x4a2   :  { %v3023_v11 = vpop.permute.xlu0 %3022 }
 0x4a3   :  { %3169 = vst.msk [vmem:[#allocation3 + $0x170] sm:$0xff] %vm3122_vm10, %v3023_v11  ;;  %v2639_v59 = vpop.permute.xlu1 %2638 }
 0x4a4   :  { %2784 = vst.msk [vmem:[#allocation3 + $0x178] sm:$0xff] %vm2736_vm9, %v2639_v59  ;;  %3042 = vrot.lane.b32.xlu0 %v2858_v12, %s5720_s20 }
 0x4a5   :  { %2658 = vrot.lane.b32.xlu1 %v3627_v49, %s5719_s19 }
 0x4a6   :  { %v3404_v13 = vpop.permute.xlu0 %3403 }
 0x4a7   :  { %3552 = vst.msk [vmem:[#allocation3 + $0x160] sm:$0xff] %vm3507_vm11, %v3404_v13  ;;  %v3021_v35 = vpop.permute.xlu1 %3020 }
 0x4a8   :  { %3168 = vst.msk [vmem:[#allocation3 + $0x168] sm:$0xff] %vm3122_vm10, %v3021_v35  ;;  %3046 = vrot.lane.b32.xlu0 %v2860_v38, %s5720_s20 }
 0x4a9   :  { %2662 = vrot.lane.b32.xlu1 %v2475_v1, %s5719_s19  ;;  %v5533_v29 = vpop.f32.mrb[52].mxu1 }
 0x4aa   :  { %v4304_v36 = vadd.f32 %v5533_v29, %v7119_v8  ;;  %v3408_v2 = vpop.permute.xlu0 %3407  ;;  %v4295_v30 = vpop.f32.mrb[53].mxu1  ;;  %v2478_v29 = vld [vmem:[#allocation2 + $0x332] sm:$0xff] }
 0x4ab   :  { %3554 = vst.msk [vmem:[#allocation3 + $0x170] sm:$0xff] %vm3507_vm11, %v3408_v2  ;;  %v4296_v34 = vadd.f32 %v7119_v8, %v4295_v30  ;;  %v3025_v3 = vpop.permute.xlu1 %3024  ;;  %v5534_v31 = vpop.f32.mrb[54].mxu1 }
 0x4ac   :  { %3170 = vst.msk [vmem:[#allocation3 + $0x178] sm:$0xff] %vm3122_vm10, %v3025_v3  ;;  %v4307_v39 = vadd.f32 %v5534_v31, %v7119_v8  ;;  %3427 = vrot.lane.b32.xlu0 %v2089_v50, %s5721_s21  ;;  %v4298_v55 = vpop.f32.mrb[55].mxu1  ;;  %v4492_v21 = vmax.f32 %v4304_v36, 0.0  ;;  %v4570_v50 = vld [vmem:[#allocation4 + $0x18] sm:$0xff]  ;;  %v2864_v3 = vld [vmem:[#allocation2 + $0x348] sm:$0xff] }
 0x4ad   :  { %v4299_v52 = vadd.f32 %v7119_v8, %v4298_v55  ;;  %3044 = vrot.lane.b32.xlu1 %v2859_v32, %s5720_s20  ;;  %v4490_v58 = vmax.f32 %v4296_v34, 0.0  ;;  %v2094_v36 = vld [vmem:[#allocation2 + $0x339] sm:$0xff]  ;;  %v2862_v34 = vld [vmem:[#allocation2 + $0x330] sm:$0xff] }
 0x4ae   :  { %v4493_v60 = vmax.f32 %v4307_v39, 0.0  ;;  %v3789_v53 = vpop.permute.xlu0 %3788  ;;  %v2479_v55 = vld [vmem:[#allocation2 + $0x33a] sm:$0xff] }
 0x4af   :  { %v4491_v7 = vmax.f32 %v4299_v52, 0.0  ;;  %3937 = vst.msk [vmem:[#allocation3 + $0x160] sm:$0xff] %vm3892_vm12, %v3789_v53  ;;  %v3406_v9 = vpop.permute.xlu1 %3405  ;;  %v7431_v52 = vld [vmem:[%s7723_s4] ss:$0 sm:$0xff] }
 0x4b0   :  { %v4545_v6 = vpack.c.bf16 %v4493_v60, %v4492_v21  ;;  %3553 = vst.msk [vmem:[#allocation3 + $0x168] sm:$0xff] %vm3507_vm11, %v3406_v9  ;;  %3431 = vrot.lane.b32.xlu0 %v3245_v51, %s5721_s21 }
 0x4b1   :  { %v4544_v18 = vpack.c.bf16 %v4491_v7, %v4490_v58  ;;  %3048 = vrot.lane.b32.xlu1 %v2861_v16, %s5720_s20  ;;  %v2863_v16 = vld [vmem:[#allocation2 + $0x338] sm:$0xff] }
 0x4b2   :  { %v3793_v8 = vpop.permute.xlu0 %3792 }
 0x4b3   :  { %3939 = vst.msk [vmem:[#allocation3 + $0x170] sm:$0xff] %vm3892_vm12, %v3793_v8  ;;  %v3410_v4 = vpop.permute.xlu1 %3409  ;;  %5597 = vmatprep.mubr.msk.bf16.mxu0 %vm604_vm0, %v4544_v18  ;;  %v3249_v8 = vld [vmem:[#allocation2 + $0x349] sm:$0xff] }
 0x4b4   :  { %3555 = vst.msk [vmem:[#allocation3 + $0x178] sm:$0xff] %vm3507_vm11, %v3410_v4  ;;  %3812 = vrot.lane.b32.xlu0 %v2474_v37, %s5722_s24  ;;  %5598 = vmatmul.mubr.msk.bf16.gmra.mrb[52].mxu0 %vm604_vm0, %v4545_v6 }
 0x4b5   :  { %3429 = vrot.lane.b32.xlu1 %v2090_v10, %s5721_s21 }
 0x4b6   :  { %v2256_v17 = vpop.permute.xlu0 %2255  ;;  %v4001_v40 = vld [vmem:[#allocation3 + $0x160] sm:$0xff] }
 0x4b7   :  { %2400 = vst.msk [vmem:[#allocation3 + $0x180] sm:$0xff] %vm2351_vm8, %v2256_v17  ;;  %v3791_v47 = vpop.permute.xlu1 %3790 }
 0x4b8   :  { %3938 = vst.msk [vmem:[#allocation3 + $0x168] sm:$0xff] %vm3892_vm12, %v3791_v47  ;;  %3816 = vrot.lane.b32.xlu0 %v3630_v24, %s5722_s24 }
 0x4b9   :  { %3433 = vrot.lane.b32.xlu1 %v3246_v19, %s5721_s21 }
 0x4ba   :  { %v2260_v15 = vpop.permute.xlu0 %2259  ;;  %v4003_v56 = vld [vmem:[#allocation3 + $0x170] sm:$0xff] }
 0x4bb   :  { %2402 = vst.msk [vmem:[#allocation3 + $0x190] sm:$0xff] %vm2351_vm8, %v2260_v15  ;;  %v3795_v62 = vpop.permute.xlu1 %3794 }
 0x4bc   :  { %3940 = vst.msk [vmem:[#allocation3 + $0x178] sm:$0xff] %vm3892_vm12, %v3795_v62  ;;  %2279 = vrot.lane.b32.xlu0 %v3245_v51, %s5718_s18 }
 0x4bd   :  { %3814 = vrot.lane.b32.xlu1 %v2475_v1, %s5722_s24 }
 0x4be   :  { %v2641_v45 = vpop.permute.xlu0 %2640 }
 0x4bf   :  { %2785 = vst.msk [vmem:[#allocation3 + $0x180] sm:$0xff] %vm2736_vm9, %v2641_v45  ;;  %v2258_v27 = vpop.permute.xlu1 %2257  ;;  %v5579_v48 = vpop.f32.mrb[32].mxu0  ;;  %v4002_v61 = vld [vmem:[#allocation3 + $0x168] sm:$0xff] }
 0x4c0   :  { %2401 = vst.msk [vmem:[#allocation3 + $0x188] sm:$0xff] %vm2351_vm8, %v2258_v27  ;;  %v4780_v41 = vadd.f32 %v5579_v48, %v7393_v14  ;;  %2283 = vrot.lane.b32.xlu0 %v7395_v26, %s5718_s18  ;;  %v4771_v57 = vpop.f32.mrb[33].mxu0  ;;  %v4043_v46 = vpack.c.bf16 %v4002_v61, %v4001_v40  ;;  %v3634_v48 = vld [vmem:[#allocation2 + $0x34a] sm:$0xff] }
 0x4c1   :  { %v4772_v20 = vadd.f32 %v7393_v14, %v4771_v57  ;;  %3818 = vrot.lane.b32.xlu1 %v3631_v63, %s5722_s24  ;;  %v5580_v22 = vpop.f32.mrb[34].mxu0  ;;  %v3250_v61 = vld [vmem:[#allocation2 + $0x351] sm:$0xff] }
 0x4c2   :  { %v5028_v44 = vadd.f32 %v4780_v41, %v4569_v33  ;;  %v4783_v49 = vadd.f32 %v5580_v22, %v7393_v14  ;;  %v2645_v5 = vpop.permute.xlu0 %2644  ;;  %5555 = vmatprep.mubr.msk.bf16.mxu1 %vm4080_vm13, %v4043_v46  ;;  %v4774_v25 = vpop.f32.mrb[35].mxu0  ;;  %v3635_v46 = vld [vmem:[#allocation2 + $0x352] sm:$0xff] }
 0x4c3   :  { %v5026_v28 = vadd.f32 %v4772_v20, %v4567_v42  ;;  %2787 = vst.msk [vmem:[#allocation3 + $0x190] sm:$0xff] %vm2736_vm9, %v2645_v5  ;;  %v4775_v0 = vadd.f32 %v7393_v14, %v4774_v25  ;;  %v2262_v43 = vpop.permute.xlu1 %2261  ;;  %v4004_v54 = vld [vmem:[#allocation3 + $0x178] sm:$0xff] }
 0x4c4   :  { %v5092_v37 = vmax.f32 %v5028_v44, 0.0  ;;  %v5029_v10 = vadd.f32 %v4783_v49, %v4570_v50  ;;  %2403 = vst.msk [vmem:[#allocation3 + $0x198] sm:$0xff] %vm2351_vm8, %v2262_v43  ;;  %2664 = vrot.lane.b32.xlu0 %v3630_v24, %s5719_s19  ;;  %v4044_v11 = vpack.c.bf16 %v4004_v54, %v4003_v56  ;;  %v2865_v24 = vld [vmem:[#allocation2 + $0x350] sm:$0xff]  ;;  %v4574_v43 = vld [vmem:[#allocation4 + $0x38] sm:$0xff] }
 0x4c5   :  { %v5090_v59 = vmax.f32 %v5026_v28, 0.0  ;;  %v5027_v12 = vadd.f32 %v4775_v0, %v4568_v23  ;;  %2281 = vrot.lane.b32.xlu1 %v3246_v19, %s5718_s18  ;;  %v4573_v50 = vld [vmem:[#allocation4 + $0x30] sm:$0xff]  ;;  %v4571_v23 = vld [vmem:[#allocation4 + $0x20] sm:$0xff] }
 0x4c6   :  { %5156 = vst.msk [vmem:[#allocation7 + $0x10] sm:$0xff] %vm153_vm2, %v5092_v37  ;;  %v5093_v13 = vmax.f32 %v5029_v10, 0.0  ;;  %v3027_v35 = vpop.permute.xlu0 %3026  ;;  %5556 = vmatmul.mubr.msk.bf16.gmra.mrb[76].mxu1 %vm4080_vm13, %v4044_v11  ;;  %v4572_v11 = vld [vmem:[#allocation4 + $0x28] sm:$0xff] }
 0x4c7   :  { %5154 = vst.msk [vmem:[#allocation7] sm:$0xff] %vm153_vm2, %v5090_v59  ;;  %v5091_v38 = vmax.f32 %v5027_v12, 0.0  ;;  %v2643_v1 = vpop.permute.xlu1 %2642 }
 0x4c8   :  { %3171 = vst.msk [vmem:[#allocation3 + $0x180] sm:$0xff] %vm3122_vm10, %v3027_v35  ;;  %2668 = vrot.lane.b32.xlu0 %v2478_v29, %s5719_s19 }
 0x4c9   :  { %5157 = vst.msk [vmem:[#allocation7 + $0x18] sm:$0xff] %vm153_vm2, %v5093_v13  ;;  %5155 = vst.msk [vmem:[#allocation7 + $0x8] sm:$0xff] %vm153_vm2, %v5091_v38  ;;  %2285 = vrot.lane.b32.xlu1 %v2094_v36, %s5718_s18 }
 0x4ca   :  { %2786 = vst.msk [vmem:[#allocation3 + $0x188] sm:$0xff] %vm2736_vm9, %v2643_v1  ;;  %v3031_v2 = vpop.permute.xlu0 %3030 }
 0x4cb   :  { %3173 = vst.msk [vmem:[#allocation3 + $0x190] sm:$0xff] %vm3122_vm10, %v3031_v2  ;;  %v2647_v30 = vpop.permute.xlu1 %2646 }
 0x4cc   :  { %2788 = vst.msk [vmem:[#allocation3 + $0x198] sm:$0xff] %vm2736_vm9, %v2647_v30  ;;  %3050 = vrot.lane.b32.xlu0 %v2862_v34, %s5720_s20 }
 0x4cd   :  { %2666 = vrot.lane.b32.xlu1 %v3631_v63, %s5719_s19 }
 0x4ce   :  { %v3412_v31 = vpop.permute.xlu0 %3411 }
 0x4cf   :  { %3556 = vst.msk [vmem:[#allocation3 + $0x180] sm:$0xff] %vm3507_vm11, %v3412_v31  ;;  %v3029_v39 = vpop.permute.xlu1 %3028 }
 0x4d0   :  { %3172 = vst.msk [vmem:[#allocation3 + $0x188] sm:$0xff] %vm3122_vm10, %v3029_v39  ;;  %3054 = vrot.lane.b32.xlu0 %v2864_v3, %s5720_s20 }
 0x4d1   :  { %2670 = vrot.lane.b32.xlu1 %v2479_v55, %s5719_s19  ;;  %v5537_v32 = vpop.f32.mrb[56].mxu1 }
 0x4d2   :  { %v4320_v21 = vadd.f32 %v7431_v52, %v5537_v32  ;;  %v3416_v60 = vpop.permute.xlu0 %3415  ;;  %v4311_v53 = vpop.f32.mrb[57].mxu1 }
 0x4d3   :  { %3558 = vst.msk [vmem:[#allocation3 + $0x190] sm:$0xff] %vm3507_vm11, %v3416_v60  ;;  %v4312_v58 = vadd.f32 %v7431_v52, %v4311_v53  ;;  %v3033_v7 = vpop.permute.xlu1 %3032  ;;  %v5538_v9 = vpop.f32.mrb[58].mxu1 }
 0x4d4   :  { %3174 = vst.msk [vmem:[#allocation3 + $0x198] sm:$0xff] %vm3122_vm10, %v3033_v7  ;;  %v4323_v51 = vadd.f32 %v7431_v52, %v5538_v9  ;;  %3435 = vrot.lane.b32.xlu0 %v7395_v26, %s5721_s21  ;;  %v4314_v6 = vpop.f32.mrb[59].mxu1  ;;  %v4496_v4 = vmax.f32 %v4320_v21, 0.0 }
 0x4d5   :  { %v4315_v18 = vadd.f32 %v7431_v52, %v4314_v6  ;;  %3052 = vrot.lane.b32.xlu1 %v2863_v16, %s5720_s20  ;;  %v4494_v19 = vmax.f32 %v4312_v58, 0.0 }
 0x4d6   :  { %v4497_v17 = vmax.f32 %v4323_v51, 0.0  ;;  %v3797_v47 = vpop.permute.xlu0 %3796 }
 0x4d7   :  { %v4495_v15 = vmax.f32 %v4315_v18, 0.0  ;;  %3941 = vst.msk [vmem:[#allocation3 + $0x180] sm:$0xff] %vm3892_vm12, %v3797_v47  ;;  %v3414_v62 = vpop.permute.xlu1 %3413 }
 0x4d8   :  { %v4547_v45 = vpack.c.bf16 %v4497_v17, %v4496_v4  ;;  %3557 = vst.msk [vmem:[#allocation3 + $0x188] sm:$0xff] %vm3507_vm11, %v3414_v62  ;;  %3439 = vrot.lane.b32.xlu0 %v3249_v8, %s5721_s21 }
 0x4d9   :  { %v4546_v26 = vpack.c.bf16 %v4495_v15, %v4494_v19  ;;  %3056 = vrot.lane.b32.xlu1 %v2865_v24, %s5720_s20 }
 0x4da   :  { %v3801_v27 = vpop.permute.xlu0 %3800 }
 0x4db   :  { %3943 = vst.msk [vmem:[#allocation3 + $0x190] sm:$0xff] %vm3892_vm12, %v3801_v27  ;;  %v3418_v33 = vpop.permute.xlu1 %3417  ;;  %5601 = vmatprep.mubr.msk.bf16.mxu0 %vm604_vm0, %v4546_v26 }
 0x4dc   :  { %3559 = vst.msk [vmem:[#allocation3 + $0x198] sm:$0xff] %vm3507_vm11, %v3418_v33  ;;  %3820 = vrot.lane.b32.xlu0 %v2478_v29, %s5722_s24  ;;  %5602 = vmatmul.mubr.msk.bf16.gmra.mrb[56].mxu0 %vm604_vm0, %v4547_v45 }
 0x4dd   :  { %3437 = vrot.lane.b32.xlu1 %v2094_v36, %s5721_s21 }
 0x4de   :  { %v2264_v40 = vpop.permute.xlu0 %2263  ;;  %v4005_v44 = vld [vmem:[#allocation3 + $0x180] sm:$0xff] }
 0x4df   :  { %2404 = vst.msk [vmem:[#allocation3 + $0x1a0] sm:$0xff] %vm2351_vm8, %v2264_v40  ;;  %v3799_v41 = vpop.permute.xlu1 %3798 }
 0x4e0   :  { %3942 = vst.msk [vmem:[#allocation3 + $0x188] sm:$0xff] %vm3892_vm12, %v3799_v41  ;;  %3824 = vrot.lane.b32.xlu0 %v3634_v48, %s5722_s24 }
 0x4e1   :  { %3441 = vrot.lane.b32.xlu1 %v3250_v61, %s5721_s21 }
 0x4e2   :  { %v2268_v42 = vpop.permute.xlu0 %2267  ;;  %v4007_v38 = vld [vmem:[#allocation3 + $0x190] sm:$0xff] }
 0x4e3   :  { %2406 = vst.msk [vmem:[#allocation3 + $0x1b0] sm:$0xff] %vm2351_vm8, %v2268_v42  ;;  %v3803_v57 = vpop.permute.xlu1 %3802 }
 0x4e4   :  { %3944 = vst.msk [vmem:[#allocation3 + $0x198] sm:$0xff] %vm3892_vm12, %v3803_v57 }
 0x4e5   :  { %3822 = vrot.lane.b32.xlu1 %v2479_v55, %s5722_s24 }
 0x4e6   :  { %v2649_v63 = vpop.permute.xlu0 %2648 }
 0x4e7   :  { %2789 = vst.msk [vmem:[#allocation3 + $0x1a0] sm:$0xff] %vm2736_vm9, %v2649_v63  ;;  %v2266_v20 = vpop.permute.xlu1 %2265  ;;  %v5583_v22 = vpop.f32.mrb[36].mxu0  ;;  %v4006_v49 = vld [vmem:[#allocation3 + $0x188] sm:$0xff] }
 0x4e8   :  { %2405 = vst.msk [vmem:[#allocation3 + $0x1a8] sm:$0xff] %vm2351_vm8, %v2266_v20  ;;  %v4796_v5 = vadd.f32 %v5583_v22, %v7393_v14  ;;  %v4787_v25 = vpop.f32.mrb[37].mxu0  ;;  %v4045_v28 = vpack.c.bf16 %v4006_v49, %v4005_v44  ;;  %v4575_v49 = vld [vmem:[#allocation4 + $0x40] sm:$0xff] }
 0x4e9   :  { %v4788_v0 = vadd.f32 %v7393_v14, %v4787_v25  ;;  %3826 = vrot.lane.b32.xlu1 %v3635_v46, %s5722_s24  ;;  %v5584_v56 = vpop.f32.mrb[38].mxu0  ;;  %v4577_v46 = vld [vmem:[#allocation4 + $0x50] sm:$0xff] }
 0x4ea   :  { %v5032_v54 = vadd.f32 %v4796_v5, %v4573_v50  ;;  %v4799_v37 = vadd.f32 %v5584_v56, %v7393_v14  ;;  %v2653_v10 = vpop.permute.xlu0 %2652  ;;  %5559 = vmatprep.mubr.msk.bf16.mxu1 %vm4080_vm13, %v4045_v28  ;;  %v4790_v59 = vpop.f32.mrb[39].mxu0  ;;  %v4578_v28 = vld [vmem:[#allocation4 + $0x58] sm:$0xff] }
 0x4eb   :  { %v5030_v12 = vadd.f32 %v4788_v0, %v4571_v23  ;;  %2791 = vst.msk [vmem:[#allocation3 + $0x1b0] sm:$0xff] %vm2736_vm9, %v2653_v10  ;;  %v4791_v13 = vadd.f32 %v7393_v14, %v4790_v59  ;;  %v2270_v35 = vpop.permute.xlu1 %2269  ;;  %v4008_v1 = vld [vmem:[#allocation3 + $0x198] sm:$0xff] }
 0x4ec   :  { %v5096_v29 = vmax.f32 %v5032_v54, 0.0  ;;  %v5033_v36 = vadd.f32 %v4799_v37, %v4574_v43  ;;  %2407 = vst.msk [vmem:[#allocation3 + $0x1b8] sm:$0xff] %vm2351_vm8, %v2270_v35  ;;  %v4046_v2 = vpack.c.bf16 %v4008_v1, %v4007_v38  ;;  %v4576_v37 = vld [vmem:[#allocation4 + $0x48] sm:$0xff] }
 0x4ed   :  { %v5094_v30 = vmax.f32 %v5030_v12, 0.0  ;;  %v5031_v34 = vadd.f32 %v4791_v13, %v4572_v11 }
 0x4ee   :  { %5160 = vst.msk [vmem:[#allocation7 + $0x30] sm:$0xff] %vm153_vm2, %v5096_v29  ;;  %v5097_v3 = vmax.f32 %v5033_v36, 0.0  ;;  %v3035_v31 = vpop.permute.xlu0 %3034  ;;  %5560 = vmatmul.mubr.msk.bf16.gmra.mrb[80].mxu1 %vm4080_vm13, %v4046_v2 }
 0x4ef   :  { %5158 = vst.msk [vmem:[#allocation7 + $0x20] sm:$0xff] %vm153_vm2, %v5094_v30  ;;  %v5095_v39 = vmax.f32 %v5031_v34, 0.0  ;;  %v2651_v55 = vpop.permute.xlu1 %2650 }
 0x4f0   :  { %3175 = vst.msk [vmem:[#allocation3 + $0x1a0] sm:$0xff] %vm3122_vm10, %v3035_v31 }
 0x4f1   :  { %5161 = vst.msk [vmem:[#allocation7 + $0x38] sm:$0xff] %vm153_vm2, %v5097_v3  ;;  %5159 = vst.msk [vmem:[#allocation7 + $0x28] sm:$0xff] %vm153_vm2, %v5095_v39 }
 0x4f2   :  { %2790 = vst.msk [vmem:[#allocation3 + $0x1a8] sm:$0xff] %vm2736_vm9, %v2651_v55  ;;  %v3039_v32 = vpop.permute.xlu0 %3038 }
 0x4f3   :  { %3177 = vst.msk [vmem:[#allocation3 + $0x1b0] sm:$0xff] %vm3122_vm10, %v3039_v32  ;;  %v2655_v21 = vpop.permute.xlu1 %2654 }
 0x4f4   :  { %2792 = vst.msk [vmem:[#allocation3 + $0x1b8] sm:$0xff] %vm2736_vm9, %v2655_v21 }
 0x4f6   :  { %v3420_v60 = vpop.permute.xlu0 %3419 }
 0x4f7   :  { %3560 = vst.msk [vmem:[#allocation3 + $0x1a0] sm:$0xff] %vm3507_vm11, %v3420_v60  ;;  %v3037_v53 = vpop.permute.xlu1 %3036 }
 0x4f8   :  { %3176 = vst.msk [vmem:[#allocation3 + $0x1a8] sm:$0xff] %vm3122_vm10, %v3037_v53 }
 0x4f9   :  { %v5541_v58 = vpop.f32.mrb[60].mxu1 }
 0x4fa   :  { %v4336_v7 = vadd.f32 %v7431_v52, %v5541_v58  ;;  %v3424_v9 = vpop.permute.xlu0 %3423  ;;  %v4327_v51 = vpop.f32.mrb[61].mxu1 }
 0x4fb   :  { %3562 = vst.msk [vmem:[#allocation3 + $0x1b0] sm:$0xff] %vm3507_vm11, %v3424_v9  ;;  %v4328_v6 = vadd.f32 %v7431_v52, %v4327_v51  ;;  %v3041_v16 = vpop.permute.xlu1 %3040  ;;  %v5542_v18 = vpop.f32.mrb[62].mxu1 }
 0x4fc   :  { %3178 = vst.msk [vmem:[#allocation3 + $0x1b8] sm:$0xff] %vm3122_vm10, %v3041_v16  ;;  %v4339_v8 = vadd.f32 %v7431_v52, %v5542_v18  ;;  %v4330_v4 = vpop.f32.mrb[63].mxu1  ;;  %v4500_v47 = vmax.f32 %v4336_v7, 0.0 }
 0x4fd   :  { %v4331_v17 = vadd.f32 %v7431_v52, %v4330_v4  ;;  %v4498_v15 = vmax.f32 %v4328_v6, 0.0 }
 0x4fe   :  { %v4501_v24 = vmax.f32 %v4339_v8, 0.0  ;;  %v3805_v19 = vpop.permute.xlu0 %3804 }
 0x4ff   :  { %v4499_v62 = vmax.f32 %v4331_v17, 0.0  ;;  %3945 = vst.msk [vmem:[#allocation3 + $0x1a0] sm:$0xff] %vm3892_vm12, %v3805_v19  ;;  %v3422_v45 = vpop.permute.xlu1 %3421 }
 0x500   :  { %v4549_v26 = vpack.c.bf16 %v4501_v24, %v4500_v47  ;;  %3561 = vst.msk [vmem:[#allocation3 + $0x1a8] sm:$0xff] %vm3507_vm11, %v3422_v45 }
 0x501   :  { %v4548_v27 = vpack.c.bf16 %v4499_v62, %v4498_v15 }
 0x502   :  { %v3809_v33 = vpop.permute.xlu0 %3808 }
 0x503   :  { %3947 = vst.msk [vmem:[#allocation3 + $0x1b0] sm:$0xff] %vm3892_vm12, %v3809_v33  ;;  %v3426_v48 = vpop.permute.xlu1 %3425  ;;  %5605 = vmatprep.mubr.msk.bf16.mxu0 %vm604_vm0, %v4548_v27 }
 0x504   :  { %3563 = vst.msk [vmem:[#allocation3 + $0x1b8] sm:$0xff] %vm3507_vm11, %v3426_v48  ;;  %5606 = vmatmul.mubr.msk.bf16.gmra.mrb[60].mxu0 %vm604_vm0, %v4549_v26 }
 0x506   :  { %v2272_v40 = vpop.permute.xlu0 %2271  ;;  %v4009_v50 = vld [vmem:[#allocation3 + $0x1a0] sm:$0xff] }
 0x507   :  { %2408 = vst.msk [vmem:[#allocation3 + $0x1c0] sm:$0xff] %vm2351_vm8, %v2272_v40  ;;  %v3807_v61 = vpop.permute.xlu1 %3806 }
 0x508   :  { %3946 = vst.msk [vmem:[#allocation3 + $0x1a8] sm:$0xff] %vm3892_vm12, %v3807_v61 }
 0x50a   :  { %v2276_v41 = vpop.permute.xlu0 %2275  ;;  %v4011_v13 = vld [vmem:[#allocation3 + $0x1b0] sm:$0xff] }
 0x50b   :  { %2410 = vst.msk [vmem:[#allocation3 + $0x1d0] sm:$0xff] %vm2351_vm8, %v2276_v41  ;;  %v3811_v42 = vpop.permute.xlu1 %3810 }
 0x50c   :  { %3948 = vst.msk [vmem:[#allocation3 + $0x1b8] sm:$0xff] %vm3892_vm12, %v3811_v42 }
 0x50e   :  { %v2657_v57 = vpop.permute.xlu0 %2656 }
 0x50f   :  { %2793 = vst.msk [vmem:[#allocation3 + $0x1c0] sm:$0xff] %vm2736_vm9, %v2657_v57  ;;  %v2274_v63 = vpop.permute.xlu1 %2273  ;;  %v5587_v20 = vpop.f32.mrb[40].mxu0  ;;  %v4010_v22 = vld [vmem:[#allocation3 + $0x1a8] sm:$0xff]  ;;  %v4581_v57 = vld [vmem:[#allocation4 + $0x70] sm:$0xff] }
 0x510   :  { %2409 = vst.msk [vmem:[#allocation3 + $0x1c8] sm:$0xff] %vm2351_vm8, %v2274_v63  ;;  %v4812_v44 = vadd.f32 %v5587_v20, %v7393_v14  ;;  %v4803_v5 = vpop.f32.mrb[41].mxu0  ;;  %v4047_v23 = vpack.c.bf16 %v4010_v22, %v4009_v50  ;;  %v4579_v22 = vld [vmem:[#allocation4 + $0x60] sm:$0xff] }
 0x511   :  { %v4804_v25 = vadd.f32 %v7393_v14, %v4803_v5  ;;  %v5588_v0 = vpop.f32.mrb[42].mxu0 }
 0x512   :  { %v5036_v43 = vadd.f32 %v4812_v44, %v4577_v46  ;;  %v4815_v56 = vadd.f32 %v5588_v0, %v7393_v14  ;;  %v2661_v54 = vpop.permute.xlu0 %2660  ;;  %5563 = vmatprep.mubr.msk.bf16.mxu1 %vm4080_vm13, %v4047_v23  ;;  %v4806_v10 = vpop.f32.mrb[43].mxu0  ;;  %v4582_v23 = vld [vmem:[#allocation4 + $0x78] sm:$0xff] }
 0x513   :  { %v5034_v11 = vadd.f32 %v4804_v25, %v4575_v49  ;;  %2795 = vst.msk [vmem:[#allocation3 + $0x1d0] sm:$0xff] %vm2736_vm9, %v2661_v54  ;;  %v4807_v59 = vadd.f32 %v7393_v14, %v4806_v10  ;;  %v2278_v12 = vpop.permute.xlu1 %2277  ;;  %v4012_v35 = vld [vmem:[#allocation3 + $0x1b8] sm:$0xff] }
 0x514   :  { %v5100_v38 = vmax.f32 %v5036_v43, 0.0  ;;  %v5037_v1 = vadd.f32 %v4815_v56, %v4578_v28  ;;  %2411 = vst.msk [vmem:[#allocation3 + $0x1d8] sm:$0xff] %vm2351_vm8, %v2278_v12  ;;  %v4048_v29 = vpack.c.bf16 %v4012_v35, %v4011_v13  ;;  %v4580_v56 = vld [vmem:[#allocation4 + $0x68] sm:$0xff] }
 0x515   :  { %v5098_v36 = vmax.f32 %v5034_v11, 0.0  ;;  %v5035_v2 = vadd.f32 %v4807_v59, %v4576_v37 }
 0x516   :  { %5164 = vst.msk [vmem:[#allocation7 + $0x50] sm:$0xff] %vm153_vm2, %v5100_v38  ;;  %v5101_v30 = vmax.f32 %v5037_v1, 0.0  ;;  %v3043_v34 = vpop.permute.xlu0 %3042  ;;  %5564 = vmatmul.mubr.msk.bf16.gmra.mrb[84].mxu1 %vm4080_vm13, %v4048_v29 }
 0x517   :  { %5162 = vst.msk [vmem:[#allocation7 + $0x40] sm:$0xff] %vm153_vm2, %v5098_v36  ;;  %v5099_v3 = vmax.f32 %v5035_v2, 0.0  ;;  %v2659_v31 = vpop.permute.xlu1 %2658 }
 0x518   :  { %3179 = vst.msk [vmem:[#allocation3 + $0x1c0] sm:$0xff] %vm3122_vm10, %v3043_v34 }
 0x519   :  { %5165 = vst.msk [vmem:[#allocation7 + $0x58] sm:$0xff] %vm153_vm2, %v5101_v30  ;;  %5163 = vst.msk [vmem:[#allocation7 + $0x48] sm:$0xff] %vm153_vm2, %v5099_v3 }
 0x51a   :  { %2794 = vst.msk [vmem:[#allocation3 + $0x1c8] sm:$0xff] %vm2736_vm9, %v2659_v31  ;;  %v3047_v39 = vpop.permute.xlu0 %3046 }
 0x51b   :  { %3181 = vst.msk [vmem:[#allocation3 + $0x1d0] sm:$0xff] %vm3122_vm10, %v3047_v39  ;;  %v2663_v55 = vpop.permute.xlu1 %2662 }
 0x51c   :  { %2796 = vst.msk [vmem:[#allocation3 + $0x1d8] sm:$0xff] %vm2736_vm9, %v2663_v55 }
 0x51e   :  { %v3428_v32 = vpop.permute.xlu0 %3427 }
 0x51f   :  { %3564 = vst.msk [vmem:[#allocation3 + $0x1c0] sm:$0xff] %vm3507_vm11, %v3428_v32  ;;  %v3045_v21 = vpop.permute.xlu1 %3044 }
 0x520   :  { %3180 = vst.msk [vmem:[#allocation3 + $0x1c8] sm:$0xff] %vm3122_vm10, %v3045_v21 }
 0x521   :  { %v5545_v60 = vpop.f32.mrb[64].mxu1 }
 0x522   :  { %v4352_v53 = vadd.f32 %v7431_v52, %v5545_v60  ;;  %v3432_v58 = vpop.permute.xlu0 %3431  ;;  %v4343_v7 = vpop.f32.mrb[65].mxu1 }
 0x523   :  { %3566 = vst.msk [vmem:[#allocation3 + $0x1d0] sm:$0xff] %vm3507_vm11, %v3432_v58  ;;  %v4344_v9 = vadd.f32 %v7431_v52, %v4343_v7  ;;  %v3049_v51 = vpop.permute.xlu1 %3048  ;;  %v5546_v6 = vpop.f32.mrb[66].mxu1 }
 0x524   :  { %3182 = vst.msk [vmem:[#allocation3 + $0x1d8] sm:$0xff] %vm3122_vm10, %v3049_v51  ;;  %v4355_v16 = vadd.f32 %v7431_v52, %v5546_v6  ;;  %v4346_v18 = vpop.f32.mrb[67].mxu1  ;;  %v4504_v4 = vmax.f32 %v4352_v53, 0.0 }
 0x525   :  { %v4347_v8 = vadd.f32 %v7431_v52, %v4346_v18  ;;  %v4502_v24 = vmax.f32 %v4344_v9, 0.0 }
 0x526   :  { %v4505_v17 = vmax.f32 %v4355_v16, 0.0  ;;  %v3813_v47 = vpop.permute.xlu0 %3812 }
 0x527   :  { %v4503_v19 = vmax.f32 %v4347_v8, 0.0  ;;  %3949 = vst.msk [vmem:[#allocation3 + $0x1c0] sm:$0xff] %vm3892_vm12, %v3813_v47  ;;  %v3430_v15 = vpop.permute.xlu1 %3429 }
 0x528   :  { %v4551_v62 = vpack.c.bf16 %v4505_v17, %v4504_v4  ;;  %3565 = vst.msk [vmem:[#allocation3 + $0x1c8] sm:$0xff] %vm3507_vm11, %v3430_v15 }
 0x529   :  { %v4550_v45 = vpack.c.bf16 %v4503_v19, %v4502_v24 }
 0x52a   :  { %v3817_v26 = vpop.permute.xlu0 %3816 }
 0x52b   :  { %3951 = vst.msk [vmem:[#allocation3 + $0x1d0] sm:$0xff] %vm3892_vm12, %v3817_v26  ;;  %v3434_v27 = vpop.permute.xlu1 %3433  ;;  %5609 = vmatprep.mubr.msk.bf16.mxu0 %vm604_vm0, %v4550_v45 }
 0x52c   :  { %3567 = vst.msk [vmem:[#allocation3 + $0x1d8] sm:$0xff] %vm3507_vm11, %v3434_v27  ;;  %5610 = vmatmul.mubr.msk.bf16.gmra.mrb[64].mxu0 %vm604_vm0, %v4551_v62 }
 0x52e   :  { %v2280_v33 = vpop.permute.xlu0 %2279  ;;  %v4013_v46 = vld [vmem:[#allocation3 + $0x1c0] sm:$0xff] }
 0x52f   :  { %2412 = vst.msk [vmem:[#allocation3 + $0x1e0] sm:$0xff] %vm2351_vm8, %v2280_v33  ;;  %v3815_v48 = vpop.permute.xlu1 %3814  ;;  %v4585_v33 = vld [vmem:[#allocation4 + $0x90] sm:$0xff] }
 0x530   :  { %3950 = vst.msk [vmem:[#allocation3 + $0x1c8] sm:$0xff] %vm3892_vm12, %v3815_v48 }
 0x532   :  { %v2284_v40 = vpop.permute.xlu0 %2283  ;;  %v4015_v59 = vld [vmem:[#allocation3 + $0x1d0] sm:$0xff] }
 0x533   :  { %2414 = vst.msk [vmem:[#allocation3 + $0x1f0] sm:$0xff] %vm2351_vm8, %v2284_v40  ;;  %v3819_v61 = vpop.permute.xlu1 %3818 }
 0x534   :  { %3952 = vst.msk [vmem:[#allocation3 + $0x1d8] sm:$0xff] %vm3892_vm12, %v3819_v61 }
 0x536   :  { %v2665_v41 = vpop.permute.xlu0 %2664 }
 0x537   :  { %2797 = vst.msk [vmem:[#allocation3 + $0x1e0] sm:$0xff] %vm2736_vm9, %v2665_v41  ;;  %v2282_v42 = vpop.permute.xlu1 %2281  ;;  %v5591_v63 = vpop.f32.mrb[44].mxu0  ;;  %v4014_v20 = vld [vmem:[#allocation3 + $0x1c8] sm:$0xff] }
 0x538   :  { %2413 = vst.msk [vmem:[#allocation3 + $0x1e8] sm:$0xff] %vm2351_vm8, %v2282_v42  ;;  %v4828_v50 = vadd.f32 %v5591_v63, %v7393_v14  ;;  %v4819_v44 = vpop.f32.mrb[45].mxu0  ;;  %v4049_v49 = vpack.c.bf16 %v4014_v20, %v4013_v46  ;;  %v4583_v42 = vld [vmem:[#allocation4 + $0x80] sm:$0xff]  ;;  %v4586_v20 = vld [vmem:[#allocation4 + $0x98] sm:$0xff] }
 0x539   :  { %v4820_v5 = vadd.f32 %v7393_v14, %v4819_v44  ;;  %v5592_v25 = vpop.f32.mrb[46].mxu0 }
 0x53a   :  { %v5040_v28 = vadd.f32 %v4828_v50, %v4581_v57  ;;  %v4831_v0 = vadd.f32 %v5592_v25, %v7393_v14  ;;  %v2669_v43 = vpop.permute.xlu0 %2668  ;;  %5567 = vmatprep.mubr.msk.bf16.mxu1 %vm4080_vm13, %v4049_v49  ;;  %v4822_v54 = vpop.f32.mrb[47].mxu0 }
 0x53b   :  { %v5038_v37 = vadd.f32 %v4820_v5, %v4579_v22  ;;  %2799 = vst.msk [vmem:[#allocation3 + $0x1f0] sm:$0xff] %vm2736_vm9, %v2669_v43  ;;  %v4823_v10 = vadd.f32 %v7393_v14, %v4822_v54  ;;  %v2286_v11 = vpop.permute.xlu1 %2285  ;;  %v4016_v12 = vld [vmem:[#allocation3 + $0x1d8] sm:$0xff]  ;;  %v4584_v5 = vld [vmem:[#allocation4 + $0x88] sm:$0xff] }
 0x53c   :  { %v5104_v13 = vmax.f32 %v5040_v28, 0.0  ;;  %v5041_v35 = vadd.f32 %v4831_v0, %v4582_v23  ;;  %2415 = vst.msk [vmem:[#allocation3 + $0x1f8] sm:$0xff] %vm2351_vm8, %v2286_v11  ;;  %v4050_v38 = vpack.c.bf16 %v4016_v12, %v4015_v59 }
 0x53d   :  { %v5102_v1 = vmax.f32 %v5038_v37, 0.0  ;;  %v5039_v29 = vadd.f32 %v4823_v10, %v4580_v56 }
 0x53e   :  { %5168 = vst.msk [vmem:[#allocation7 + $0x70] sm:$0xff] %vm153_vm2, %v5104_v13  ;;  %v5105_v36 = vmax.f32 %v5041_v35, 0.0  ;;  %v3051_v2 = vpop.permute.xlu0 %3050  ;;  %5568 = vmatmul.mubr.msk.bf16.gmra.mrb[88].mxu1 %vm4080_vm13, %v4050_v38 }
 0x53f   :  { %5166 = vst.msk [vmem:[#allocation7 + $0x60] sm:$0xff] %vm153_vm2, %v5102_v1  ;;  %v5103_v30 = vmax.f32 %v5039_v29, 0.0  ;;  %v2667_v34 = vpop.permute.xlu1 %2666 }
 0x540   :  { %3183 = vst.msk [vmem:[#allocation3 + $0x1e0] sm:$0xff] %vm3122_vm10, %v3051_v2 }
 0x541   :  { %5169 = vst.msk [vmem:[#allocation7 + $0x78] sm:$0xff] %vm153_vm2, %v5105_v36  ;;  %5167 = vst.msk [vmem:[#allocation7 + $0x68] sm:$0xff] %vm153_vm2, %v5103_v30 }
 0x542   :  { %2798 = vst.msk [vmem:[#allocation3 + $0x1e8] sm:$0xff] %vm2736_vm9, %v2667_v34  ;;  %v3055_v3 = vpop.permute.xlu0 %3054 }
 0x543   :  { %3185 = vst.msk [vmem:[#allocation3 + $0x1f0] sm:$0xff] %vm3122_vm10, %v3055_v3  ;;  %v2671_v31 = vpop.permute.xlu1 %2670 }
 0x544   :  { %2800 = vst.msk [vmem:[#allocation3 + $0x1f8] sm:$0xff] %vm2736_vm9, %v2671_v31 }
 0x546   :  { %v3436_v39 = vpop.permute.xlu0 %3435 }
 0x547   :  { %3568 = vst.msk [vmem:[#allocation3 + $0x1e0] sm:$0xff] %vm3507_vm11, %v3436_v39  ;;  %v3053_v55 = vpop.permute.xlu1 %3052 }
 0x548   :  { %3184 = vst.msk [vmem:[#allocation3 + $0x1e8] sm:$0xff] %vm3122_vm10, %v3053_v55 }
 0x549   :  { %v5549_v32 = vpop.f32.mrb[68].mxu1 }
 0x54a   :  { %v4368_v21 = vadd.f32 %v7431_v52, %v5549_v32  ;;  %v3440_v60 = vpop.permute.xlu0 %3439  ;;  %v4359_v53 = vpop.f32.mrb[69].mxu1  ;;  %v4589_v32 = vld [vmem:[#allocation4 + $0xb0] sm:$0xff] }
 0x54b   :  { %3570 = vst.msk [vmem:[#allocation3 + $0x1f0] sm:$0xff] %vm3507_vm11, %v3440_v60  ;;  %v4360_v58 = vadd.f32 %v7431_v52, %v4359_v53  ;;  %v3057_v7 = vpop.permute.xlu1 %3056  ;;  %v5550_v9 = vpop.f32.mrb[70].mxu1  ;;  %v4587_v53 = vld [vmem:[#allocation4 + $0xa0] sm:$0xff] }
 0x54c   :  { %3186 = vst.msk [vmem:[#allocation3 + $0x1f8] sm:$0xff] %vm3122_vm10, %v3057_v7  ;;  %v4371_v51 = vadd.f32 %v7431_v52, %v5550_v9  ;;  %v4362_v6 = vpop.f32.mrb[71].mxu1  ;;  %v4508_v18 = vmax.f32 %v4368_v21, 0.0  ;;  %v4590_v9 = vld [vmem:[#allocation4 + $0xb8] sm:$0xff] }
 0x54d   :  { %v4363_v16 = vadd.f32 %v7431_v52, %v4362_v6  ;;  %v4506_v17 = vmax.f32 %v4360_v58, 0.0 }
 0x54e   :  { %v4509_v8 = vmax.f32 %v4371_v51, 0.0  ;;  %v3821_v4 = vpop.permute.xlu0 %3820 }
 0x54f   :  { %v4507_v47 = vmax.f32 %v4363_v16, 0.0  ;;  %3953 = vst.msk [vmem:[#allocation3 + $0x1e0] sm:$0xff] %vm3892_vm12, %v3821_v4  ;;  %v3438_v24 = vpop.permute.xlu1 %3437 }
 0x550   :  { %v4553_v19 = vpack.c.bf16 %v4509_v8, %v4508_v18  ;;  %3569 = vst.msk [vmem:[#allocation3 + $0x1e8] sm:$0xff] %vm3507_vm11, %v3438_v24  ;;  %v4588_v18 = vld [vmem:[#allocation4 + $0xa8] sm:$0xff] }
 0x551   :  { %v4552_v15 = vpack.c.bf16 %v4507_v47, %v4506_v17 }
 0x552   :  { %v3825_v62 = vpop.permute.xlu0 %3824 }
 0x553   :  { %v3442_v45 = vpop.permute.xlu1 %3441  ;;  %5613 = vmatprep.mubr.msk.bf16.mxu0 %vm604_vm0, %v4552_v15  ;;  %3955 = vst.msk [vmem:[#allocation3 + $0x1f0] sm:$0xff] %vm3892_vm12, %v3825_v62 }
 0x554   :  { %3571 = vst.msk [vmem:[#allocation3 + $0x1f8] sm:$0xff] %vm3507_vm11, %v3442_v45  ;;  %5614 = vmatmul.mubr.msk.bf16.gmra.mrb[68].mxu0 %vm604_vm0, %v4553_v19 }
 0x556   :  { %v4017_v40 = vld [vmem:[#allocation3 + $0x1e0] sm:$0xff] }
 0x557   :  { %v3823_v26 = vpop.permute.xlu1 %3822 }
 0x558   :  { %3954 = vst.msk [vmem:[#allocation3 + $0x1e8] sm:$0xff] %vm3892_vm12, %v3823_v26 }
 0x55a   :  { %v4019_v22 = vld [vmem:[#allocation3 + $0x1f0] sm:$0xff] }
 0x55b   :  { %v3827_v27 = vpop.permute.xlu1 %3826 }
 0x55c   :  { %3956 = vst.msk [vmem:[#allocation3 + $0x1f8] sm:$0xff] %vm3892_vm12, %v3827_v27 }
 0x55f   :  { %v5595_v48 = vpop.f32.mrb[48].mxu0  ;;  %v4018_v61 = vld [vmem:[#allocation3 + $0x1e8] sm:$0xff] }
 0x560   :  { %v4844_v41 = vadd.f32 %v5595_v48, %v7393_v14  ;;  %v4835_v57 = vpop.f32.mrb[49].mxu0  ;;  %v4051_v63 = vpack.c.bf16 %v4018_v61, %v4017_v40 }
 0x561   :  { %v4836_v46 = vadd.f32 %v7393_v14, %v4835_v57  ;;  %v5596_v50 = vpop.f32.mrb[50].mxu0 }
 0x562   :  { %v5044_v44 = vadd.f32 %v4844_v41, %v4585_v33  ;;  %v4847_v49 = vadd.f32 %v5596_v50, %v7393_v14  ;;  %5571 = vmatprep.mubr.msk.bf16.mxu1 %vm4080_vm13, %v4051_v63  ;;  %v4838_v23 = vpop.f32.mrb[51].mxu0 }
 0x563   :  { %v5042_v25 = vadd.f32 %v4836_v46, %v4583_v42  ;;  %v4839_v28 = vadd.f32 %v7393_v14, %v4838_v23  ;;  %v4020_v0 = vld [vmem:[#allocation3 + $0x1f8] sm:$0xff]  ;;  %v4591_v23 = vld [vmem:[#allocation4 + $0xc0] sm:$0xff] }
 0x564   :  { %v5108_v43 = vmax.f32 %v5044_v44, 0.0  ;;  %v5045_v56 = vadd.f32 %v4847_v49, %v4586_v20  ;;  %v4052_v54 = vpack.c.bf16 %v4020_v0, %v4019_v22  ;;  %v4593_v44 = vld [vmem:[#allocation4 + $0xd0] sm:$0xff]  ;;  %v4594_v0 = vld [vmem:[#allocation4 + $0xd8] sm:$0xff] }
 0x565   :  { %v5106_v37 = vmax.f32 %v5042_v25, 0.0  ;;  %v5043_v10 = vadd.f32 %v4839_v28, %v4584_v5 }
 0x566   :  { %5172 = vst.msk [vmem:[#allocation7 + $0x90] sm:$0xff] %vm153_vm2, %v5108_v43  ;;  %v5109_v11 = vmax.f32 %v5045_v56, 0.0  ;;  %5572 = vmatmul.mubr.msk.bf16.gmra.mrb[92].mxu1 %vm4080_vm13, %v4052_v54 }
 0x567   :  { %5170 = vst.msk [vmem:[#allocation7 + $0x80] sm:$0xff] %vm153_vm2, %v5106_v37  ;;  %v5107_v59 = vmax.f32 %v5043_v10, 0.0  ;;  %v4592_v37 = vld [vmem:[#allocation4 + $0xc8] sm:$0xff] }
 0x568   :  { %5173 = vst.msk [vmem:[#allocation7 + $0x98] sm:$0xff] %vm153_vm2, %v5109_v11 }
 0x569   :  { %5171 = vst.msk [vmem:[#allocation7 + $0x88] sm:$0xff] %vm153_vm2, %v5107_v59 }
 0x571   :  { %v5553_v12 = vpop.f32.mrb[72].mxu1 }
 0x572   :  { %v4384_v13 = vadd.f32 %v7431_v52, %v5553_v12  ;;  %v4375_v35 = vpop.f32.mrb[73].mxu1 }
 0x573   :  { %v4376_v38 = vadd.f32 %v7431_v52, %v4375_v35  ;;  %v5554_v1 = vpop.f32.mrb[74].mxu1 }
 0x574   :  { %v4387_v29 = vadd.f32 %v7431_v52, %v5554_v1  ;;  %v4378_v36 = vpop.f32.mrb[75].mxu1  ;;  %v4512_v30 = vmax.f32 %v4384_v13, 0.0 }
 0x575   :  { %v4379_v2 = vadd.f32 %v7431_v52, %v4378_v36  ;;  %v4510_v3 = vmax.f32 %v4376_v38, 0.0 }
 0x576   :  { %v4513_v34 = vmax.f32 %v4387_v29, 0.0 }
 0x577   :  { %v4511_v31 = vmax.f32 %v4379_v2, 0.0 }
 0x578   :  { %v4555_v39 = vpack.c.bf16 %v4513_v34, %v4512_v30 }
 0x579   :  { %v4554_v55 = vpack.c.bf16 %v4511_v31, %v4510_v3 }
 0x57b   :  { %5617 = vmatprep.mubr.msk.bf16.mxu0 %vm604_vm0, %v4554_v55 }
 0x57c   :  { %5618 = vmatmul.mubr.msk.bf16.gmra.mrb[72].mxu0 %vm604_vm0, %v4555_v39 }
 0x587   :  { %v5599_v21 = vpop.f32.mrb[52].mxu0 }
 0x588   :  { %v4860_v60 = vadd.f32 %v5599_v21, %v7393_v14  ;;  %v4851_v58 = vpop.f32.mrb[53].mxu0 }
 0x589   :  { %v4852_v7 = vadd.f32 %v7393_v14, %v4851_v58  ;;  %v5600_v51 = vpop.f32.mrb[54].mxu0 }
 0x58a   :  { %v5048_v6 = vadd.f32 %v4860_v60, %v4589_v32  ;;  %v4863_v16 = vadd.f32 %v5600_v51, %v7393_v14  ;;  %v4854_v8 = vpop.f32.mrb[55].mxu0  ;;  %v7613_v51 = vld [vmem:[%s7725_s6] ss:$0 sm:$0xff] }
 0x58b   :  { %v5046_v4 = vadd.f32 %v4852_v7, %v4587_v53  ;;  %v4855_v17 = vadd.f32 %v7393_v14, %v4854_v8  ;;  %v4597_v7 = vld [vmem:[#allocation4 + $0xf0] sm:$0xff] }
 0x58c   :  { %v5112_v47 = vmax.f32 %v5048_v6, 0.0  ;;  %v5049_v24 = vadd.f32 %v4863_v16, %v4590_v9  ;;  %v4595_v16 = vld [vmem:[#allocation4 + $0xe0] sm:$0xff] }
 0x58d   :  { %v5110_v19 = vmax.f32 %v5046_v4, 0.0  ;;  %v5047_v15 = vadd.f32 %v4855_v17, %v4588_v18  ;;  %v4598_v4 = vld [vmem:[#allocation4 + $0xf8] sm:$0xff] }
 0x58e   :  { %5176 = vst.msk [vmem:[#allocation7 + $0xb0] sm:$0xff] %vm153_vm2, %v5112_v47  ;;  %v5113_v62 = vmax.f32 %v5049_v24, 0.0 }
 0x58f   :  { %5174 = vst.msk [vmem:[#allocation7 + $0xa0] sm:$0xff] %vm153_vm2, %v5110_v19  ;;  %v5111_v45 = vmax.f32 %v5047_v15, 0.0  ;;  %v4596_v19 = vld [vmem:[#allocation4 + $0xe8] sm:$0xff] }
 0x590   :  { %5177 = vst.msk [vmem:[#allocation7 + $0xb8] sm:$0xff] %vm153_vm2, %v5113_v62 }
 0x591   :  { %5175 = vst.msk [vmem:[#allocation7 + $0xa8] sm:$0xff] %vm153_vm2, %v5111_v45 }
 0x599   :  { %v5557_v26 = vpop.f32.mrb[76].mxu1 }
 0x59a   :  { %v4400_v27 = vadd.f32 %v7431_v52, %v5557_v26  ;;  %v4391_v33 = vpop.f32.mrb[77].mxu1 }
 0x59b   :  { %v4392_v48 = vadd.f32 %v7431_v52, %v4391_v33  ;;  %v5558_v40 = vpop.f32.mrb[78].mxu1 }
 0x59c   :  { %v4403_v61 = vadd.f32 %v7431_v52, %v5558_v40  ;;  %v4394_v41 = vpop.f32.mrb[79].mxu1  ;;  %v4516_v57 = vmax.f32 %v4400_v27, 0.0 }
 0x59d   :  { %v4395_v42 = vadd.f32 %v7431_v52, %v4394_v41  ;;  %v4514_v46 = vmax.f32 %v4392_v48, 0.0 }
 0x59e   :  { %v4517_v63 = vmax.f32 %v4403_v61, 0.0 }
 0x59f   :  { %v4515_v20 = vmax.f32 %v4395_v42, 0.0 }
 0x5a0   :  { %v4557_v50 = vpack.c.bf16 %v4517_v63, %v4516_v57 }
 0x5a1   :  { %v4556_v22 = vpack.c.bf16 %v4515_v20, %v4514_v46 }
 0x5a3   :  { %5621 = vmatprep.mubr.msk.bf16.mxu0 %vm604_vm0, %v4556_v22 }
 0x5a4   :  { %5622 = vmatmul.mubr.msk.bf16.gmra.mrb[76].mxu0 %vm604_vm0, %v4557_v50 }
 0x5af   :  { %v5603_v49 = vpop.f32.mrb[56].mxu0 }
 0x5b0   :  { %v4876_v5 = vadd.f32 %v5603_v49, %v7393_v14  ;;  %v4867_v25 = vpop.f32.mrb[57].mxu0 }
 0x5b1   :  { %v4868_v28 = vadd.f32 %v7393_v14, %v4867_v25  ;;  %v5604_v43 = vpop.f32.mrb[58].mxu0 }
 0x5b2   :  { %v5052_v56 = vadd.f32 %v4876_v5, %v4593_v44  ;;  %v4879_v54 = vadd.f32 %v5604_v43, %v7393_v14  ;;  %v4870_v10 = vpop.f32.mrb[59].mxu0 }
 0x5b3   :  { %v5050_v11 = vadd.f32 %v4868_v28, %v4591_v23  ;;  %v4871_v59 = vadd.f32 %v7393_v14, %v4870_v10 }
 0x5b4   :  { %v5116_v12 = vmax.f32 %v5052_v56, 0.0  ;;  %v5053_v13 = vadd.f32 %v4879_v54, %v4594_v0  ;;  %v4601_v0 = vld [vmem:[#allocation4 + $0x110] sm:$0xff]  ;;  %v4599_v54 = vld [vmem:[#allocation4 + $0x100] sm:$0xff] }
 0x5b5   :  { %v5114_v35 = vmax.f32 %v5050_v11, 0.0  ;;  %v5051_v38 = vadd.f32 %v4871_v59, %v4592_v37  ;;  %v4602_v11 = vld [vmem:[#allocation4 + $0x118] sm:$0xff] }
 0x5b6   :  { %5180 = vst.msk [vmem:[#allocation7 + $0xd0] sm:$0xff] %vm153_vm2, %v5116_v12  ;;  %v5117_v1 = vmax.f32 %v5053_v13, 0.0 }
 0x5b7   :  { %5178 = vst.msk [vmem:[#allocation7 + $0xc0] sm:$0xff] %vm153_vm2, %v5114_v35  ;;  %v5115_v29 = vmax.f32 %v5051_v38, 0.0  ;;  %v4600_v35 = vld [vmem:[#allocation4 + $0x108] sm:$0xff] }
 0x5b8   :  { %5181 = vst.msk [vmem:[#allocation7 + $0xd8] sm:$0xff] %vm153_vm2, %v5117_v1 }
 0x5b9   :  { %5179 = vst.msk [vmem:[#allocation7 + $0xc8] sm:$0xff] %vm153_vm2, %v5115_v29 }
 0x5c1   :  { %v5561_v36 = vpop.f32.mrb[80].mxu1 }
 0x5c2   :  { %v4416_v2 = vadd.f32 %v7431_v52, %v5561_v36  ;;  %v4407_v30 = vpop.f32.mrb[81].mxu1 }
 0x5c3   :  { %v4408_v14 = vadd.f32 %v7431_v52, %v4407_v30  ;;  %v5562_v34 = vpop.f32.mrb[82].mxu1 }
 0x5c4   :  { %v4419_v3 = vadd.f32 %v7431_v52, %v5562_v34  ;;  %v4410_v31 = vpop.f32.mrb[83].mxu1  ;;  %v4520_v55 = vmax.f32 %v4416_v2, 0.0 }
 0x5c5   :  { %v4411_v39 = vadd.f32 %v7431_v52, %v4410_v31  ;;  %v4518_v21 = vmax.f32 %v4408_v14, 0.0 }
 0x5c6   :  { %v4521_v32 = vmax.f32 %v4419_v3, 0.0 }
 0x5c7   :  { %v4519_v60 = vmax.f32 %v4411_v39, 0.0 }
 0x5c8   :  { %v4559_v53 = vpack.c.bf16 %v4521_v32, %v4520_v55 }
 0x5c9   :  { %v4558_v58 = vpack.c.bf16 %v4519_v60, %v4518_v21 }
 0x5cb   :  { %5625 = vmatprep.mubr.msk.bf16.mxu0 %vm604_vm0, %v4558_v58 }
 0x5cc   :  { %5626 = vmatmul.mubr.msk.bf16.gmra.mrb[80].mxu0 %vm604_vm0, %v4559_v53 }
 0x5d7   :  { %v5607_v9 = vpop.f32.mrb[60].mxu0 }
 0x5d8   :  { %v4892_v6 = vadd.f32 %v7613_v51, %v5607_v9  ;;  %v4883_v18 = vpop.f32.mrb[61].mxu0 }
 0x5d9   :  { %v4884_v8 = vadd.f32 %v7613_v51, %v4883_v18  ;;  %v5608_v17 = vpop.f32.mrb[62].mxu0 }
 0x5da   :  { %v5056_v47 = vadd.f32 %v4892_v6, %v4597_v7  ;;  %v4895_v24 = vadd.f32 %v7613_v51, %v5608_v17  ;;  %v4886_v15 = vpop.f32.mrb[63].mxu0 }
 0x5db   :  { %v5054_v62 = vadd.f32 %v4884_v8, %v4595_v16  ;;  %v4887_v45 = vadd.f32 %v7613_v51, %v4886_v15 }
 0x5dc   :  { %v5120_v26 = vmax.f32 %v5056_v47, 0.0  ;;  %v5057_v27 = vadd.f32 %v4895_v24, %v4598_v4  ;;  %v4605_v4 = vld [vmem:[#allocation4 + $0x130] sm:$0xff]  ;;  %v4603_v24 = vld [vmem:[#allocation4 + $0x120] sm:$0xff] }
 0x5dd   :  { %v5118_v33 = vmax.f32 %v5054_v62, 0.0  ;;  %v5055_v48 = vadd.f32 %v4887_v45, %v4596_v19  ;;  %v4606_v62 = vld [vmem:[#allocation4 + $0x138] sm:$0xff] }
 0x5de   :  { %5184 = vst.msk [vmem:[#allocation7 + $0xf0] sm:$0xff] %vm153_vm2, %v5120_v26  ;;  %v5121_v40 = vmax.f32 %v5057_v27, 0.0  ;;  %v4604_v27 = vld [vmem:[#allocation4 + $0x128] sm:$0xff] }
 0x5df   :  { %5182 = vst.msk [vmem:[#allocation7 + $0xe0] sm:$0xff] %vm153_vm2, %v5118_v33  ;;  %v5119_v61 = vmax.f32 %v5055_v48, 0.0 }
 0x5e0   :  { %5185 = vst.msk [vmem:[#allocation7 + $0xf8] sm:$0xff] %vm153_vm2, %v5121_v40 }
 0x5e1   :  { %5183 = vst.msk [vmem:[#allocation7 + $0xe8] sm:$0xff] %vm153_vm2, %v5119_v61 }
 0x5e9   :  { %v5565_v41 = vpop.f32.mrb[84].mxu1 }
 0x5ea   :  { %v4432_v42 = vadd.f32 %v7431_v52, %v5565_v41  ;;  %v4423_v57 = vpop.f32.mrb[85].mxu1 }
 0x5eb   :  { %v4424_v63 = vadd.f32 %v7431_v52, %v4423_v57  ;;  %v5566_v46 = vpop.f32.mrb[86].mxu1 }
 0x5ec   :  { %v4435_v20 = vadd.f32 %v7431_v52, %v5566_v46  ;;  %v4426_v50 = vpop.f32.mrb[87].mxu1  ;;  %v4524_v44 = vmax.f32 %v4432_v42, 0.0 }
 0x5ed   :  { %v4427_v22 = vadd.f32 %v7431_v52, %v4426_v50  ;;  %v4522_v5 = vmax.f32 %v4424_v63, 0.0  ;;  %v5663_v50 = vld [vmem:[%s7723_s4] ss:$0 sm:$0xff]  ;;  %s5723_s4 = smov [#allocation7]  }
 0x5ee   :  { %v4525_v49 = vmax.f32 %v4435_v20, 0.0  ;;  %s5223_s1 = sshll.u32 %s5723_s4, 4  ;;  %s5224_s1 = int_to_ptr.vmem [resolvable:$true] %s5223_s1 }
 0x5ef   :  { %v4523_v23 = vmax.f32 %v4427_v22, 0.0  ;;  %s5686_s16 = scalar_lea.vmem %s5224_s1, 8192  ;;  %p5691_p9 = scmp.lt.s32.totalorder %s5224_s1, %s5224_s1 }
 0x5f0   :  { %v4561_v25 = vpack.c.bf16 %v4525_v49, %v4524_v44  ;;  %p5687_p8 = scmp.ne.s32.totalorder %s5224_s1, %s5686_s16  ;;  %p5692_p10 = scmp.lt.s32.totalorder %s5686_s16, %s5686_s16 }
 0x5f1   :  { %v4560_v28 = vpack.c.bf16 %v4523_v23, %v4522_v5 }
 0x5f2   :  { %p5693_p11 = por %p5692_p10, %p5691_p9 }
 0x5f3   :  { %5629 = vmatprep.mubr.msk.bf16.mxu0 %vm604_vm0, %v4560_v28 }
 0x5f4   :  { %5630 = vmatmul.mubr.msk.bf16.gmra.mrb[84].mxu0 %vm604_vm0, %v4561_v25  ;;  %p5694_p12 = pnand %p5693_p11, %p5687_p8 }
 0x5ff   :  { %v5611_v43 = vpop.f32.mrb[64].mxu0 }
 0x600   :  { %v4908_v56 = vadd.f32 %v7613_v51, %v5611_v43  ;;  %v4899_v37 = vpop.f32.mrb[65].mxu0 }
 0x601   :  { %v4900_v10 = vadd.f32 %v7613_v51, %v4899_v37  ;;  %v5612_v59 = vpop.f32.mrb[66].mxu0 }
 0x602   :  { %v5060_v12 = vadd.f32 %v4908_v56, %v4601_v0  ;;  %v4911_v13 = vadd.f32 %v7613_v51, %v5612_v59  ;;  %v4902_v38 = vpop.f32.mrb[67].mxu0 }
 0x603   :  { %v5058_v1 = vadd.f32 %v4900_v10, %v4599_v54  ;;  %v4903_v29 = vadd.f32 %v7613_v51, %v4902_v38 }
 0x604   :  { %v5124_v36 = vmax.f32 %v5060_v12, 0.0  ;;  %v5061_v2 = vadd.f32 %v4911_v13, %v4602_v11  ;;  %v4609_v11 = vld [vmem:[#allocation4 + $0x150] sm:$0xff]  ;;  %v4607_v13 = vld [vmem:[#allocation4 + $0x140] sm:$0xff] }
 0x605   :  { %v5122_v30 = vmax.f32 %v5058_v1, 0.0  ;;  %v5059_v14 = vadd.f32 %v4903_v29, %v4600_v35  ;;  %v4610_v1 = vld [vmem:[#allocation4 + $0x158] sm:$0xff] }
 0x606   :  { %5188 = vst.msk [vmem:[#allocation7 + $0x110] sm:$0xff] %vm153_vm2, %v5124_v36  ;;  %v5125_v34 = vmax.f32 %v5061_v2, 0.0 }
 0x607   :  { %5186 = vst.msk [vmem:[#allocation7 + $0x100] sm:$0xff] %vm153_vm2, %v5122_v30  ;;  %v5123_v3 = vmax.f32 %v5059_v14, 0.0  ;;  %v4608_v30 = vld [vmem:[#allocation4 + $0x148] sm:$0xff] }
 0x608   :  { %5189 = vst.msk [vmem:[#allocation7 + $0x118] sm:$0xff] %vm153_vm2, %v5125_v34 }
 0x609   :  { %5187 = vst.msk [vmem:[#allocation7 + $0x108] sm:$0xff] %vm153_vm2, %v5123_v3 }
 0x611   :  { %v5569_v31 = vpop.f32.mrb[88].mxu1 }
 0x612   :  { %v4448_v39 = vadd.f32 %v7431_v52, %v5569_v31  ;;  %v4439_v55 = vpop.f32.mrb[89].mxu1 }
 0x613   :  { %v4440_v32 = vadd.f32 %v7431_v52, %v4439_v55  ;;  %v5570_v21 = vpop.f32.mrb[90].mxu1 }
 0x614   :  { %v4451_v60 = vadd.f32 %v7431_v52, %v5570_v21  ;;  %v4442_v53 = vpop.f32.mrb[91].mxu1  ;;  %v4528_v7 = vmax.f32 %v4448_v39, 0.0 }
 0x615   :  { %v4443_v58 = vadd.f32 %v7431_v52, %v4442_v53  ;;  %v4526_v6 = vmax.f32 %v4440_v32, 0.0  ;;  %v4613_v53 = vld [vmem:[#allocation4 + $0x170] sm:$0xff] }
 0x616   :  { %v4529_v9 = vmax.f32 %v4451_v60, 0.0 }
 0x617   :  { %v4527_v16 = vmax.f32 %v4443_v58, 0.0 }
 0x618   :  { %v4563_v18 = vpack.c.bf16 %v4529_v9, %v4528_v7  ;;  %v4611_v9 = vld [vmem:[#allocation4 + $0x160] sm:$0xff] }
 0x619   :  { %v4562_v8 = vpack.c.bf16 %v4527_v16, %v4526_v6 }
 0x61b   :  { %5633 = vmatprep.mubr.msk.bf16.mxu0 %vm604_vm0, %v4562_v8 }
 0x61c   :  { %5634 = vmatmul.mubr.msk.bf16.gmra.mrb[88].mxu0 %vm604_vm0, %v4563_v18  ;;  %v4614_v18 = vld [vmem:[#allocation4 + $0x178] sm:$0xff] }
 0x627   :  { %v5615_v17 = vpop.f32.mrb[68].mxu0 }
 0x628   :  { %v4924_v47 = vadd.f32 %v7613_v51, %v5615_v17  ;;  %v4915_v19 = vpop.f32.mrb[69].mxu0 }
 0x629   :  { %v4916_v15 = vadd.f32 %v7613_v51, %v4915_v19  ;;  %v5616_v52 = vpop.f32.mrb[70].mxu0 }
 0x62a   :  { %v5064_v45 = vadd.f32 %v4924_v47, %v4605_v4  ;;  %v4927_v26 = vadd.f32 %v7613_v51, %v5616_v52  ;;  %v4918_v33 = vpop.f32.mrb[71].mxu0  ;;  %v4612_v47 = vld [vmem:[#allocation4 + $0x168] sm:$0xff] }
 0x62b   :  { %v5062_v48 = vadd.f32 %v4916_v15, %v4603_v24  ;;  %v4919_v40 = vadd.f32 %v7613_v51, %v4918_v33 }
 0x62c   :  { %v5128_v61 = vmax.f32 %v5064_v45, 0.0  ;;  %v5065_v41 = vadd.f32 %v4927_v26, %v4606_v62 }
 0x62d   :  { %v5126_v42 = vmax.f32 %v5062_v48, 0.0  ;;  %v5063_v57 = vadd.f32 %v4919_v40, %v4604_v27  ;;  %v4617_v48 = vld [vmem:[#allocation4 + $0x190] sm:$0xff] }
 0x62e   :  { %5192 = vst.msk [vmem:[#allocation7 + $0x130] sm:$0xff] %vm153_vm2, %v5128_v61  ;;  %v5129_v63 = vmax.f32 %v5065_v41, 0.0  ;;  %v4615_v41 = vld [vmem:[#allocation4 + $0x180] sm:$0xff] }
 0x62f   :  { %5190 = vst.msk [vmem:[#allocation7 + $0x120] sm:$0xff] %vm153_vm2, %v5126_v42  ;;  %v5127_v46 = vmax.f32 %v5063_v57, 0.0 }
 0x630   :  { %5193 = vst.msk [vmem:[#allocation7 + $0x138] sm:$0xff] %vm153_vm2, %v5129_v63  ;;  %v4618_v63 = vld [vmem:[#allocation4 + $0x198] sm:$0xff] }
 0x631   :  { %5191 = vst.msk [vmem:[#allocation7 + $0x128] sm:$0xff] %vm153_vm2, %v5127_v46 }
 0x639   :  { %v5573_v20 = vpop.f32.mrb[92].mxu1 }
 0x63a   :  { %v4464_v22 = vadd.f32 %v5663_v50, %v5573_v20  ;;  %v4455_v44 = vpop.f32.mrb[93].mxu1 }
 0x63b   :  { %v4456_v49 = vadd.f32 %v5663_v50, %v4455_v44  ;;  %v5574_v5 = vpop.f32.mrb[94].mxu1 }
 0x63c   :  { %v4467_v23 = vadd.f32 %v5663_v50, %v5574_v5  ;;  %v4458_v25 = vpop.f32.mrb[95].mxu1  ;;  %v4532_v0 = vmax.f32 %v4464_v22, 0.0  ;;  %v4616_v22 = vld [vmem:[#allocation4 + $0x188] sm:$0xff] }
 0x63d   :  { %v4459_v28 = vadd.f32 %v5663_v50, %v4458_v25  ;;  %v4530_v56 = vmax.f32 %v4456_v49, 0.0 }
 0x63e   :  { %v4533_v43 = vmax.f32 %v4467_v23, 0.0 }
 0x63f   :  { %v4531_v54 = vmax.f32 %v4459_v28, 0.0 }
 0x640   :  { %v4565_v37 = vpack.c.bf16 %v4533_v43, %v4532_v0 }
 0x641   :  { %v4564_v10 = vpack.c.bf16 %v4531_v54, %v4530_v56  ;;  %v4621_v54 = vld [vmem:[#allocation4 + $0x1b0] sm:$0xff] }
 0x643   :  { %5637 = vmatprep.mubr.msk.bf16.mxu0 %vm604_vm0, %v4564_v10 }
 0x644   :  { %5638 = vmatmul.mubr.msk.bf16.gmra.mrb[92].mxu0 %vm604_vm0, %v4565_v37 }
 0x64f   :  { %v5619_v59 = vpop.f32.mrb[72].mxu0 }
 0x650   :  { %v4940_v12 = vadd.f32 %v7613_v51, %v5619_v59  ;;  %v4931_v35 = vpop.f32.mrb[73].mxu0 }
 0x651   :  { %v4932_v38 = vadd.f32 %v7613_v51, %v4931_v35  ;;  %v5620_v29 = vpop.f32.mrb[74].mxu0 }
 0x652   :  { %v5068_v36 = vadd.f32 %v4940_v12, %v4609_v11  ;;  %v4943_v2 = vadd.f32 %v7613_v51, %v5620_v29  ;;  %v4934_v14 = vpop.f32.mrb[75].mxu0  ;;  %v4619_v11 = vld [vmem:[#allocation4 + $0x1a0] sm:$0xff]  ;;  %v4620_v29 = vld [vmem:[#allocation4 + $0x1a8] sm:$0xff] }
 0x653   :  { %v5066_v34 = vadd.f32 %v4932_v38, %v4607_v13  ;;  %v4935_v3 = vadd.f32 %v7613_v51, %v4934_v14  ;;  %v4622_v13 = vld [vmem:[#allocation4 + $0x1b8] sm:$0xff] }
 0x654   :  { %v5132_v31 = vmax.f32 %v5068_v36, 0.0  ;;  %v5069_v39 = vadd.f32 %v4943_v2, %v4610_v1 }
 0x655   :  { %v5130_v55 = vmax.f32 %v5066_v34, 0.0  ;;  %v5067_v32 = vadd.f32 %v4935_v3, %v4608_v30 }
 0x656   :  { %5196 = vst.msk [vmem:[#allocation7 + $0x150] sm:$0xff] %vm153_vm2, %v5132_v31  ;;  %v5133_v21 = vmax.f32 %v5069_v39, 0.0 }
 0x657   :  { %5194 = vst.msk [vmem:[#allocation7 + $0x140] sm:$0xff] %vm153_vm2, %v5130_v55  ;;  %v5131_v60 = vmax.f32 %v5067_v32, 0.0  ;;  %v4625_v32 = vld [vmem:[#allocation4 + $0x1d0] sm:$0xff] }
 0x658   :  { %5197 = vst.msk [vmem:[#allocation7 + $0x158] sm:$0xff] %vm153_vm2, %v5133_v21 }
 0x659   :  { %5195 = vst.msk [vmem:[#allocation7 + $0x148] sm:$0xff] %vm153_vm2, %v5131_v60 }
 0x677   :  { %v5623_v58 = vpop.f32.mrb[76].mxu0 }
 0x678   :  { %v4956_v7 = vadd.f32 %v7613_v51, %v5623_v58  ;;  %v4947_v6 = vpop.f32.mrb[77].mxu0 }
 0x679   :  { %v4948_v16 = vadd.f32 %v7613_v51, %v4947_v6  ;;  %v5624_v8 = vpop.f32.mrb[78].mxu0 }
 0x67a   :  { %v5072_v4 = vadd.f32 %v4956_v7, %v4613_v53  ;;  %v4959_v17 = vadd.f32 %v7613_v51, %v5624_v8  ;;  %v4950_v24 = vpop.f32.mrb[79].mxu0  ;;  %v4623_v53 = vld [vmem:[#allocation4 + $0x1c0] sm:$0xff]  ;;  %v4624_v8 = vld [vmem:[#allocation4 + $0x1c8] sm:$0xff] }
 0x67b   :  { %v5070_v19 = vadd.f32 %v4948_v16, %v4611_v9  ;;  %v4951_v15 = vadd.f32 %v7613_v51, %v4950_v24  ;;  %v4626_v9 = vld [vmem:[#allocation4 + $0x1d8] sm:$0xff] }
 0x67c   :  { %v5136_v62 = vmax.f32 %v5072_v4, 0.0  ;;  %v5073_v52 = vadd.f32 %v4959_v17, %v4614_v18 }
 0x67d   :  { %v5134_v45 = vmax.f32 %v5070_v19, 0.0  ;;  %v5071_v26 = vadd.f32 %v4951_v15, %v4612_v47 }
 0x67e   :  { %5200 = vst.msk [vmem:[#allocation7 + $0x170] sm:$0xff] %vm153_vm2, %v5136_v62  ;;  %v5137_v27 = vmax.f32 %v5073_v52, 0.0 }
 0x67f   :  { %5198 = vst.msk [vmem:[#allocation7 + $0x160] sm:$0xff] %vm153_vm2, %v5134_v45  ;;  %v5135_v33 = vmax.f32 %v5071_v26, 0.0  ;;  %v4629_v26 = vld [vmem:[#allocation4 + $0x1f0] sm:$0xff] }
 0x680   :  { %5201 = vst.msk [vmem:[#allocation7 + $0x178] sm:$0xff] %vm153_vm2, %v5137_v27 }
 0x681   :  { %5199 = vst.msk [vmem:[#allocation7 + $0x168] sm:$0xff] %vm153_vm2, %v5135_v33 }
 0x69f   :  { %v5627_v40 = vpop.f32.mrb[80].mxu0 }
 0x6a0   :  { %v4972_v61 = vadd.f32 %v7613_v51, %v5627_v40  ;;  %v4963_v42 = vpop.f32.mrb[81].mxu0 }
 0x6a1   :  { %v4964_v57 = vadd.f32 %v7613_v51, %v4963_v42  ;;  %v5628_v46 = vpop.f32.mrb[82].mxu0 }
 0x6a2   :  { %v5076_v20 = vadd.f32 %v4972_v61, %v4617_v48  ;;  %v4975_v50 = vadd.f32 %v7613_v51, %v5628_v46  ;;  %v4966_v44 = vpop.f32.mrb[83].mxu0  ;;  %v4627_v48 = vld [vmem:[#allocation4 + $0x1e0] sm:$0xff]  ;;  %v4628_v46 = vld [vmem:[#allocation4 + $0x1e8] sm:$0xff] }
 0x6a3   :  { %v5074_v49 = vadd.f32 %v4964_v57, %v4615_v41  ;;  %v4967_v5 = vadd.f32 %v7613_v51, %v4966_v44  ;;  %v4630_v41 = vld [vmem:[#allocation4 + $0x1f8] sm:$0xff] }
 0x6a4   :  { %v5140_v23 = vmax.f32 %v5076_v20, 0.0  ;;  %v5077_v25 = vadd.f32 %v4975_v50, %v4618_v63 }
 0x6a5   :  { %v5138_v28 = vmax.f32 %v5074_v49, 0.0  ;;  %v5075_v0 = vadd.f32 %v4967_v5, %v4616_v22 }
 0x6a6   :  { %5204 = vst.msk [vmem:[#allocation7 + $0x190] sm:$0xff] %vm153_vm2, %v5140_v23  ;;  %v5141_v43 = vmax.f32 %v5077_v25, 0.0 }
 0x6a7   :  { %5202 = vst.msk [vmem:[#allocation7 + $0x180] sm:$0xff] %vm153_vm2, %v5138_v28  ;;  %v5139_v56 = vmax.f32 %v5075_v0, 0.0 }
 0x6a8   :  { %5205 = vst.msk [vmem:[#allocation7 + $0x198] sm:$0xff] %vm153_vm2, %v5141_v43 }
 0x6a9   :  { %5203 = vst.msk [vmem:[#allocation7 + $0x188] sm:$0xff] %vm153_vm2, %v5139_v56 }
 0x6c7   :  { %v5631_v37 = vpop.f32.mrb[84].mxu0 }
 0x6c8   :  { %v4988_v10 = vadd.f32 %v7613_v51, %v5631_v37  ;;  %v4979_v59 = vpop.f32.mrb[85].mxu0 }
 0x6c9   :  { %v4980_v12 = vadd.f32 %v7613_v51, %v4979_v59  ;;  %v5632_v35 = vpop.f32.mrb[86].mxu0 }
 0x6ca   :  { %v5080_v38 = vadd.f32 %v4988_v10, %v4621_v54  ;;  %v4991_v1 = vadd.f32 %v7613_v51, %v5632_v35  ;;  %v4982_v36 = vpop.f32.mrb[87].mxu0 }
 0x6cb   :  { %v5078_v2 = vadd.f32 %v4980_v12, %v4619_v11  ;;  %v4983_v30 = vadd.f32 %v7613_v51, %v4982_v36 }
 0x6cc   :  { %v5144_v14 = vmax.f32 %v5080_v38, 0.0  ;;  %v5081_v34 = vadd.f32 %v4991_v1, %v4622_v13 }
 0x6cd   :  { %v5142_v3 = vmax.f32 %v5078_v2, 0.0  ;;  %v5079_v31 = vadd.f32 %v4983_v30, %v4620_v29 }
 0x6ce   :  { %5208 = vst.msk [vmem:[#allocation7 + $0x1b0] sm:$0xff] %vm153_vm2, %v5144_v14  ;;  %v5145_v39 = vmax.f32 %v5081_v34, 0.0 }
 0x6cf   :  { %5206 = vst.msk [vmem:[#allocation7 + $0x1a0] sm:$0xff] %vm153_vm2, %v5142_v3  ;;  %v5143_v55 = vmax.f32 %v5079_v31, 0.0 }
 0x6d0   :  { %5209 = vst.msk [vmem:[#allocation7 + $0x1b8] sm:$0xff] %vm153_vm2, %v5145_v39 }
 0x6d1   :  { %5207 = vst.msk [vmem:[#allocation7 + $0x1a8] sm:$0xff] %vm153_vm2, %v5143_v55 }
 0x6ef   :  { %v5635_v21 = vpop.f32.mrb[88].mxu0 }
 0x6f0   :  { %v5004_v60 = vadd.f32 %v7613_v51, %v5635_v21  ;;  %v4995_v58 = vpop.f32.mrb[89].mxu0 }
 0x6f1   :  { %v4996_v7 = vadd.f32 %v7613_v51, %v4995_v58  ;;  %v5636_v6 = vpop.f32.mrb[90].mxu0 }
 0x6f2   :  { %v5084_v16 = vadd.f32 %v5004_v60, %v4625_v32  ;;  %v5007_v18 = vadd.f32 %v7613_v51, %v5636_v6  ;;  %v4998_v4 = vpop.f32.mrb[91].mxu0 }
 0x6f3   :  { %v5082_v17 = vadd.f32 %v4996_v7, %v4623_v53  ;;  %v4999_v47 = vadd.f32 %v7613_v51, %v4998_v4 }
 0x6f4   :  { %v5148_v24 = vmax.f32 %v5084_v16, 0.0  ;;  %v5085_v19 = vadd.f32 %v5007_v18, %v4626_v9 }
 0x6f5   :  { %v5146_v15 = vmax.f32 %v5082_v17, 0.0  ;;  %v5083_v62 = vadd.f32 %v4999_v47, %v4624_v8 }
 0x6f6   :  { %5212 = vst.msk [vmem:[#allocation7 + $0x1d0] sm:$0xff] %vm153_vm2, %v5148_v24  ;;  %v5149_v52 = vmax.f32 %v5085_v19, 0.0 }
 0x6f7   :  { %5210 = vst.msk [vmem:[#allocation7 + $0x1c0] sm:$0xff] %vm153_vm2, %v5146_v15  ;;  %v5147_v45 = vmax.f32 %v5083_v62, 0.0 }
 0x6f8   :  { %5213 = vst.msk [vmem:[#allocation7 + $0x1d8] sm:$0xff] %vm153_vm2, %v5149_v52 }
 0x6f9   :  { %5211 = vst.msk [vmem:[#allocation7 + $0x1c8] sm:$0xff] %vm153_vm2, %v5147_v45 }
 0x717   :  { %v5639_v27 = vpop.f32.mrb[92].mxu0 }
 0x718   :  { %v5020_v33 = vadd.f32 %v7613_v51, %v5639_v27  ;;  %v5011_v40 = vpop.f32.mrb[93].mxu0 }
 0x719   :  { %v5012_v61 = vadd.f32 %v7613_v51, %v5011_v40  ;;  %v5640_v42 = vpop.f32.mrb[94].mxu0 }
 0x71a   :  { %v5088_v57 = vadd.f32 %v5020_v33, %v4629_v26  ;;  %v5023_v63 = vadd.f32 %v7613_v51, %v5640_v42  ;;  %v5014_v20 = vpop.f32.mrb[95].mxu0 }
 0x71b   :  { %v5086_v50 = vadd.f32 %v5012_v61, %v4627_v48  ;;  %v5015_v22 = vadd.f32 %v7613_v51, %v5014_v20 }
 0x71c   :  { %v5152_v44 = vmax.f32 %v5088_v57, 0.0  ;;  %v5089_v49 = vadd.f32 %v5023_v63, %v4630_v41 }
 0x71d   :  { %v5150_v5 = vmax.f32 %v5086_v50, 0.0  ;;  %v5087_v23 = vadd.f32 %v5015_v22, %v4628_v46 }
 0x71e   :  { %5216 = vst.msk [vmem:[#allocation7 + $0x1f0] sm:$0xff] %vm153_vm2, %v5152_v44  ;;  %v5153_v25 = vmax.f32 %v5089_v49, 0.0 }
 0x71f   :  { %5214 = vst.msk [vmem:[#allocation7 + $0x1e0] sm:$0xff] %vm153_vm2, %v5150_v5  ;;  %v5151_v28 = vmax.f32 %v5087_v23, 0.0 }
 0x720   :  { %5217 = vst.msk [vmem:[#allocation7 + $0x1f8] sm:$0xff] %vm153_vm2, %v5153_v25 }
 0x721   :  { %5215 = vst.msk [vmem:[#allocation7 + $0x1e8] sm:$0xff] %vm153_vm2, %v5151_v28 }
 0x722   :  { %5697 = shalt.err (!%p5694_p12)
}
 0x723   :  { %s5698_s18 = scalar_lea.hbm %s7726_s7, 8192 }
 0x724   :  { %p5699_p13 = scmp.ne.s32.totalorder %s7726_s7, %s5698_s18  ;;  %p5702_p0 = scmp.lt.u32.totalorder %s5698_s18, %s7726_s7 }
 0x726   :  { %p5704_p1 = pnand %p5702_p0, %p5699_p13 }
 0x728   :  { %5707 = shalt.err (!%p5704_p1)
}
 0x729   :  { %5229 = dma.vmem_to_hbm [thread:$0]  %s5224_s1, 8192, %s7726_s7, [#allocation6], %s5713_s11, %s5713_s11, %s5714_s12  }
 0x72a   :  { %5710 = dma.done.wait [#allocation6], 8192  }
 0x72b   :  { %5711 = vsyncadd [#allocation6], 4294959104 }
 0x72c   :  { %5233 = vsyncpa [#allocation5], 1 }
 0x72d   :  { %5234 = vsyncpa [#allocation6], 1 }

</bundles_post_ra>
